<compile_context>
chip_gen: v5e
topology: v5e:2x2
jax: 0.10.0
libtpu: 0.0.40
codegen_flags: <defaults>
</compile_context>

<pallas_src>
from functools import partial

import jax
import jax.numpy as jnp
from jax.experimental import pallas as pl
from jax.experimental.pallas import tpu as pltpu


HIDDEN_DIM = 500
Z_DIM = 20
IN_DIM = 28 * 28  # 784


def _pick_batch_tile(batch):
    """Largest useful batch tile.

    The whole working set (bf16 weights ~1.6 MiB + per-tile activations) is
    tiny, so the only thing a small tile buys is per-grid-step overhead and
    underfilled MXU pushes.  Take the full batch when it is modest; otherwise
    the largest MXU-row-aligned divisor (256 fills a v6e/v7x MXU row pair,
    128 fills v5e).
    """
    if batch <= 1024:
        return batch
    for tb in (1024, 512, 256, 128, 64, 32, 16, 8):
        if batch % tb == 0:
            return tb
    return batch  # non-divisible odd batch: single full-batch block


def vae_kernel(
    x_ref,       # [TB, 784] f32  (batch tile, streamed)
    eps_ref,     # [TB, Z]   f32  (reparameterization noise, streamed)
    w_enc_ref,   # [784, H]  bf16 (resident)
    b_enc_ref,   # [1, H]    f32
    w_mu_ref,    # [H, Z]    bf16
    b_mu_ref,    # [1, Z]    f32
    w_std_ref,   # [H, Z]    bf16
    b_std_ref,   # [1, Z]    f32
    w_d1_ref,    # [Z, H]    bf16
    b_d1_ref,    # [1, H]    f32
    w_d2_ref,    # [H, 784]  bf16
    b_d2_ref,    # [1, 784]  f32
    out_ref,     # [1, 1, 1] f32  per-tile partial loss
):
    x = x_ref[...]                         # f32 copy kept for the BCE term
    x_bf = x.astype(jnp.bfloat16)

    # ---- Encoder ----
    h = jnp.dot(x_bf, w_enc_ref[...], preferred_element_type=jnp.float32)
    h = jnp.maximum(h + b_enc_ref[...], 0.0)                       # ReLU (f32)
    h_bf = h.astype(jnp.bfloat16)

    mean = jnp.dot(h_bf, w_mu_ref[...],
                   preferred_element_type=jnp.float32) + b_mu_ref[...]
    log_std = jnp.dot(h_bf, w_std_ref[...],
                      preferred_element_type=jnp.float32) + b_std_ref[...]
    std = jnp.exp(log_std)

    # ---- Reparameterization ----
    z = mean + eps_ref[...] * std

    # ---- Decoder (sigmoid folded into the logits-form BCE below) ----
    hd = jnp.dot(z.astype(jnp.bfloat16), w_d1_ref[...],
                 preferred_element_type=jnp.float32)
    hd = jnp.maximum(hd + b_d1_ref[...], 0.0)                      # ReLU (f32)
    logits = jnp.dot(hd.astype(jnp.bfloat16), w_d2_ref[...],
                     preferred_element_type=jnp.float32) + b_d2_ref[...]

    # ---- Bernoulli (BCE) reconstruction loss, logits form ----
    #   -[x*log(sigmoid(l)) + (1-x)*log(1-sigmoid(l))] == softplus(l) - x*l
    softplus = jnp.maximum(logits, 0.0) + jnp.log1p(jnp.exp(-jnp.abs(logits)))
    bce = softplus - x * logits
    bernoulli_loss = jnp.sum(jnp.sum(bce, axis=-1, keepdims=True))

    # ---- KL divergence:  -0.5 * sum(1 + 2*log_std - mean^2 - std^2) ----
    # (reference uses log(std^2 + 1e-5); difference is O(1e-5) per element)
    var = std * std
    kl_terms = 1.0 + 2.0 * log_std - mean * mean - var
    kl_loss = -0.5 * jnp.sum(jnp.sum(kl_terms, axis=-1, keepdims=True))

    out_ref[...] = jnp.broadcast_to(bernoulli_loss + kl_loss, out_ref.shape)


def prepare_params(params):
    """One-time conversion to the kernel layout: bf16 weights, f32 biases.

    Call once outside the training step so the per-call forward does not
    re-run f32->bf16 casts as separate XLA ops.
    """
    (w_enc, b_enc, w_mu, b_mu, w_std, b_std, w_d1, b_d1, w_d2, b_d2) = params
    return (
        w_enc.astype(jnp.bfloat16), b_enc,
        w_mu.astype(jnp.bfloat16), b_mu,
        w_std.astype(jnp.bfloat16), b_std,
        w_d1.astype(jnp.bfloat16), b_d1,
        w_d2.astype(jnp.bfloat16), b_d2,
    )


@partial(jax.jit, static_argnames=("batch_tile",))
def vae_forward(x, eps, fused_params, *, batch_tile=None):
    """Negative ELBO (summed over the batch), same semantics as VAE.forward.

    `fused_params` must come from prepare_params().  `batch_tile` overrides
    the automatic tile choice (must divide the batch); mainly for testing.
    """
    (w_enc, b_enc, w_mu, b_mu, w_std, b_std, w_d1, b_d1, w_d2, b_d2) = fused_params
    batch = x.shape[0]
    tb = batch_tile if batch_tile is not None else _pick_batch_tile(batch)
    assert batch % tb == 0, "batch_tile must divide the batch"
    num_tiles = batch // tb

    def resident(shape):
        # Same block index every grid step -> fetched once, stays in VMEM.
        return pl.BlockSpec(shape, lambda i: (0, 0))

    operands = (x, eps, w_enc, b_enc, w_mu, b_mu, w_std, b_std,
                w_d1, b_d1, w_d2, b_d2)
    in_specs = [
        pl.BlockSpec((tb, IN_DIM), lambda i: (i, 0)),   # x: batch-tiled
        pl.BlockSpec((tb, Z_DIM), lambda i: (i, 0)),    # eps: batch-tiled
    ] + [resident(a.shape) for a in operands[2:]]

    partials = pl.pallas_call(
        vae_kernel,
        out_shape=jax.ShapeDtypeStruct((num_tiles, 1, 1), jnp.float32),
        grid=(num_tiles,),
        in_specs=in_specs,
        # Per-tile partial sums -> grid axis is embarrassingly parallel
        # (lets v7x shard the grid across both TensorCores).
        out_specs=pl.BlockSpec((1, 1, 1), lambda i: (i, 0, 0)),
        compiler_params=pltpu.CompilerParams(
            dimension_semantics=("parallel",)),
    )(*operands)
    return jnp.sum(partials)


def init_params(key, hidden_dim=HIDDEN_DIM, z_dim=Z_DIM, in_dim=IN_DIM):
    """PyTorch-Linear-style init (uniform +/- 1/sqrt(fan_in)).

    Weights are stored as [in_features, out_features] (transposed vs torch).
    Biases are stored as [1, out_features].
    """
    def linear(k, fan_in, fan_out):
        kw, kb = jax.random.split(k)
        bound = 1.0 / jnp.sqrt(fan_in)
        w = jax.random.uniform(kw, (fan_in, fan_out), jnp.float32,
                               minval=-bound, maxval=bound)
        b = jax.random.uniform(kb, (1, fan_out), jnp.float32,
                               minval=-bound, maxval=bound)
        return w, b

    k1, k2, k3, k4, k5 = jax.random.split(key, 5)
    w_enc, b_enc = linear(k1, in_dim, hidden_dim)     # encoder.linear
    w_mu, b_mu = linear(k2, hidden_dim, z_dim)        # encoder.mean_lin
    w_std, b_std = linear(k3, hidden_dim, z_dim)      # encoder.std_lin
    w_d1, b_d1 = linear(k4, z_dim, hidden_dim)        # decoder.linear1
    w_d2, b_d2 = linear(k5, hidden_dim, in_dim)       # decoder.linear2
    return (w_enc, b_enc, w_mu, b_mu, w_std, b_std, w_d1, b_d1, w_d2, b_d2)


if __name__ == "__main__":
    key = jax.random.PRNGKey(0)
    k_params, k_x, k_eps = jax.random.split(key, 3)

    batch = 32
    params = init_params(k_params)
    fused = prepare_params(params)   # one-time bf16 layout

    # Pixel intensities in [0, 1] (MNIST-like), flattened 1x28x28 -> 784.
    x = jax.random.uniform(k_x, (batch, IN_DIM), jnp.float32)
    # Reparameterization noise: the torch code draws np.random.normal inside
    # forward(); here it is drawn deterministically outside and fed in.
    eps = jax.random.normal(k_eps, (batch, Z_DIM), jnp.float32)

    # Forced small tile to exercise the multi-tile parallel partial-sum path
    # (grid=(4,)); production calls use the automatic full/aligned tile.
    neg_elbo_tiled = vae_forward(x, eps, fused, batch_tile=8)
    jax.block_until_ready(neg_elbo_tiled)

    # Auto tile: batch <= 1024 -> single full-batch block, grid=(1,).
    neg_elbo = vae_forward(x, eps, fused)
    jax.block_until_ready(neg_elbo)

    # Basic sanity: finite scalar, tiling-invariant result.
    assert neg_elbo.shape == ()
    assert bool(jnp.isfinite(neg_elbo))
    assert bool(jnp.allclose(neg_elbo, neg_elbo_tiled, rtol=1e-3, atol=1e-2))

    print("KERNEL_OK")
</pallas_src>

<mosaic_0001>
module attributes {stable_mosaic.version = 11 : i64} {
  func.func @vae_kernel(%arg0: i32, %arg1: memref<8x784xf32, #tpu.memory_space<vmem>>, %arg2: memref<8x20xf32, #tpu.memory_space<vmem>>, %arg3: memref<784x500xbf16, #tpu.memory_space<vmem>>, %arg4: memref<1x500xf32, #tpu.memory_space<vmem>>, %arg5: memref<500x20xbf16, #tpu.memory_space<vmem>>, %arg6: memref<1x20xf32, #tpu.memory_space<vmem>>, %arg7: memref<500x20xbf16, #tpu.memory_space<vmem>>, %arg8: memref<1x20xf32, #tpu.memory_space<vmem>>, %arg9: memref<20x500xbf16, #tpu.memory_space<vmem>>, %arg10: memref<1x500xf32, #tpu.memory_space<vmem>>, %arg11: memref<500x784xbf16, #tpu.memory_space<vmem>>, %arg12: memref<1x784xf32, #tpu.memory_space<vmem>>, %arg13: memref<1x1x1xf32, #tpu.memory_space<vmem>>) attributes {dimension_semantics = [#tpu.dimension_semantics<parallel>], iteration_bounds = array<i64: 4>, scalar_prefetch = 0 : i64, scratch_operands = 0 : i64, tpu.core_type = #tpu.core_type<tc>, window_params = [{transform_indices = @transform_0, window_bounds = array<i64: 8, 784>}, {transform_indices = @transform_1, window_bounds = array<i64: 8, 20>}, {pipeline_mode = #tpu.pipeline_mode<synchronous>, transform_indices = @transform_2, window_bounds = array<i64: 784, 500>}, {pipeline_mode = #tpu.pipeline_mode<synchronous>, transform_indices = @transform_3, window_bounds = array<i64: 1, 500>}, {pipeline_mode = #tpu.pipeline_mode<synchronous>, transform_indices = @transform_4, window_bounds = array<i64: 500, 20>}, {pipeline_mode = #tpu.pipeline_mode<synchronous>, transform_indices = @transform_5, window_bounds = array<i64: 1, 20>}, {pipeline_mode = #tpu.pipeline_mode<synchronous>, transform_indices = @transform_6, window_bounds = array<i64: 500, 20>}, {pipeline_mode = #tpu.pipeline_mode<synchronous>, transform_indices = @transform_7, window_bounds = array<i64: 1, 20>}, {pipeline_mode = #tpu.pipeline_mode<synchronous>, transform_indices = @transform_8, window_bounds = array<i64: 20, 500>}, {pipeline_mode = #tpu.pipeline_mode<synchronous>, transform_indices = @transform_9, window_bounds = array<i64: 1, 500>}, {pipeline_mode = #tpu.pipeline_mode<synchronous>, transform_indices = @transform_10, window_bounds = array<i64: 500, 784>}, {pipeline_mode = #tpu.pipeline_mode<synchronous>, transform_indices = @transform_11, window_bounds = array<i64: 1, 784>}, {transform_indices = @transform_12, window_bounds = array<i64: 1, 1, 1>}]} {
    %c0 = arith.constant 0 : index
    %c0_0 = arith.constant 0 : index
    %0 = vector.load %arg1[%c0, %c0_0] : memref<8x784xf32, #tpu.memory_space<vmem>>, vector<8x784xf32>
    %1 = arith.truncf %0 : vector<8x784xf32> to vector<8x784xbf16>
    %c0_1 = arith.constant 0 : index
    %c0_2 = arith.constant 0 : index
    %2 = vector.load %arg3[%c0_1, %c0_2] : memref<784x500xbf16, #tpu.memory_space<vmem>>, vector<784x500xbf16>
    %cst = arith.constant dense<0.000000e+00> : vector<8x500xf32>
    %3 = tpu.matmul %1, %2, %cst {dimension_numbers = #tpu.dot_dimension_numbers<[1], [0], [0], [1], [0, 0, 1, 1], [], []>} : vector<8x784xbf16>, vector<784x500xbf16>, vector<8x500xf32> -> vector<8x500xf32>
    %c0_3 = arith.constant 0 : index
    %c0_4 = arith.constant 0 : index
    %4 = vector.load %arg4[%c0_3, %c0_4] : memref<1x500xf32, #tpu.memory_space<vmem>>, vector<1x500xf32>
    %5 = vector.broadcast %4 : vector<1x500xf32> to vector<8x500xf32>
    %6 = arith.addf %3, %5 : vector<8x500xf32>
    %cst_5 = arith.constant 0.000000e+00 : f32
    %7 = vector.broadcast %cst_5 : f32 to vector<8x500xf32>
    %8 = arith.maximumf %6, %7 : vector<8x500xf32>
    %9 = arith.truncf %8 : vector<8x500xf32> to vector<8x500xbf16>
    %c0_6 = arith.constant 0 : index
    %c0_7 = arith.constant 0 : index
    %10 = vector.load %arg5[%c0_6, %c0_7] : memref<500x20xbf16, #tpu.memory_space<vmem>>, vector<500x20xbf16>
    %cst_8 = arith.constant dense<0.000000e+00> : vector<8x20xf32>
    %11 = tpu.matmul %9, %10, %cst_8 {dimension_numbers = #tpu.dot_dimension_numbers<[1], [0], [0], [1], [0, 0, 1, 1], [], []>} : vector<8x500xbf16>, vector<500x20xbf16>, vector<8x20xf32> -> vector<8x20xf32>
    %c0_9 = arith.constant 0 : index
    %c0_10 = arith.constant 0 : index
    %12 = vector.load %arg6[%c0_9, %c0_10] : memref<1x20xf32, #tpu.memory_space<vmem>>, vector<1x20xf32>
    %13 = vector.broadcast %12 : vector<1x20xf32> to vector<8x20xf32>
    %14 = arith.addf %11, %13 : vector<8x20xf32>
    %c0_11 = arith.constant 0 : index
    %c0_12 = arith.constant 0 : index
    %15 = vector.load %arg7[%c0_11, %c0_12] : memref<500x20xbf16, #tpu.memory_space<vmem>>, vector<500x20xbf16>
    %cst_13 = arith.constant dense<0.000000e+00> : vector<8x20xf32>
    %16 = tpu.matmul %9, %15, %cst_13 {dimension_numbers = #tpu.dot_dimension_numbers<[1], [0], [0], [1], [0, 0, 1, 1], [], []>} : vector<8x500xbf16>, vector<500x20xbf16>, vector<8x20xf32> -> vector<8x20xf32>
    %c0_14 = arith.constant 0 : index
    %c0_15 = arith.constant 0 : index
    %17 = vector.load %arg8[%c0_14, %c0_15] : memref<1x20xf32, #tpu.memory_space<vmem>>, vector<1x20xf32>
    %18 = vector.broadcast %17 : vector<1x20xf32> to vector<8x20xf32>
    %19 = arith.addf %16, %18 : vector<8x20xf32>
    %20 = math.exp %19 : vector<8x20xf32>
    %c0_16 = arith.constant 0 : index
    %c0_17 = arith.constant 0 : index
    %21 = vector.load %arg2[%c0_16, %c0_17] : memref<8x20xf32, #tpu.memory_space<vmem>>, vector<8x20xf32>
    %22 = arith.mulf %21, %20 : vector<8x20xf32>
    %23 = arith.addf %14, %22 : vector<8x20xf32>
    %24 = arith.truncf %23 : vector<8x20xf32> to vector<8x20xbf16>
    %c0_18 = arith.constant 0 : index
    %c0_19 = arith.constant 0 : index
    %25 = vector.load %arg9[%c0_18, %c0_19] : memref<20x500xbf16, #tpu.memory_space<vmem>>, vector<20x500xbf16>
    %cst_20 = arith.constant dense<0.000000e+00> : vector<8x500xf32>
    %26 = tpu.matmul %24, %25, %cst_20 {dimension_numbers = #tpu.dot_dimension_numbers<[1], [0], [0], [1], [0, 0, 1, 1], [], []>} : vector<8x20xbf16>, vector<20x500xbf16>, vector<8x500xf32> -> vector<8x500xf32>
    %c0_21 = arith.constant 0 : index
    %c0_22 = arith.constant 0 : index
    %27 = vector.load %arg10[%c0_21, %c0_22] : memref<1x500xf32, #tpu.memory_space<vmem>>, vector<1x500xf32>
    %28 = vector.broadcast %27 : vector<1x500xf32> to vector<8x500xf32>
    %29 = arith.addf %26, %28 : vector<8x500xf32>
    %cst_23 = arith.constant 0.000000e+00 : f32
    %30 = vector.broadcast %cst_23 : f32 to vector<8x500xf32>
    %31 = arith.maximumf %29, %30 : vector<8x500xf32>
    %32 = arith.truncf %31 : vector<8x500xf32> to vector<8x500xbf16>
    %c0_24 = arith.constant 0 : index
    %c0_25 = arith.constant 0 : index
    %33 = vector.load %arg11[%c0_24, %c0_25] : memref<500x784xbf16, #tpu.memory_space<vmem>>, vector<500x784xbf16>
    %cst_26 = arith.constant dense<0.000000e+00> : vector<8x784xf32>
    %34 = tpu.matmul %32, %33, %cst_26 {dimension_numbers = #tpu.dot_dimension_numbers<[1], [0], [0], [1], [0, 0, 1, 1], [], []>} : vector<8x500xbf16>, vector<500x784xbf16>, vector<8x784xf32> -> vector<8x784xf32>
    %c0_27 = arith.constant 0 : index
    %c0_28 = arith.constant 0 : index
    %35 = vector.load %arg12[%c0_27, %c0_28] : memref<1x784xf32, #tpu.memory_space<vmem>>, vector<1x784xf32>
    %36 = vector.broadcast %35 : vector<1x784xf32> to vector<8x784xf32>
    %37 = arith.addf %34, %36 : vector<8x784xf32>
    %cst_29 = arith.constant 0.000000e+00 : f32
    %38 = vector.broadcast %cst_29 : f32 to vector<8x784xf32>
    %39 = arith.maximumf %37, %38 : vector<8x784xf32>
    %40 = math.absf %37 : vector<8x784xf32>
    %cst_30 = arith.constant 0.000000e+00 : f32
    %41 = vector.broadcast %cst_30 : f32 to vector<8x784xf32>
    %42 = arith.subf %41, %40 : vector<8x784xf32>
    %43 = math.exp %42 : vector<8x784xf32>
    %44 = math.log1p %43 : vector<8x784xf32>
    %45 = arith.addf %39, %44 : vector<8x784xf32>
    %46 = arith.mulf %0, %37 : vector<8x784xf32>
    %47 = arith.subf %45, %46 : vector<8x784xf32>
    %cst_31 = arith.constant dense<0.000000e+00> : vector<8xf32>
    %48 = vector.multi_reduction <add>, %47, %cst_31 [1] : vector<8x784xf32> to vector<8xf32>
    %49 = vector.shape_cast %48 : vector<8xf32> to vector<8x1xf32>
    %50 = vector.shape_cast %49 : vector<8x1xf32> to vector<1x8x1xf32>
    %cst_32 = arith.constant dense<0.000000e+00> : vector<1xf32>
    %51 = vector.multi_reduction <add>, %50, %cst_32 [1, 2] : vector<1x8x1xf32> to vector<1xf32>
    %52 = vector.shape_cast %51 : vector<1xf32> to vector<1x1x1xf32>
    %53 = vector.extract %52[0, 0, 0] : f32 from vector<1x1x1xf32>
    %54 = arith.mulf %20, %20 : vector<8x20xf32>
    %cst_33 = arith.constant 2.000000e+00 : f32
    %55 = vector.broadcast %cst_33 : f32 to vector<8x20xf32>
    %56 = arith.mulf %55, %19 : vector<8x20xf32>
    %cst_34 = arith.constant 1.000000e+00 : f32
    %57 = vector.broadcast %cst_34 : f32 to vector<8x20xf32>
    %58 = arith.addf %57, %56 : vector<8x20xf32>
    %59 = arith.mulf %14, %14 : vector<8x20xf32>
    %60 = arith.subf %58, %59 : vector<8x20xf32>
    %61 = arith.subf %60, %54 : vector<8x20xf32>
    %cst_35 = arith.constant dense<0.000000e+00> : vector<8xf32>
    %62 = vector.multi_reduction <add>, %61, %cst_35 [1] : vector<8x20xf32> to vector<8xf32>
    %63 = vector.shape_cast %62 : vector<8xf32> to vector<8x1xf32>
    %64 = vector.shape_cast %63 : vector<8x1xf32> to vector<1x8x1xf32>
    %cst_36 = arith.constant dense<0.000000e+00> : vector<1xf32>
    %65 = vector.multi_reduction <add>, %64, %cst_36 [1, 2] : vector<1x8x1xf32> to vector<1xf32>
    %66 = vector.shape_cast %65 : vector<1xf32> to vector<1x1x1xf32>
    %67 = vector.extract %66[0, 0, 0] : f32 from vector<1x1x1xf32>
    %cst_37 = arith.constant -5.000000e-01 : f32
    %68 = arith.mulf %cst_37, %67 : f32
    %69 = arith.addf %53, %68 : f32
    %70 = vector.broadcast %69 : f32 to vector<1x1x1xf32>
    %c0_38 = arith.constant 0 : index
    %c0_39 = arith.constant 0 : index
    %c0_40 = arith.constant 0 : index
    %71 = vector.load %arg13[%c0_38, %c0_39, %c0_40] : memref<1x1x1xf32, #tpu.memory_space<vmem>>, vector<1x1x1xf32>
    tpu.vector_store %arg13[%c0_38, %c0_39, %c0_40], %70 {strides = array<i32>} : memref<1x1x1xf32, #tpu.memory_space<vmem>>, vector<1x1x1xf32>,
    return
  }
  func.func @transform_0(%arg0: i32) -> (i32, i32) {
    %c0_i32 = arith.constant 0 : i32
    %c0_i32_0 = arith.constant 0 : i32
    return %arg0, %c0_i32 : i32, i32
  }
  func.func @transform_1(%arg0: i32) -> (i32, i32) {
    %c0_i32 = arith.constant 0 : i32
    %c0_i32_0 = arith.constant 0 : i32
    return %arg0, %c0_i32 : i32, i32
  }
  func.func @transform_2(%arg0: i32) -> (i32, i32) {
    %c0_i32 = arith.constant 0 : i32
    %c0_i32_0 = arith.constant 0 : i32
    %c0_i32_1 = arith.constant 0 : i32
    return %c0_i32, %c0_i32_0 : i32, i32
  }
  func.func @transform_3(%arg0: i32) -> (i32, i32) {
    %c0_i32 = arith.constant 0 : i32
    %c0_i32_0 = arith.constant 0 : i32
    %c0_i32_1 = arith.constant 0 : i32
    return %c0_i32, %c0_i32_0 : i32, i32
  }
  func.func @transform_4(%arg0: i32) -> (i32, i32) {
    %c0_i32 = arith.constant 0 : i32
    %c0_i32_0 = arith.constant 0 : i32
    %c0_i32_1 = arith.constant 0 : i32
    return %c0_i32, %c0_i32_0 : i32, i32
  }
  func.func @transform_5(%arg0: i32) -> (i32, i32) {
    %c0_i32 = arith.constant 0 : i32
    %c0_i32_0 = arith.constant 0 : i32
    %c0_i32_1 = arith.constant 0 : i32
    return %c0_i32, %c0_i32_0 : i32, i32
  }
  func.func @transform_6(%arg0: i32) -> (i32, i32) {
    %c0_i32 = arith.constant 0 : i32
    %c0_i32_0 = arith.constant 0 : i32
    %c0_i32_1 = arith.constant 0 : i32
    return %c0_i32, %c0_i32_0 : i32, i32
  }
  func.func @transform_7(%arg0: i32) -> (i32, i32) {
    %c0_i32 = arith.constant 0 : i32
    %c0_i32_0 = arith.constant 0 : i32
    %c0_i32_1 = arith.constant 0 : i32
    return %c0_i32, %c0_i32_0 : i32, i32
  }
  func.func @transform_8(%arg0: i32) -> (i32, i32) {
    %c0_i32 = arith.constant 0 : i32
    %c0_i32_0 = arith.constant 0 : i32
    %c0_i32_1 = arith.constant 0 : i32
    return %c0_i32, %c0_i32_0 : i32, i32
  }
  func.func @transform_9(%arg0: i32) -> (i32, i32) {
    %c0_i32 = arith.constant 0 : i32
    %c0_i32_0 = arith.constant 0 : i32
    %c0_i32_1 = arith.constant 0 : i32
    return %c0_i32, %c0_i32_0 : i32, i32
  }
  func.func @transform_10(%arg0: i32) -> (i32, i32) {
    %c0_i32 = arith.constant 0 : i32
    %c0_i32_0 = arith.constant 0 : i32
    %c0_i32_1 = arith.constant 0 : i32
    return %c0_i32, %c0_i32_0 : i32, i32
  }
  func.func @transform_11(%arg0: i32) -> (i32, i32) {
    %c0_i32 = arith.constant 0 : i32
    %c0_i32_0 = arith.constant 0 : i32
    %c0_i32_1 = arith.constant 0 : i32
    return %c0_i32, %c0_i32_0 : i32, i32
  }
  func.func @transform_12(%arg0: i32) -> (i32, i32, i32) {
    %c0_i32 = arith.constant 0 : i32
    %c0_i32_0 = arith.constant 0 : i32
    %c0_i32_1 = arith.constant 0 : i32
    return %arg0, %c0_i32, %c0_i32_0 : i32, i32, i32
  }
}

</mosaic_0001>

<bundles_post_ra>
// kernel: vae_forward.1
= control target key start
LH: loop header
LB: loop body
LE: loop exit
PB: predicated region body
PF: predicated region fallthrough
CT: control target
= control target key end

     0   :  { %s7317_s21 = smov 0   ;;  %s10262_s0 = inlined_call_operand.vmem [shape: f32[32,784], index: 0, kind: input, shape index: {}]   ;;  %s10263_s1 = inlined_call_operand.vmem [shape: f32[32,20], index: 1, kind: input, shape index: {}]   ;;  %s10264_s2 = inlined_call_operand.vmem [shape: bf16[784,500], index: 2, kind: input, shape index: {}]   ;;  %s10265_s3 = inlined_call_operand.vmem [shape: f32[1,500], index: 3, kind: input, shape index: {}]   ;;  %s10266_s4 = inlined_call_operand.vmem [shape: bf16[500,20], index: 4, kind: input, shape index: {}]   ;;  %s10267_s5 = inlined_call_operand.vmem [shape: f32[1,20], index: 5, kind: input, shape index: {}]   ;;  %s10268_s6 = inlined_call_operand.vmem [shape: bf16[500,20], index: 6, kind: input, shape index: {}]   ;;  %s10269_s7 = inlined_call_operand.vmem [shape: f32[1,20], index: 7, kind: input, shape index: {}]   ;;  %s10270_s8 = inlined_call_operand.vmem [shape: bf16[20,500], index: 8, kind: input, shape index: {}]   ;;  %s10271_s9 = inlined_call_operand.vmem [shape: f32[1,500], index: 9, kind: input, shape index: {}]   ;;  %s10272_s10 = inlined_call_operand.vmem [shape: bf16[500,784], index: 10, kind: input, shape index: {}]   ;;  %s10273_s11 = inlined_call_operand.vmem [shape: f32[1,784], index: 11, kind: input, shape index: {}]   ;;  %s10274_s12 = inlined_call_operand.vmem [shape: f32[4,1,1], index: 12, kind: output, shape index: {}]  }
   0x1 LB: > { %s4771_s22 = sadd.s32 4294967295, %s7250_s21   ;;  %p4775_p0 = scmp.ge.s32.totalorder %s7250_s21, 1  ;;  %s7250_s21 = sphi %s7317_s21, %s22_s21  }
   0x2   : > { %p371_p1 = scmp.lt.s32.totalorder %s7250_s21, 5 }
   0x4   : > { %p372_p2 = pnand %p4775_p0, %p371_p1 }
   0x5   : > { %p415_p3 = scmp.lt.s32.totalorder (!%p372_p2), %s4771_s22, 3 }
   0x6   : > { %375 = sbr.rel (%p372_p2) target bundleno = 1303 (0x517), region = 68 }
   0xb   : > { %v4892_v0 = vld [vmem:[%s10264_s2 + $0xe0] sm:$0xf]  ;;  %v6743_v1 = vld [vmem:[%s10264_s2 + $0xec] sm:$0xf0]  ;;  %s10276_s22 = smov (!%p415_p3, %s4771_s22), 3  ;;  %vm1628_vm0 = vcmask 130048  }
   0xc   : > { %v5020_v2 = vld [vmem:[%s10264_s2 + $0x1e0] sm:$0xf]  ;;  %v4893_v3 = vor.u32 %v6743_v1, %v4892_v0  ;;  %v6775_v4 = vld [vmem:[%s10264_s2 + $0x1ec] sm:$0xf0]  ;;  %s7192_s17 = smul.u32 56, %s10276_s22  ;;  %vm2264_vm1 = vcmask 1041408   ;;  %s426_s28 = scalar_lea.vmem %s10274_s12, %s10276_s22 }
   0xd   : > { %v5148_v5 = vld [vmem:[%s10264_s2 + $0x2e0] sm:$0xf]  ;;  %v6807_v6 = vld [vmem:[%s10264_s2 + $0x2ec] sm:$0xf0]  ;;  %v5021_v7 = vor.u32 %v6775_v4, %v5020_v2  ;;  %vm2260_vm2 = vcmask 949248   ;;  %s4777_s14 = sshll.u32 %s10276_s22, 3 }
   0xe   : > { %v5149_v8 = vor.u32 %v6807_v6, %v5148_v5  ;;  %v5276_v9 = vld [vmem:[%s10264_s2 + $0x3e0] sm:$0xf]  ;;  %v6839_v10 = vld [vmem:[%s10264_s2 + $0x3ec] sm:$0xf0]  ;;  %1632 = vmatpush.bf16.msra.mxu0 %v4893_v3  ;;  %s7557_s30 = scalar_lea.vmem %s10262_s0, %s7192_s17  ;;  %s423_s15 = scalar_lea.vmem %s10263_s1, %s4777_s14  ;;  %vm2683_vm3 = vcmask 162816   ;;  %vm4677_vm11 = vcmask 7168  }
   0xf   : > { %v4876_v11 = vld [vmem:[%s10264_s2 + $0xc0] sm:$0xf]  ;;  %v5277_v12 = vor.u32 %v6839_v10, %v5276_v9  ;;  %v6739_v13 = vld [vmem:[%s10264_s2 + $0xcc] sm:$0xf0]  ;;  %1645 = vmatpush.bf16.msra.mxu1 %v5021_v7  ;;  %vm4710_vm12 = vcmask 0  }
  0x10   : > { %v5004_v14 = vld [vmem:[%s10264_s2 + $0x1c0] sm:$0xf]  ;;  %v6771_v15 = vld [vmem:[%s10264_s2 + $0x1cc] sm:$0xf0]  ;;  %1658 = vmatpush.bf16.msra.mxu2 %v5149_v8  ;;  %v4877_v16 = vor.u32 %v6739_v13, %v4876_v11 }
  0x11   : > { %v5005_v17 = vor.u32 %v6771_v15, %v5004_v14  ;;  %v5132_v18 = vld [vmem:[%s10264_s2 + $0x2c0] sm:$0xf]  ;;  %v6803_v19 = vld [vmem:[%s10264_s2 + $0x2cc] sm:$0xf0]  ;;  %1671 = vmatpush.bf16.msra.mxu3 %v5277_v12 }
  0x12   : > { %v5260_v20 = vld [vmem:[%s10264_s2 + $0x3c0] sm:$0xf]  ;;  %v5133_v21 = vor.u32 %v6803_v19, %v5132_v18  ;;  %v6835_v22 = vld [vmem:[%s10264_s2 + $0x3cc] sm:$0xf0]  ;;  %1633 = vmatpush.bf16.msra.mxu0 %v4877_v16 }
  0x13   : > { %v4860_v23 = vld [vmem:[%s10264_s2 + $0xa0] sm:$0xf]  ;;  %v6735_v24 = vld [vmem:[%s10264_s2 + $0xac] sm:$0xf0]  ;;  %v5261_v25 = vor.u32 %v6835_v22, %v5260_v20  ;;  %1646 = vmatpush.bf16.msra.mxu1 %v5005_v17 }
  0x14   : > { %v4988_v26 = vld [vmem:[%s10264_s2 + $0x1a0] sm:$0xf]  ;;  %v6767_v27 = vld [vmem:[%s10264_s2 + $0x1ac] sm:$0xf0]  ;;  %v4861_v29 = vor.u32 %v6735_v24, %v4860_v23  ;;  %1659 = vmatpush.bf16.msra.mxu2 %v5133_v21 }
  0x15   : > { %v5116_v28 = vld [vmem:[%s10264_s2 + $0x2a0] sm:$0xf]  ;;  %v6799_v30 = vld [vmem:[%s10264_s2 + $0x2ac] sm:$0xf0]  ;;  %v4989_v33 = vor.u32 %v6767_v27, %v4988_v26  ;;  %1672 = vmatpush.bf16.msra.mxu3 %v5261_v25 }
  0x16   : > { %v5244_v31 = vld [vmem:[%s10264_s2 + $0x3a0] sm:$0xf]  ;;  %v6831_v32 = vld [vmem:[%s10264_s2 + $0x3ac] sm:$0xf0]  ;;  %v5117_v34 = vor.u32 %v6799_v30, %v5116_v28  ;;  %1634 = vmatpush.bf16.msra.mxu0 %v4861_v29 }
  0x17   : > { %v4844_v35 = vld [vmem:[%s10264_s2 + $0x80] sm:$0xf]  ;;  %v6731_v36 = vld [vmem:[%s10264_s2 + $0x8c] sm:$0xf0]  ;;  %v5245_v38 = vor.u32 %v6831_v32, %v5244_v31  ;;  %1647 = vmatpush.bf16.msra.mxu1 %v4989_v33  ;;  %v6741_v32 = vld [vmem:[%s10264_s2 + $0xe4] sm:$0xf] }
  0x18   : > { %v4972_v37 = vld [vmem:[%s10264_s2 + $0x180] sm:$0xf]  ;;  %v6763_v39 = vld [vmem:[%s10264_s2 + $0x18c] sm:$0xf0]  ;;  %v4845_v44 = vor.u32 %v6731_v36, %v4844_v35  ;;  %1660 = vmatpush.bf16.msra.mxu2 %v5117_v34  ;;  %v4894_v34 = vld [vmem:[%s10264_s2 + $0xf0] sm:$0xf0] }
  0x19   : > { %v5100_v40 = vld [vmem:[%s10264_s2 + $0x280] sm:$0xf]  ;;  %v6795_v41 = vld [vmem:[%s10264_s2 + $0x28c] sm:$0xf0]  ;;  %v4973_v45 = vor.u32 %v6763_v39, %v4972_v37  ;;  %1673 = vmatpush.bf16.msra.mxu3 %v5245_v38  ;;  %v6773_v39 = vld [vmem:[%s10264_s2 + $0x1e4] sm:$0xf] }
  0x1a   : > { %v5228_v42 = vld [vmem:[%s10264_s2 + $0x380] sm:$0xf]  ;;  %v6827_v43 = vld [vmem:[%s10264_s2 + $0x38c] sm:$0xf0]  ;;  %v5101_v46 = vor.u32 %v6795_v41, %v5100_v40  ;;  %1635 = vmatpush.bf16.msra.mxu0 %v4845_v44  ;;  %v5022_v40 = vld [vmem:[%s10264_s2 + $0x1f0] sm:$0xf0] }
  0x1b   : > { %v4828_v47 = vld [vmem:[%s10264_s2 + $0x60] sm:$0xf]  ;;  %v6727_v48 = vld [vmem:[%s10264_s2 + $0x6c] sm:$0xf0]  ;;  %v5229_v50 = vor.u32 %v6827_v43, %v5228_v42  ;;  %1648 = vmatpush.bf16.msra.mxu1 %v4973_v45 }
  0x1c   : > { %v4956_v49 = vld [vmem:[%s10264_s2 + $0x160] sm:$0xf]  ;;  %v6759_v51 = vld [vmem:[%s10264_s2 + $0x16c] sm:$0xf0]  ;;  %v4829_v56 = vor.u32 %v6727_v48, %v4828_v47  ;;  %1661 = vmatpush.bf16.msra.mxu2 %v5101_v46  ;;  %v4897_v47 = vor.u32 %v6741_v32, %v4894_v34 }
  0x1d   : > { %v5084_v52 = vld [vmem:[%s10264_s2 + $0x260] sm:$0xf]  ;;  %v6791_v53 = vld [vmem:[%s10264_s2 + $0x26c] sm:$0xf0]  ;;  %v4957_v57 = vor.u32 %v6759_v51, %v4956_v49  ;;  %1674 = vmatpush.bf16.msra.mxu3 %v5229_v50  ;;  %v431_v50 = vld [vmem:[%s7557_s30 + $0x18] sm:$0xff] }
  0x1e   : > { %v5212_v54 = vld [vmem:[%s10264_s2 + $0x360] sm:$0xf]  ;;  %v6823_v55 = vld [vmem:[%s10264_s2 + $0x36c] sm:$0xf0]  ;;  %v5085_v58 = vor.u32 %v6791_v53, %v5084_v52  ;;  %1636 = vmatpush.bf16.msra.mxu0 %v4829_v56  ;;  %v6737_v53 = vld [vmem:[%s10264_s2 + $0xc4] sm:$0xf] }
  0x1f   : > { %v4812_v59 = vld [vmem:[%s10264_s2 + $0x40] sm:$0xf]  ;;  %v6723_v60 = vld [vmem:[%s10264_s2 + $0x4c] sm:$0xf0]  ;;  %v5213_v62 = vor.u32 %v6823_v55, %v5212_v54  ;;  %1649 = vmatpush.bf16.msra.mxu1 %v4957_v57  ;;  %v4878_v54 = vld [vmem:[%s10264_s2 + $0xd0] sm:$0xf0]  ;;  %v7584_v57 = vpack.c.bf16 %v431_v50, %v431_v50 }
  0x20   : > { %v4940_v61 = vld [vmem:[%s10264_s2 + $0x140] sm:$0xf]  ;;  %v6755_v63 = vld [vmem:[%s10264_s2 + $0x14c] sm:$0xf0]  ;;  %v4813_v4 = vor.u32 %v6723_v60, %v4812_v59  ;;  %1662 = vmatpush.bf16.msra.mxu2 %v5085_v58  ;;  %v429_v58 = vld [vmem:[%s7557_s30 + $0x8] sm:$0xff]  ;;  %v5025_v59 = vor.u32 %v6773_v39, %v5022_v40 }
  0x21   : > { %v5068_v0 = vld [vmem:[%s10264_s2 + $0x240] sm:$0xf]  ;;  %v6787_v1 = vld [vmem:[%s10264_s2 + $0x24c] sm:$0xf0]  ;;  %v4941_v6 = vor.u32 %v6755_v63, %v4940_v61  ;;  %1675 = vmatpush.bf16.msra.mxu3 %v5213_v62  ;;  %v6769_v61 = vld [vmem:[%s10264_s2 + $0x1c4] sm:$0xf] }
  0x22   : > { %v5196_v2 = vld [vmem:[%s10264_s2 + $0x340] sm:$0xf]  ;;  %v6819_v3 = vld [vmem:[%s10264_s2 + $0x34c] sm:$0xf0]  ;;  %v5069_v7 = vor.u32 %v6787_v1, %v5068_v0  ;;  %1637 = vmatpush.bf16.msra.mxu0 %v4813_v4  ;;  %v5006_v62 = vld [vmem:[%s10264_s2 + $0x1d0] sm:$0xf0]  ;;  %v4881_v0 = vor.u32 %v6737_v53, %v4878_v54 }
  0x23   : > { %v4796_v5 = vld [vmem:[%s10264_s2 + $0x20] sm:$0xf]  ;;  %v6719_v8 = vld [vmem:[%s10264_s2 + $0x2c] sm:$0xf0]  ;;  %v5197_v11 = vor.u32 %v6819_v3, %v5196_v2  ;;  %1650 = vmatpush.bf16.msra.mxu1 %v4941_v6  ;;  %v4862_v6 = vld [vmem:[%s10264_s2 + $0xb0] sm:$0xf0] }
  0x24   : > { %v4924_v9 = vld [vmem:[%s10264_s2 + $0x120] sm:$0xf]  ;;  %v6751_v10 = vld [vmem:[%s10264_s2 + $0x12c] sm:$0xf0]  ;;  %v4797_v18 = vor.u32 %v6719_v8, %v4796_v5  ;;  %1663 = vmatpush.bf16.msra.mxu2 %v5069_v7  ;;  %v6733_v5 = vld [vmem:[%s10264_s2 + $0xa4] sm:$0xf]  ;;  %v7613_v7 = vpack.c.bf16 %v429_v58, %v429_v58  ;;  %v5009_v8 = vor.u32 %v6769_v61, %v5006_v62 }
  0x25   : > { %v5052_v12 = vld [vmem:[%s10264_s2 + $0x220] sm:$0xf]  ;;  %v6783_v13 = vld [vmem:[%s10264_s2 + $0x22c] sm:$0xf0]  ;;  %v4925_v22 = vor.u32 %v6751_v10, %v4924_v9  ;;  %1676 = vmatpush.bf16.msra.mxu3 %v5197_v11  ;;  %v6765_v10 = vld [vmem:[%s10264_s2 + $0x1a4] sm:$0xf] }
  0x26   : > { %v5180_v14 = vld [vmem:[%s10264_s2 + $0x320] sm:$0xf]  ;;  %v6815_v15 = vld [vmem:[%s10264_s2 + $0x32c] sm:$0xf0]  ;;  %v5053_v23 = vor.u32 %v6783_v13, %v5052_v12  ;;  %1638 = vmatpush.bf16.msra.mxu0 %v4797_v18  ;;  %v4990_v11 = vld [vmem:[%s10264_s2 + $0x1b0] sm:$0xf0]  ;;  %v4865_v13 = vor.u32 %v6733_v5, %v4862_v6 }
  0x27   : > { %v4780_v16 = vld [vmem:[%s10264_s2] sm:$0xf]  ;;  %v6715_v17 = vld [vmem:[%s10264_s2 + $0xc] sm:$0xf0]  ;;  %v5181_v27 = vor.u32 %v6815_v15, %v5180_v14  ;;  %1651 = vmatpush.bf16.msra.mxu1 %v4925_v22  ;;  %v6729_v18 = vld [vmem:[%s10264_s2 + $0x84] sm:$0xf] }
  0x28   : > { %v4908_v19 = vld [vmem:[%s10264_s2 + $0x100] sm:$0xf]  ;;  %v6747_v20 = vld [vmem:[%s10264_s2 + $0x10c] sm:$0xf0]  ;;  %v4781_v33 = vor.u32 %v6715_v17, %v4780_v16  ;;  %1664 = vmatpush.bf16.msra.mxu2 %v5053_v23  ;;  %v6761_v22 = vld [vmem:[%s10264_s2 + $0x184] sm:$0xf] }
  0x29   : > { %v5036_v21 = vld [vmem:[%s10264_s2 + $0x200] sm:$0xf]  ;;  %v6779_v24 = vld [vmem:[%s10264_s2 + $0x20c] sm:$0xf0]  ;;  %v4909_v36 = vor.u32 %v6747_v20, %v4908_v19  ;;  %1677 = vmatpush.bf16.msra.mxu3 %v5181_v27  ;;  %v4846_v19 = vld [vmem:[%s10264_s2 + $0x90] sm:$0xf0]  ;;  %v4993_v20 = vor.u32 %v6765_v10, %v4990_v11 }
  0x2a   : > { %v5164_v25 = vld [vmem:[%s10264_s2 + $0x300] sm:$0xf]  ;;  %v6811_v26 = vld [vmem:[%s10264_s2 + $0x30c] sm:$0xf0]  ;;  %v5037_v37 = vor.u32 %v6779_v24, %v5036_v21  ;;  %1639 = vmatpush.bf16.msra.mxu0 %v4781_v33  ;;  %v4974_v23 = vld [vmem:[%s10264_s2 + $0x190] sm:$0xf0] }
  0x2b   : > { %v5404_v28 = vld [vmem:[%s10264_s2 + $0x4e0] sm:$0xf]  ;;  %v6871_v29 = vld [vmem:[%s10264_s2 + $0x4ec] sm:$0xf0]  ;;  %v5165_v41 = vor.u32 %v6811_v26, %v5164_v25  ;;  %1652 = vmatpush.bf16.msra.mxu1 %v4909_v36  ;;  %v4849_v25 = vor.u32 %v6729_v18, %v4846_v19  ;;  %v4977_v33 = vor.u32 %v6761_v22, %v4974_v23  ;;  %v4958_v36 = vld [vmem:[%s10264_s2 + $0x170] sm:$0xf0] }
  0x2c   : > { %v5532_v30 = vld [vmem:[%s10264_s2 + $0x5e0] sm:$0xf]  ;;  %v6903_v31 = vld [vmem:[%s10264_s2 + $0x5ec] sm:$0xf0]  ;;  %v5405_v42 = vor.u32 %v6871_v29, %v5404_v28  ;;  %1665 = vmatpush.bf16.msra.mxu2 %v5037_v37  ;;  %v6805_v10 = vld [vmem:[%s10264_s2 + $0x2e4] sm:$0xf] }
  0x2d   : > { %v5548_v35 = vld [vmem:[%s10264_s2 + $0x600] sm:$0xf]  ;;  %v6907_v38 = vld [vmem:[%s10264_s2 + $0x60c] sm:$0xf0]  ;;  %v5533_v46 = vor.u32 %v6903_v31, %v5532_v30  ;;  %1678 = vmatpush.bf16.msra.mxu3 %v5165_v41  ;;  %v6725_v30 = vld [vmem:[%s10264_s2 + $0x64] sm:$0xf] }
  0x2e   : > { %v5388_v43 = vld [vmem:[%s10264_s2 + $0x4c0] sm:$0xf]  ;;  %v6867_v44 = vld [vmem:[%s10264_s2 + $0x4cc] sm:$0xf0]  ;;  %v5549_v56 = vor.u32 %v6907_v38, %v5548_v35  ;;  %1684 = vmatpush.bf16.msrb.mxu0 %v5405_v42  ;;  %1653 = vmatmul.bf16.vlgmr.msra.gmra.mxu1 %v7613_v7  ;;  %v4830_v31 = vld [vmem:[%s10264_s2 + $0x70] sm:$0xf0] }
  0x2f   : > { %v5516_v45 = vld [vmem:[%s10264_s2 + $0x5c0] sm:$0xf]  ;;  %v430_v48 = vld [vmem:[%s7557_s30 + $0x10] sm:$0xff]  ;;  %v5389_v60 = vor.u32 %v6867_v44, %v5388_v43  ;;  %1697 = vmatpush.bf16.msrb.mxu1 %v5533_v46  ;;  %v6757_v35 = vld [vmem:[%s10264_s2 + $0x164] sm:$0xf]  ;;  %v4833_v38 = vor.u32 %v6725_v30, %v4830_v31 }
  0x30   : > { %v428_v49 = vld [vmem:[%s7557_s30] sm:$0xff]  ;;  %v7571_v51 = vpack.c.bf16 %v430_v48, %v430_v48  ;;  %v6899_v52 = vld [vmem:[%s10264_s2 + $0x5cc] sm:$0xf0]  ;;  %1717 = vmatpush.bf16.msrb.mxu2 %v5549_v56  ;;  %1679 = vmatmul.bf16.vlgmr.msra.gmra.mxu3 %v7584_v57  ;;  %v4814_v44 = vld [vmem:[%s10264_s2 + $0x50] sm:$0xf0]  ;;  %v4961_v46 = vor.u32 %v6757_v35, %v4958_v36 }
  0x31   : > { %v7582_v55 = vpack.c.bf16 %v428_v49, %v428_v49  ;;  %1723 = vmatpush.bf16.msrb.mxu3 %v4897_v47  ;;  %v5517_v63 = vor.u32 %v6899_v52, %v5516_v45  ;;  %v5372_v1 = vld [vmem:[%s10264_s2 + $0x4a0] sm:$0xf]  ;;  %v6863_v2 = vld [vmem:[%s10264_s2 + $0x4ac] sm:$0xf0]  ;;  %v6721_v43 = vld [vmem:[%s10264_s2 + $0x44] sm:$0xf] }
  0x32   : > { %v5500_v3 = vld [vmem:[%s10264_s2 + $0x5a0] sm:$0xf]  ;;  %1666 = vmatmul.bf16.vlgmr.msra.gmra.mxu2 %v7571_v51  ;;  %v6895_v4 = vld [vmem:[%s10264_s2 + $0x5ac] sm:$0xf0]  ;;  %1685 = vmatpush.bf16.msrb.mxu0 %v5389_v60  ;;  %v5373_v9 = vor.u32 %v6863_v2, %v5372_v1  ;;  %v6753_v48 = vld [vmem:[%s10264_s2 + $0x144] sm:$0xf]  ;;  %v4817_v52 = vor.u32 %v6721_v43, %v4814_v44 }
  0x33   : > { %1640 = vmatmul.bf16.vlgmr.msra.gmra.mxu0 %v7582_v55  ;;  %1698 = vmatpush.bf16.msrb.mxu1 %v5517_v63  ;;  %v5501_v12 = vor.u32 %v6895_v4, %v5500_v3  ;;  %v5356_v14 = vld [vmem:[%s10264_s2 + $0x480] sm:$0xf]  ;;  %v6859_v15 = vld [vmem:[%s10264_s2 + $0x48c] sm:$0xf0]  ;;  %v4942_v49 = vld [vmem:[%s10264_s2 + $0x150] sm:$0xf0] }
  0x34   : > { %1736 = vmatpush.bf16.msra.mxu2 %v5025_v59  ;;  %v5484_v16 = vld [vmem:[%s10264_s2 + $0x580] sm:$0xf]  ;;  %v6891_v17 = vld [vmem:[%s10264_s2 + $0x58c] sm:$0xf0]  ;;  %v5357_v21 = vor.u32 %v6859_v15, %v5356_v14  ;;  %v6717_v59 = vld [vmem:[%s10264_s2 + $0x24] sm:$0xf]  ;;  %v4945_v61 = vor.u32 %v6753_v48, %v4942_v49 }
  0x35   : > { %1724 = vmatpush.bf16.msrb.mxu3 %v4881_v0  ;;  %v5485_v24 = vor.u32 %v6891_v17, %v5484_v16  ;;  %v5340_v26 = vld [vmem:[%s10264_s2 + $0x460] sm:$0xf]  ;;  %v6855_v27 = vld [vmem:[%s10264_s2 + $0x46c] sm:$0xf0]  ;;  %v4798_v60 = vld [vmem:[%s10264_s2 + $0x30] sm:$0xf0] }
  0x36   : > { %1686 = vmatpush.bf16.msrb.mxu0 %v5373_v9  ;;  %v5468_v28 = vld [vmem:[%s10264_s2 + $0x560] sm:$0xf]  ;;  %v6887_v29 = vld [vmem:[%s10264_s2 + $0x56c] sm:$0xf0]  ;;  %v5341_v34 = vor.u32 %v6855_v27, %v5340_v26  ;;  %v6749_v63 = vld [vmem:[%s10264_s2 + $0x124] sm:$0xf]  ;;  %v4801_v3 = vor.u32 %v6717_v59, %v4798_v60 }
  0x37   : > { %1699 = vmatpush.bf16.msrb.mxu1 %v5501_v12  ;;  %v434_v32 = vld [vmem:[%s7557_s30 + $0x30] sm:$0xff]  ;;  %v5469_v37 = vor.u32 %v6887_v29, %v5468_v28  ;;  %v5324_v39 = vld [vmem:[%s10264_s2 + $0x440] sm:$0xf]  ;;  %v6837_v12 = vld [vmem:[%s10264_s2 + $0x3e4] sm:$0xf] }
  0x38   : > { %1737 = vmatpush.bf16.msra.mxu2 %v5009_v8  ;;  %v6851_v40 = vld [vmem:[%s10264_s2 + $0x44c] sm:$0xf0]  ;;  %v5452_v41 = vld [vmem:[%s10264_s2 + $0x540] sm:$0xf]  ;;  %v7690_v45 = vpack.c.bf16 %v434_v32, %v434_v32  ;;  %v4926_v0 = vld [vmem:[%s10264_s2 + $0x130] sm:$0xf0] }
  0x39   : > { %1725 = vmatpush.bf16.msrb.mxu3 %v4865_v13  ;;  %v6883_v42 = vld [vmem:[%s10264_s2 + $0x54c] sm:$0xf0]  ;;  %v5325_v47 = vor.u32 %v6851_v40, %v5324_v39  ;;  %v5308_v53 = vld [vmem:[%s10264_s2 + $0x420] sm:$0xf]  ;;  %v6713_v8 = vld [vmem:[%s10264_s2 + $0x4] sm:$0xf]  ;;  %v4929_v14 = vor.u32 %v6749_v63, %v4926_v0 }
  0x3a   : > { %1687 = vmatpush.bf16.msrb.mxu0 %v5357_v21  ;;  %v5453_v50 = vor.u32 %v6883_v42, %v5452_v41  ;;  %v6847_v54 = vld [vmem:[%s10264_s2 + $0x42c] sm:$0xf0]  ;;  %v5436_v56 = vld [vmem:[%s10264_s2 + $0x520] sm:$0xf]  ;;  %v4782_v9 = vld [vmem:[%s10264_s2 + $0x10] sm:$0xf0] }
  0x3b   : > { %1700 = vmatpush.bf16.msrb.mxu1 %v5485_v24  ;;  %v6879_v58 = vld [vmem:[%s10264_s2 + $0x52c] sm:$0xf0]  ;;  %v5309_v62 = vor.u32 %v6847_v54, %v5308_v53  ;;  %v5292_v1 = vld [vmem:[%s10264_s2 + $0x400] sm:$0xf]  ;;  %v5150_v11 = vld [vmem:[%s10264_s2 + $0x2f0] sm:$0xf0] }
  0x3c   : > { %1738 = vmatpush.bf16.msra.mxu2 %v4993_v20  ;;  %v5437_v2 = vor.u32 %v6879_v58, %v5436_v56  ;;  %v6843_v4 = vld [vmem:[%s10264_s2 + $0x40c] sm:$0xf0]  ;;  %v5420_v5 = vld [vmem:[%s10264_s2 + $0x500] sm:$0xf]  ;;  %v5278_v13 = vld [vmem:[%s10264_s2 + $0x3f0] sm:$0xf0]  ;;  %v4785_v20 = vor.u32 %v6713_v8, %v4782_v9  ;;  %v5153_v24 = vor.u32 %v6805_v10, %v5150_v11 }
  0x3d   : > { %1726 = vmatpush.bf16.msrb.mxu3 %v4849_v25  ;;  %v6875_v6 = vld [vmem:[%s10264_s2 + $0x50c] sm:$0xf0]  ;;  %v5293_v15 = vor.u32 %v6843_v4, %v5292_v1  ;;  %v6869_v16 = vld [vmem:[%s10264_s2 + $0x4e4] sm:$0xf]  ;;  %v5406_v17 = vld [vmem:[%s10264_s2 + $0x4f0] sm:$0xf0]  ;;  %v5281_v25 = vor.u32 %v6837_v12, %v5278_v13 }
  0x3e   : > { %1688 = vmatpush.bf16.msrb.mxu0 %v5341_v34  ;;  %v432_v18 = vld [vmem:[%s7557_s30 + $0x20] sm:$0xff]  ;;  %v5421_v19 = vor.u32 %v6875_v6, %v5420_v5  ;;  %v4910_v22 = vld [vmem:[%s10264_s2 + $0x110] sm:$0xf0]  ;;  %v433_v23 = vld [vmem:[%s7557_s30 + $0x28] sm:$0xff]  ;;  %v5409_v29 = vor.u32 %v6869_v16, %v5406_v17 }
  0x3f   : > { %1701 = vmatpush.bf16.msrb.mxu1 %v5469_v37  ;;  %v6745_v21 = vld [vmem:[%s10264_s2 + $0x104] sm:$0xf]  ;;  %v5534_v27 = vld [vmem:[%s10264_s2 + $0x5f0] sm:$0xf0]  ;;  %v7777_v30 = vpack.c.bf16 %v432_v18, %v432_v18  ;;  %v7788_v35 = vpack.c.bf16 %v433_v23, %v433_v23 }
  0x40   : > { %1739 = vmatpush.bf16.msra.mxu2 %v4977_v33  ;;  %v6901_v26 = vld [vmem:[%s10264_s2 + $0x5e4] sm:$0xf]  ;;  %v5134_v31 = vld [vmem:[%s10264_s2 + $0x2d0] sm:$0xf0]  ;;  %v4913_v34 = vor.u32 %v6745_v21, %v4910_v22 }
  0x41   : > { %1727 = vmatpush.bf16.msrb.mxu3 %v4833_v38  ;;  %v6801_v28 = vld [vmem:[%s10264_s2 + $0x2c4] sm:$0xf]  ;;  %v5262_v33 = vld [vmem:[%s10264_s2 + $0x3d0] sm:$0xf0]  ;;  %v5537_v38 = vor.u32 %v6901_v26, %v5534_v27 }
  0x42   : > { %5562 = vmatmul.msk.bf16.vlgmr.msrb.gmra.mxu2 %vm1628_vm0, %v7690_v45  ;;  %1689 = vmatpush.bf16.msrb.mxu0 %v5325_v47  ;;  %v6833_v32 = vld [vmem:[%s10264_s2 + $0x3c4] sm:$0xf]  ;;  %v5390_v37 = vld [vmem:[%s10264_s2 + $0x4d0] sm:$0xf0]  ;;  %v5137_v39 = vor.u32 %v6801_v28, %v5134_v31 }
  0x43   : > { %1702 = vmatpush.bf16.msrb.mxu1 %v5453_v50  ;;  %v6865_v36 = vld [vmem:[%s10264_s2 + $0x4c4] sm:$0xf]  ;;  %v5265_v40 = vor.u32 %v6833_v32, %v5262_v33  ;;  %v5518_v42 = vld [vmem:[%s10264_s2 + $0x5d0] sm:$0xf0] }
  0x44   : > { %1740 = vmatpush.bf16.msra.mxu2 %v4961_v46  ;;  %v6897_v41 = vld [vmem:[%s10264_s2 + $0x5c4] sm:$0xf]  ;;  %v5393_v44 = vor.u32 %v6865_v36, %v5390_v37  ;;  %v5118_v46 = vld [vmem:[%s10264_s2 + $0x2b0] sm:$0xf0] }
  0x45   : > { %1728 = vmatpush.bf16.msrb.mxu3 %v4817_v52  ;;  %v6797_v43 = vld [vmem:[%s10264_s2 + $0x2a4] sm:$0xf]  ;;  %v5246_v48 = vld [vmem:[%s10264_s2 + $0x3b0] sm:$0xf0]  ;;  %v5521_v52 = vor.u32 %v6897_v41, %v5518_v42 }
  0x46   : > { %1690 = vmatpush.bf16.msrb.mxu0 %v5309_v62  ;;  %v6829_v47 = vld [vmem:[%s10264_s2 + $0x3a4] sm:$0xf]  ;;  %v5374_v50 = vld [vmem:[%s10264_s2 + $0x4b0] sm:$0xf0]  ;;  %v5121_v53 = vor.u32 %v6797_v43, %v5118_v46 }
  0x47   : > { %1703 = vmatpush.bf16.msrb.mxu1 %v5437_v2  ;;  %v6861_v49 = vld [vmem:[%s10264_s2 + $0x4a4] sm:$0xf]  ;;  %v5249_v54 = vor.u32 %v6829_v47, %v5246_v48  ;;  %v5502_v58 = vld [vmem:[%s10264_s2 + $0x5b0] sm:$0xf0] }
  0x48   : > { %1741 = vmatpush.bf16.msra.mxu2 %v4945_v61  ;;  %v6893_v56 = vld [vmem:[%s10264_s2 + $0x5a4] sm:$0xf]  ;;  %v5377_v60 = vor.u32 %v6861_v49, %v5374_v50  ;;  %v5102_v61 = vld [vmem:[%s10264_s2 + $0x290] sm:$0xf0] }
  0x49   : > { %1729 = vmatpush.bf16.msrb.mxu3 %v4801_v3  ;;  %v6793_v59 = vld [vmem:[%s10264_s2 + $0x284] sm:$0xf]  ;;  %v5230_v63 = vld [vmem:[%s10264_s2 + $0x390] sm:$0xf0]  ;;  %v5505_v2 = vor.u32 %v6893_v56, %v5502_v58  ;;  %v4900_v56 = vld [vmem:[%s10264_s2 + $0xe8] sm:$0xf] }
  0x4a   : > { %1691 = vmatpush.bf16.msrb.mxu0 %v5293_v15  ;;  %v6825_v62 = vld [vmem:[%s10264_s2 + $0x384] sm:$0xf]  ;;  %v5358_v1 = vld [vmem:[%s10264_s2 + $0x490] sm:$0xf0]  ;;  %v5105_v3 = vor.u32 %v6793_v59, %v5102_v61  ;;  %v6744_v58 = vld [vmem:[%s10264_s2 + $0xf4] sm:$0xf0] }
  0x4b   : > { %1704 = vmatpush.bf16.msrb.mxu1 %v5421_v19  ;;  %v6857_v0 = vld [vmem:[%s10264_s2 + $0x484] sm:$0xf]  ;;  %v5233_v4 = vor.u32 %v6825_v62, %v5230_v63  ;;  %v5486_v6 = vld [vmem:[%s10264_s2 + $0x590] sm:$0xf0]  ;;  %v5028_v59 = vld [vmem:[%s10264_s2 + $0x1e8] sm:$0xf] }
  0x4c   : > { %1742 = vmatpush.bf16.msra.mxu2 %v4929_v14  ;;  %v6889_v5 = vld [vmem:[%s10264_s2 + $0x584] sm:$0xf]  ;;  %v5361_v9 = vor.u32 %v6857_v0, %v5358_v1  ;;  %v5086_v10 = vld [vmem:[%s10264_s2 + $0x270] sm:$0xf0]  ;;  %v6776_v61 = vld [vmem:[%s10264_s2 + $0x1f4] sm:$0xf0] }
  0x4d   : > { %1730 = vmatpush.bf16.msrb.mxu3 %v4785_v20  ;;  %1692 = vmatmul.bf16.vlgmr.msrb.gmra.mxu0 %v7777_v30  ;;  %v6789_v8 = vld [vmem:[%s10264_s2 + $0x264] sm:$0xf]  ;;  %v5214_v12 = vld [vmem:[%s10264_s2 + $0x370] sm:$0xf0]  ;;  %v5489_v15 = vor.u32 %v6889_v5, %v5486_v6  ;;  %v4901_v6 = vor.u32 %v6744_v58, %v4900_v56  ;;  %v6728_v56 = vld [vmem:[%s10264_s2 + $0x74] sm:$0xf0] }
  0x4e   : > { %1749 = vmatpush.bf16.msra.mxu0 %v5153_v24  ;;  %1705 = vmatmul.bf16.vlgmr.msrb.gmra.mxu1 %v7788_v35  ;;  %v6821_v11 = vld [vmem:[%s10264_s2 + $0x364] sm:$0xf]  ;;  %v5342_v14 = vld [vmem:[%s10264_s2 + $0x470] sm:$0xf0]  ;;  %v5089_v16 = vor.u32 %v6789_v8, %v5086_v10  ;;  %v6808_v8 = vld [vmem:[%s10264_s2 + $0x2f4] sm:$0xf0] }
  0x4f   : > { %1762 = vmatpush.bf16.msra.mxu1 %v5281_v25  ;;  %v6853_v13 = vld [vmem:[%s10264_s2 + $0x464] sm:$0xf]  ;;  %v5217_v17 = vor.u32 %v6821_v11, %v5214_v12  ;;  %v5470_v19 = vld [vmem:[%s10264_s2 + $0x570] sm:$0xf0]  ;;  %v6840_v10 = vld [vmem:[%s10264_s2 + $0x3f4] sm:$0xf0]  ;;  %v5029_v11 = vor.u32 %v6776_v61, %v5028_v59 }
  0x50   : > { %1743 = vmatpush.bf16.msra.mxu2 %v4913_v34  ;;  %1731 = vmatmul.bf16.vlgmr.msrb.gmra.mxu3 %v7582_v55  ;;  %v6885_v18 = vld [vmem:[%s10264_s2 + $0x564] sm:$0xf]  ;;  %v5345_v21 = vor.u32 %v6853_v13, %v5342_v14  ;;  %v5070_v22 = vld [vmem:[%s10264_s2 + $0x250] sm:$0xf0]  ;;  %v4884_v13 = vld [vmem:[%s10264_s2 + $0xc8] sm:$0xf] }
  0x51   : > { %1775 = vmatpush.bf16.msra.mxu3 %v5409_v29  ;;  %v6785_v20 = vld [vmem:[%s10264_s2 + $0x244] sm:$0xf]  ;;  %v5198_v24 = vld [vmem:[%s10264_s2 + $0x350] sm:$0xf0]  ;;  %v5473_v27 = vor.u32 %v6885_v18, %v5470_v19  ;;  %v6740_v14 = vld [vmem:[%s10264_s2 + $0xd4] sm:$0xf0] }
  0x52   : > { %1750 = vmatpush.bf16.msra.mxu0 %v5137_v39  ;;  %v6817_v23 = vld [vmem:[%s10264_s2 + $0x344] sm:$0xf]  ;;  %v5326_v26 = vld [vmem:[%s10264_s2 + $0x450] sm:$0xf0]  ;;  %v5073_v28 = vor.u32 %v6785_v20, %v5070_v22  ;;  %v5140_v20 = vld [vmem:[%s10264_s2 + $0x2c8] sm:$0xf] }
  0x53   : > { %1763 = vmatpush.bf16.msra.mxu1 %v5265_v40  ;;  %1744 = vmatmul.bf16.vlgmr.msra.gmra.mxu2 %v7613_v7  ;;  %v6849_v25 = vld [vmem:[%s10264_s2 + $0x444] sm:$0xf]  ;;  %v5201_v29 = vor.u32 %v6817_v23, %v5198_v24  ;;  %v5454_v32 = vld [vmem:[%s10264_s2 + $0x550] sm:$0xf0]  ;;  %v6804_v22 = vld [vmem:[%s10264_s2 + $0x2d4] sm:$0xf0] }
  0x54   : > { %1788 = vmatpush.bf16.msrb.mxu2 %v5537_v38  ;;  %v6881_v31 = vld [vmem:[%s10264_s2 + $0x544] sm:$0xf]  ;;  %v5329_v34 = vor.u32 %v6849_v25, %v5326_v26  ;;  %v5054_v36 = vld [vmem:[%s10264_s2 + $0x230] sm:$0xf0]  ;;  %v5268_v23 = vld [vmem:[%s10264_s2 + $0x3c8] sm:$0xf] }
  0x55   : > { %1776 = vmatpush.bf16.msra.mxu3 %v5393_v44  ;;  %v6781_v33 = vld [vmem:[%s10264_s2 + $0x224] sm:$0xf]  ;;  %v5182_v38 = vld [vmem:[%s10264_s2 + $0x330] sm:$0xf0]  ;;  %v5457_v41 = vor.u32 %v6881_v31, %v5454_v32  ;;  %v6836_v24 = vld [vmem:[%s10264_s2 + $0x3d4] sm:$0xf0]  ;;  %v5141_v31 = vor.u32 %v6804_v22, %v5140_v20 }
  0x56   : > { %1751 = vmatpush.bf16.msra.mxu0 %v5121_v53  ;;  %v6813_v37 = vld [vmem:[%s10264_s2 + $0x324] sm:$0xf]  ;;  %v5310_v40 = vld [vmem:[%s10264_s2 + $0x430] sm:$0xf0]  ;;  %v5057_v44 = vor.u32 %v6781_v33, %v5054_v36  ;;  %v4868_v26 = vld [vmem:[%s10264_s2 + $0xa8] sm:$0xf]  ;;  %v5269_v32 = vor.u32 %v6836_v24, %v5268_v23 }
  0x57   : > { %1764 = vmatpush.bf16.msra.mxu1 %v5249_v54  ;;  %v6845_v39 = vld [vmem:[%s10264_s2 + $0x424] sm:$0xf]  ;;  %v5438_v43 = vld [vmem:[%s10264_s2 + $0x530] sm:$0xf0]  ;;  %v5185_v46 = vor.u32 %v6813_v37, %v5182_v38  ;;  %v5124_v33 = vld [vmem:[%s10264_s2 + $0x2a8] sm:$0xf] }
  0x58   : > { %1789 = vmatpush.bf16.msrb.mxu2 %v5521_v52  ;;  %v6877_v42 = vld [vmem:[%s10264_s2 + $0x524] sm:$0xf]  ;;  %v5038_v48 = vld [vmem:[%s10264_s2 + $0x210] sm:$0xf0]  ;;  %v5313_v50 = vor.u32 %v6845_v39, %v5310_v40  ;;  %v5252_v37 = vld [vmem:[%s10264_s2 + $0x3a8] sm:$0xf] }
  0x59   : > { %1777 = vmatpush.bf16.msra.mxu3 %v5377_v60  ;;  %v6777_v47 = vld [vmem:[%s10264_s2 + $0x204] sm:$0xf]  ;;  %v5166_v52 = vld [vmem:[%s10264_s2 + $0x310] sm:$0xf0]  ;;  %v5441_v60 = vor.u32 %v6877_v42, %v5438_v43  ;;  %v6832_v38 = vld [vmem:[%s10264_s2 + $0x3b4] sm:$0xf0] }
  0x5a   : > { %1752 = vmatpush.bf16.msra.mxu0 %v5105_v3  ;;  %v6809_v49 = vld [vmem:[%s10264_s2 + $0x304] sm:$0xf]  ;;  %v5294_v54 = vld [vmem:[%s10264_s2 + $0x410] sm:$0xf0]  ;;  %v5041_v0 = vor.u32 %v6777_v47, %v5038_v48  ;;  %v4852_v40 = vld [vmem:[%s10264_s2 + $0x88] sm:$0xf] }
  0x5b   : > { %1765 = vmatpush.bf16.msra.mxu1 %v5233_v4  ;;  %v6841_v53 = vld [vmem:[%s10264_s2 + $0x404] sm:$0xf]  ;;  %v5550_v63 = vld [vmem:[%s10264_s2 + $0x610] sm:$0xf0]  ;;  %v5169_v1 = vor.u32 %v6809_v49, %v5166_v52  ;;  %v5156_v4 = vld [vmem:[%s10264_s2 + $0x2e8] sm:$0xf] }
  0x5c   : > { %1790 = vmatpush.bf16.msrb.mxu2 %v5505_v2  ;;  %v6905_v62 = vld [vmem:[%s10264_s2 + $0x604] sm:$0xf]  ;;  %v5422_v3 = vld [vmem:[%s10264_s2 + $0x510] sm:$0xf0]  ;;  %v5297_v5 = vor.u32 %v6841_v53, %v5294_v54  ;;  %v5157_v18 = vor.u32 %v6808_v8, %v5156_v4  ;;  %v4980_v42 = vld [vmem:[%s10264_s2 + $0x188] sm:$0xf] }
  0x5d   : > { %1778 = vmatpush.bf16.msra.mxu3 %v5361_v9  ;;  %v6873_v2 = vld [vmem:[%s10264_s2 + $0x504] sm:$0xf]  ;;  %v5284_v9 = vld [vmem:[%s10264_s2 + $0x3e8] sm:$0xf]  ;;  %v5553_v12 = vor.u32 %v6905_v62, %v5550_v63  ;;  %v6764_v43 = vld [vmem:[%s10264_s2 + $0x194] sm:$0xf0] }
  0x5e   : > { %1753 = vmatpush.bf16.msra.mxu0 %v5089_v16  ;;  %v5012_v16 = vld [vmem:[%s10264_s2 + $0x1c8] sm:$0xf]  ;;  %v5285_v19 = vor.u32 %v6840_v10, %v5284_v9  ;;  %v6796_v49 = vld [vmem:[%s10264_s2 + $0x294] sm:$0xf0]  ;;  %v4981_v53 = vor.u32 %v6764_v43, %v4980_v42 }
  0x5f   : > { %1766 = vmatpush.bf16.msra.mxu1 %v5217_v17  ;;  %v6772_v17 = vld [vmem:[%s10264_s2 + $0x1d4] sm:$0xf0]  ;;  %v5108_v47 = vld [vmem:[%s10264_s2 + $0x288] sm:$0xf] }
  0x60   : > { %1791 = vmatpush.bf16.msrb.mxu2 %v5489_v15  ;;  %v5425_v15 = vor.u32 %v6873_v2, %v5422_v3  ;;  %v5013_v25 = vor.u32 %v6772_v17, %v5012_v16  ;;  %v6828_v52 = vld [vmem:[%s10264_s2 + $0x394] sm:$0xf0]  ;;  %v4836_v54 = vld [vmem:[%s10264_s2 + $0x68] sm:$0xf] }
  0x61   : > { %1779 = vmatpush.bf16.msra.mxu3 %v5345_v21  ;;  %v4885_v21 = vor.u32 %v6740_v14, %v4884_v13  ;;  %v4964_v58 = vld [vmem:[%s10264_s2 + $0x168] sm:$0xf]  ;;  %v6760_v59 = vld [vmem:[%s10264_s2 + $0x174] sm:$0xf0]  ;;  %v4837_v63 = vor.u32 %v6728_v56, %v4836_v54 }
  0x62   : > { %1754 = vmatpush.bf16.msra.mxu0 %v5073_v28  ;;  %v4996_v28 = vld [vmem:[%s10264_s2 + $0x1a8] sm:$0xf]  ;;  %v6824_v2 = vld [vmem:[%s10264_s2 + $0x374] sm:$0xf0]  ;;  %v4965_v3 = vor.u32 %v6760_v59, %v4964_v58 }
  0x63   : > { %1767 = vmatpush.bf16.msra.mxu1 %v5201_v29  ;;  %v6768_v29 = vld [vmem:[%s10264_s2 + $0x1b4] sm:$0xf0]  ;;  %v5092_v62 = vld [vmem:[%s10264_s2 + $0x268] sm:$0xf] }
  0x64   : > { %1792 = vmatpush.bf16.msrb.mxu2 %v5473_v27  ;;  %v6736_v27 = vld [vmem:[%s10264_s2 + $0xb4] sm:$0xf0]  ;;  %v4997_v39 = vor.u32 %v6768_v29, %v4996_v28  ;;  %v4820_v4 = vld [vmem:[%s10264_s2 + $0x48] sm:$0xf] }
  0x65   : > { %1780 = vmatpush.bf16.msra.mxu3 %v5329_v34  ;;  %v6800_v34 = vld [vmem:[%s10264_s2 + $0x2b4] sm:$0xf0]  ;;  %v4869_v36 = vor.u32 %v6736_v27, %v4868_v26  ;;  %v5204_v14 = vld [vmem:[%s10264_s2 + $0x348] sm:$0xf] }
  0x66   : > { %1755 = vmatpush.bf16.msra.mxu0 %v5057_v44  ;;  %v5125_v44 = vor.u32 %v6800_v34, %v5124_v33  ;;  %v6756_v8 = vld [vmem:[%s10264_s2 + $0x154] sm:$0xf0]  ;;  %v4804_v17 = vld [vmem:[%s10264_s2 + $0x28] sm:$0xf] }
  0x67   : > { %1768 = vmatpush.bf16.msra.mxu1 %v5185_v46  ;;  %v5253_v46 = vor.u32 %v6832_v38, %v5252_v37  ;;  %v6788_v13 = vld [vmem:[%s10264_s2 + $0x254] sm:$0xf0]  ;;  %v5060_v23 = vld [vmem:[%s10264_s2 + $0x228] sm:$0xf] }
  0x68   : > { %1793 = vmatpush.bf16.msrb.mxu2 %v5457_v41  ;;  %v6732_v41 = vld [vmem:[%s10264_s2 + $0x94] sm:$0xf0]  ;;  %v5188_v26 = vld [vmem:[%s10264_s2 + $0x328] sm:$0xf] }
  0x69   : > { %1781 = vmatpush.bf16.msra.mxu3 %v5313_v50  ;;  %v4853_v48 = vor.u32 %v6732_v41, %v4852_v40  ;;  %v5236_v50 = vld [vmem:[%s10264_s2 + $0x388] sm:$0xf]  ;;  %v6752_v20 = vld [vmem:[%s10264_s2 + $0x134] sm:$0xf0] }
  0x6a   : > { %1756 = vmatpush.bf16.msra.mxu0 %v5041_v0  ;;  %v5237_v61 = vor.u32 %v6828_v52, %v5236_v50  ;;  %v6792_v0 = vld [vmem:[%s10264_s2 + $0x274] sm:$0xf0]  ;;  %v4788_v28 = vld [vmem:[%s10264_s2 + $0x8] sm:$0xf]  ;;  %v4902_v50 = vld [vmem:[%s10264_s2 + $0xf8] sm:$0xf0] }
  0x6b   : > { %1769 = vmatpush.bf16.msra.mxu1 %v5169_v1  ;;  %v5220_v1 = vld [vmem:[%s10264_s2 + $0x368] sm:$0xf]  ;;  %v5093_v9 = vor.u32 %v6792_v0, %v5092_v62  ;;  %v6784_v24 = vld [vmem:[%s10264_s2 + $0x234] sm:$0xf0] }
  0x6c   : > { %1794 = vmatpush.bf16.msrb.mxu2 %v5441_v60  ;;  %v5109_v60 = vor.u32 %v6796_v49, %v5108_v47  ;;  %v5221_v10 = vor.u32 %v6824_v2, %v5220_v1  ;;  %v6816_v27 = vld [vmem:[%s10264_s2 + $0x334] sm:$0xf0]  ;;  %v5412_v34 = vld [vmem:[%s10264_s2 + $0x4e8] sm:$0xf]  ;;  %v5061_v38 = vor.u32 %v6784_v24, %v5060_v23  ;;  %v6742_v47 = vld [vmem:[%s10264_s2 + $0xec] sm:$0xf] }
  0x6d   : > { %1782 = vmatpush.bf16.msra.mxu3 %v5297_v5  ;;  %1757 = vmatmul.bf16.vlgmr.msra.gmra.mxu0 %v7571_v51  ;;  %v6724_v5 = vld [vmem:[%s10264_s2 + $0x54] sm:$0xf0]  ;;  %v5540_v37 = vld [vmem:[%s10264_s2 + $0x5e8] sm:$0xf]  ;;  %v6774_v1 = vld [vmem:[%s10264_s2 + $0x1ec] sm:$0xf] }
  0x6e   : > { %1808 = vmatpush.bf16.msrb.mxu0 %v5553_v12  ;;  %1770 = vmatmul.bf16.vlgmr.msra.gmra.mxu1 %v7584_v57  ;;  %v4821_v12 = vor.u32 %v6724_v5, %v4820_v4  ;;  %v6748_v33 = vld [vmem:[%s10264_s2 + $0x114] sm:$0xf0]  ;;  %v5044_v41 = vld [vmem:[%s10264_s2 + $0x208] sm:$0xf]  ;;  %v5030_v2 = vld [vmem:[%s10264_s2 + $0x1f8] sm:$0xf0] }
  0x6f   : > { %1814 = vmatpush.bf16.msrb.mxu1 %v4901_v6  ;;  %v4948_v6 = vld [vmem:[%s10264_s2 + $0x148] sm:$0xf]  ;;  %v6904_v40 = vld [vmem:[%s10264_s2 + $0x5f4] sm:$0xf0]  ;;  %v6738_v4 = vld [vmem:[%s10264_s2 + $0xcc] sm:$0xf] }
  0x70   : > { %1795 = vmatpush.bf16.msrb.mxu2 %v5425_v15  ;;  %1783 = vmatmul.bf16.vlgmr.msra.gmra.mxu3 %v7777_v30  ;;  %v6820_v15 = vld [vmem:[%s10264_s2 + $0x354] sm:$0xf0]  ;;  %v4949_v16 = vor.u32 %v6756_v8, %v4948_v6  ;;  %v5556_v52 = vld [vmem:[%s10264_s2 + $0x608] sm:$0xf]  ;;  %v5541_v54 = vor.u32 %v6904_v40, %v5540_v37  ;;  %v4886_v5 = vld [vmem:[%s10264_s2 + $0xd8] sm:$0xf0] }
  0x71   : > { %1827 = vmatpush.bf16.msrb.mxu3 %v5029_v11  ;;  %v5076_v11 = vld [vmem:[%s10264_s2 + $0x248] sm:$0xf]  ;;  %v5205_v22 = vor.u32 %v6820_v15, %v5204_v14  ;;  %v6780_v42 = vld [vmem:[%s10264_s2 + $0x214] sm:$0xf0]  ;;  %v6770_v14 = vld [vmem:[%s10264_s2 + $0x1cc] sm:$0xf] }
  0x72   : > { %1840 = vmatpush.bf16.msra.mxu0 %v5157_v18  ;;  %v6720_v18 = vld [vmem:[%s10264_s2 + $0x34] sm:$0xf0]  ;;  %v5396_v56 = vld [vmem:[%s10264_s2 + $0x4c8] sm:$0xf]  ;;  %v5045_v59 = vor.u32 %v6780_v42, %v5044_v41  ;;  %v5014_v15 = vld [vmem:[%s10264_s2 + $0x1d8] sm:$0xf0] }
  0x73   : > { %1815 = vmatpush.bf16.msrb.mxu1 %v4885_v21  ;;  %1796 = vmatmul.bf16.vlgmr.msrb.gmra.mxu2 %v7788_v35  ;;  %v5077_v21 = vor.u32 %v6788_v13, %v5076_v11  ;;  %v6868_v58 = vld [vmem:[%s10264_s2 + $0x4d4] sm:$0xf0]  ;;  %v5380_v8 = vld [vmem:[%s10264_s2 + $0x4a8] sm:$0xf]  ;;  %v4889_v13 = vor.u32 %v6738_v4, %v4886_v5  ;;  %v6762_v40 = vld [vmem:[%s10264_s2 + $0x18c] sm:$0xf] }
  0x74   : > { %1853 = vmatpush.bf16.msra.mxu2 %v5285_v19  ;;  %v4932_v19 = vld [vmem:[%s10264_s2 + $0x128] sm:$0xf]  ;;  %v6900_v62 = vld [vmem:[%s10264_s2 + $0x5d4] sm:$0xf0]  ;;  %v4982_v41 = vld [vmem:[%s10264_s2 + $0x198] sm:$0xf0] }
  0x75   : > { %1828 = vmatpush.bf16.msrb.mxu3 %v5013_v25  ;;  %v4805_v25 = vor.u32 %v6720_v18, %v4804_v17  ;;  %v4933_v29 = vor.u32 %v6752_v20, %v4932_v19  ;;  %v5508_v11 = vld [vmem:[%s10264_s2 + $0x5a8] sm:$0xf]  ;;  %v6734_v17 = vld [vmem:[%s10264_s2 + $0xac] sm:$0xf]  ;;  %v4870_v18 = vld [vmem:[%s10264_s2 + $0xb8] sm:$0xf0] }
  0x76   : > { %1841 = vmatpush.bf16.msra.mxu0 %v5141_v31  ;;  %v6716_v31 = vld [vmem:[%s10264_s2 + $0x14] sm:$0xf0]  ;;  %v5364_v20 = vld [vmem:[%s10264_s2 + $0x488] sm:$0xf]  ;;  %v6754_v4 = vld [vmem:[%s10264_s2 + $0x14c] sm:$0xf] }
  0x77   : > { %1816 = vmatpush.bf16.msrb.mxu1 %v4869_v36  ;;  %v6872_v36 = vld [vmem:[%s10264_s2 + $0x4f4] sm:$0xf0]  ;;  %v4789_v43 = vor.u32 %v6716_v31, %v4788_v28  ;;  %v5492_v23 = vld [vmem:[%s10264_s2 + $0x588] sm:$0xf]  ;;  %v4854_v31 = vld [vmem:[%s10264_s2 + $0x98] sm:$0xf0] }
  0x78   : > { %1854 = vmatpush.bf16.msra.mxu2 %v5269_v32  ;;  %v4916_v32 = vld [vmem:[%s10264_s2 + $0x108] sm:$0xf]  ;;  %v5413_v49 = vor.u32 %v6872_v36, %v5412_v34  ;;  %v6892_v24 = vld [vmem:[%s10264_s2 + $0x594] sm:$0xf0]  ;;  %v4950_v5 = vld [vmem:[%s10264_s2 + $0x158] sm:$0xf0] }
  0x79   : > { %1829 = vmatpush.bf16.msrb.mxu3 %v4997_v39  ;;  %v5189_v39 = vor.u32 %v6816_v27, %v5188_v26  ;;  %v6766_v26 = vld [vmem:[%s10264_s2 + $0x1ac] sm:$0xf]  ;;  %v4998_v27 = vld [vmem:[%s10264_s2 + $0x1b8] sm:$0xf0]  ;;  %v6856_v34 = vld [vmem:[%s10264_s2 + $0x474] sm:$0xf0] }
  0x7a   : > { %1842 = vmatpush.bf16.msra.mxu0 %v5125_v44  ;;  %v5172_v44 = vld [vmem:[%s10264_s2 + $0x308] sm:$0xf]  ;;  %v5001_v36 = vor.u32 %v6766_v26, %v4998_v27 }
  0x7b   : > { %1817 = vmatpush.bf16.msrb.mxu1 %v4853_v48  ;;  %v4917_v48 = vor.u32 %v6748_v33, %v4916_v32  ;;  %v5493_v32 = vor.u32 %v6892_v24, %v5492_v23  ;;  %v5348_v33 = vld [vmem:[%s10264_s2 + $0x468] sm:$0xf]  ;;  %v6714_v24 = vld [vmem:[%s10264_s2 + $0xc] sm:$0xf] }
  0x7c   : > { %1855 = vmatpush.bf16.msra.mxu2 %v5253_v46  ;;  %v6812_v46 = vld [vmem:[%s10264_s2 + $0x314] sm:$0xf0]  ;;  %v5476_v37 = vld [vmem:[%s10264_s2 + $0x568] sm:$0xf]  ;;  %v5349_v42 = vor.u32 %v6856_v34, %v5348_v33  ;;  %v6802_v33 = vld [vmem:[%s10264_s2 + $0x2cc] sm:$0xf] }
  0x7d   : > { %1830 = vmatpush.bf16.msrb.mxu3 %v4981_v53  ;;  %5563 = vmatmul.msk.bf16.vlgmr.msrb.gmra.mxu0 %vm1628_vm0, %v7690_v45  ;;  %v6908_v53 = vld [vmem:[%s10264_s2 + $0x614] sm:$0xf0]  ;;  %v5142_v34 = vld [vmem:[%s10264_s2 + $0x2d8] sm:$0xf0] }
  0x7e   : > { %1843 = vmatpush.bf16.msra.mxu0 %v5109_v60  ;;  %v5173_v60 = vor.u32 %v6812_v46, %v5172_v44  ;;  %v5557_v0 = vor.u32 %v6908_v53, %v5556_v52  ;;  %v4838_v44 = vld [vmem:[%s10264_s2 + $0x78] sm:$0xf0]  ;;  %v6884_v52 = vld [vmem:[%s10264_s2 + $0x554] sm:$0xf0] }
  0x7f   : > { %1818 = vmatpush.bf16.msrb.mxu1 %v4837_v63  ;;  %v4905_v63 = vor.u32 %v6742_v47, %v4902_v50  ;;  %v5332_v47 = vld [vmem:[%s10264_s2 + $0x448] sm:$0xf] }
  0x80   : > { %1856 = vmatpush.bf16.msra.mxu2 %v5237_v61  ;;  %v5524_v61 = vld [vmem:[%s10264_s2 + $0x5c8] sm:$0xf] }
  0x81   : > { %1831 = vmatpush.bf16.msrb.mxu3 %v4965_v3  ;;  %v5397_v3 = vor.u32 %v6868_v58, %v5396_v56  ;;  %v5525_v6 = vor.u32 %v6900_v62, %v5524_v61  ;;  %v5460_v50 = vld [vmem:[%s10264_s2 + $0x548] sm:$0xf]  ;;  %v4966_v56 = vld [vmem:[%s10264_s2 + $0x178] sm:$0xf0] }
  0x82   : > { %1844 = vmatpush.bf16.msra.mxu0 %v5093_v9  ;;  %v6864_v9 = vld [vmem:[%s10264_s2 + $0x4b4] sm:$0xf0]  ;;  %v5461_v61 = vor.u32 %v6884_v52, %v5460_v50  ;;  %v5316_v62 = vld [vmem:[%s10264_s2 + $0x428] sm:$0xf]  ;;  %v6798_v50 = vld [vmem:[%s10264_s2 + $0x2ac] sm:$0xf] }
  0x83   : > { %1819 = vmatpush.bf16.msrb.mxu1 %v4821_v12  ;;  %v6896_v12 = vld [vmem:[%s10264_s2 + $0x5b4] sm:$0xf0]  ;;  %v5126_v52 = vld [vmem:[%s10264_s2 + $0x2b8] sm:$0xf0] }
  0x84   : > { %1857 = vmatpush.bf16.msra.mxu2 %v5221_v10  ;;  %v5033_v10 = vor.u32 %v6774_v1, %v5030_v2  ;;  %v5509_v19 = vor.u32 %v6896_v12, %v5508_v11  ;;  %v5444_v1 = vld [vmem:[%s10264_s2 + $0x528] sm:$0xf]  ;;  %v6880_v2 = vld [vmem:[%s10264_s2 + $0x534] sm:$0xf0] }
  0x85   : > { %1832 = vmatpush.bf16.msrb.mxu3 %v4949_v16  ;;  %v5381_v16 = vor.u32 %v6864_v9, %v5380_v8  ;;  %v6718_v8 = vld [vmem:[%s10264_s2 + $0x2c] sm:$0xf]  ;;  %v4806_v9 = vld [vmem:[%s10264_s2 + $0x38] sm:$0xf0]  ;;  %v5445_v11 = vor.u32 %v6880_v2, %v5444_v1  ;;  %v6844_v12 = vld [vmem:[%s10264_s2 + $0x414] sm:$0xf0] }
  0x86   : > { %1845 = vmatpush.bf16.msra.mxu0 %v5077_v21  ;;  %v6860_v21 = vld [vmem:[%s10264_s2 + $0x494] sm:$0xf0]  ;;  %v6794_v1 = vld [vmem:[%s10264_s2 + $0x28c] sm:$0xf]  ;;  %v5110_v2 = vld [vmem:[%s10264_s2 + $0x298] sm:$0xf0] }
  0x87   : > { %1820 = vmatpush.bf16.msrb.mxu1 %v4805_v25  ;;  %v4873_v25 = vor.u32 %v6734_v17, %v4870_v18  ;;  %v5365_v28 = vor.u32 %v6860_v21, %v5364_v20  ;;  %v5158_v17 = vld [vmem:[%s10264_s2 + $0x2f8] sm:$0xf0]  ;;  %v6838_v18 = vld [vmem:[%s10264_s2 + $0x3ec] sm:$0xf] }
  0x88   : > { %1858 = vmatpush.bf16.msra.mxu2 %v5205_v22  ;;  %v5017_v22 = vor.u32 %v6770_v14, %v5014_v15  ;;  %v6876_v14 = vld [vmem:[%s10264_s2 + $0x514] sm:$0xf0]  ;;  %v4953_v15 = vor.u32 %v6754_v4, %v4950_v5  ;;  %v5286_v20 = vld [vmem:[%s10264_s2 + $0x3f8] sm:$0xf0]  ;;  %v6750_v21 = vld [vmem:[%s10264_s2 + $0x12c] sm:$0xf] }
  0x89   : > { %1833 = vmatpush.bf16.msrb.mxu3 %v4933_v29  ;;  %v6730_v29 = vld [vmem:[%s10264_s2 + $0x8c] sm:$0xf]  ;;  %v5238_v5 = vld [vmem:[%s10264_s2 + $0x398] sm:$0xf0] }
  0x8a   : > { %1846 = vmatpush.bf16.msra.mxu0 %v5061_v38  ;;  %v6888_v38 = vld [vmem:[%s10264_s2 + $0x574] sm:$0xf0]  ;;  %v6826_v4 = vld [vmem:[%s10264_s2 + $0x38c] sm:$0xf] }
  0x8b   : > { %1821 = vmatpush.bf16.msrb.mxu1 %v4789_v43  ;;  %v6726_v43 = vld [vmem:[%s10264_s2 + $0x6c] sm:$0xf]  ;;  %v5477_v46 = vor.u32 %v6888_v38, %v5476_v37  ;;  %v5270_v38 = vld [vmem:[%s10264_s2 + $0x3d8] sm:$0xf0] }
  0x8c   : > { %1859 = vmatpush.bf16.msra.mxu2 %v5189_v39  ;;  %v4857_v39 = vor.u32 %v6730_v29, %v4854_v31  ;;  %v4841_v53 = vor.u32 %v6726_v43, %v4838_v44  ;;  %v5414_v29 = vld [vmem:[%s10264_s2 + $0x4f8] sm:$0xf0]  ;;  %v5289_v31 = vor.u32 %v6838_v18, %v5286_v20  ;;  %v5145_v44 = vor.u32 %v6802_v33, %v5142_v34  ;;  %v6886_v33 = vld [vmem:[%s10264_s2 + $0x56c] sm:$0xf] }
  0x8d   : > { %1834 = vmatpush.bf16.msrb.mxu3 %v4917_v48  ;;  %v6852_v48 = vld [vmem:[%s10264_s2 + $0x454] sm:$0xf0]  ;;  %v5542_v43 = vld [vmem:[%s10264_s2 + $0x5f8] sm:$0xf0] }
  0x8e   : > { %1847 = vmatpush.bf16.msra.mxu0 %v5045_v59  ;;  %1822 = vmatmul.bf16.vlgmr.msrb.gmra.mxu1 %v7582_v55  ;;  %v5333_v58 = vor.u32 %v6852_v48, %v5332_v47  ;;  %v6722_v59 = vld [vmem:[%s10264_s2 + $0x4c] sm:$0xf]  ;;  %v5398_v47 = vld [vmem:[%s10264_s2 + $0x4d8] sm:$0xf0] }
  0x8f   : > { %1866 = vmatpush.bf16.msra.mxu1 %v5413_v49  ;;  %v4985_v49 = vor.u32 %v6762_v40, %v4982_v41  ;;  %v4918_v40 = vld [vmem:[%s10264_s2 + $0x118] sm:$0xf0] }
  0x90   : > { %1860 = vmatpush.bf16.msra.mxu2 %v5173_v60  ;;  %1835 = vmatmul.bf16.vlgmr.msrb.gmra.mxu3 %v7613_v7  ;;  %v4822_v60 = vld [vmem:[%s10264_s2 + $0x58] sm:$0xf0] }
  0x91   : > { %1879 = vmatpush.bf16.msra.mxu3 %v5541_v54  ;;  %1848 = vmatmul.bf16.vlgmr.msra.gmra.mxu0 %v7571_v51  ;;  %v6758_v54 = vld [vmem:[%s10264_s2 + $0x16c] sm:$0xf]  ;;  %v5494_v20 = vld [vmem:[%s10264_s2 + $0x598] sm:$0xf0] }
  0x92   : > { %1899 = vmatpush.bf16.msrb.mxu0 %v5557_v0  ;;  %v4969_v0 = vor.u32 %v6758_v54, %v4966_v56  ;;  %v6830_v54 = vld [vmem:[%s10264_s2 + $0x3ac] sm:$0xf]  ;;  %v5254_v56 = vld [vmem:[%s10264_s2 + $0x3b8] sm:$0xf0] }
  0x93   : > { %1867 = vmatpush.bf16.msra.mxu1 %v5397_v3  ;;  %1861 = vmatmul.bf16.vlgmr.msra.gmra.mxu2 %v7584_v57  ;;  %v4825_v3 = vor.u32 %v6722_v59, %v4822_v60  ;;  %v6898_v59 = vld [vmem:[%s10264_s2 + $0x5cc] sm:$0xf]  ;;  %v5526_v60 = vld [vmem:[%s10264_s2 + $0x5d8] sm:$0xf0] }
  0x94   : > { %1905 = vmatpush.bf16.msrb.mxu2 %v4905_v63  ;;  %v6848_v63 = vld [vmem:[%s10264_s2 + $0x434] sm:$0xf0]  ;;  %v5478_v34 = vld [vmem:[%s10264_s2 + $0x578] sm:$0xf0] }
  0x95   : > { %1880 = vmatpush.bf16.msra.mxu3 %v5525_v6  ;;  %v5317_v6 = vor.u32 %v6848_v63, %v5316_v62  ;;  %v6862_v62 = vld [vmem:[%s10264_s2 + $0x4ac] sm:$0xf]  ;;  %v5382_v63 = vld [vmem:[%s10264_s2 + $0x4b8] sm:$0xf0] }
  0x96   : > { %1918 = vmatpush.bf16.msra.mxu0 %v5033_v10  ;;  %v5300_v10 = vld [vmem:[%s10264_s2 + $0x408] sm:$0xf] }
  0x97   : > { %1868 = vmatpush.bf16.msra.mxu1 %v5381_v16  ;;  %v6806_v16 = vld [vmem:[%s10264_s2 + $0x2ec] sm:$0xf]  ;;  %v5301_v23 = vor.u32 %v6844_v12, %v5300_v10  ;;  %v5113_v10 = vor.u32 %v6794_v1, %v5110_v2  ;;  %v5241_v12 = vor.u32 %v6826_v4, %v5238_v5 }
  0x98   : > { %1906 = vmatpush.bf16.msrb.mxu2 %v4889_v13  ;;  %v5428_v13 = vld [vmem:[%s10264_s2 + $0x508] sm:$0xf]  ;;  %v5161_v27 = vor.u32 %v6806_v16, %v5158_v17  ;;  %v6822_v16 = vld [vmem:[%s10264_s2 + $0x36c] sm:$0xf] }
  0x99   : > { %1881 = vmatpush.bf16.msra.mxu3 %v5509_v19  ;;  %v4809_v19 = vor.u32 %v6718_v8, %v4806_v9  ;;  %v5429_v26 = vor.u32 %v6876_v14, %v5428_v13  ;;  %v6894_v8 = vld [vmem:[%s10264_s2 + $0x5ac] sm:$0xf]  ;;  %v5510_v9 = vld [vmem:[%s10264_s2 + $0x5b8] sm:$0xf0] }
  0x9a   : > { %1919 = vmatpush.bf16.msra.mxu0 %v5017_v22  ;;  %v4934_v22 = vld [vmem:[%s10264_s2 + $0x138] sm:$0xf0]  ;;  %v6790_v13 = vld [vmem:[%s10264_s2 + $0x26c] sm:$0xf] }
  0x9b   : > { %1869 = vmatpush.bf16.msra.mxu1 %v5365_v28  ;;  %v6870_v28 = vld [vmem:[%s10264_s2 + $0x4ec] sm:$0xf]  ;;  %v5094_v14 = vld [vmem:[%s10264_s2 + $0x278] sm:$0xf0] }
  0x9c   : > { %1907 = vmatpush.bf16.msrb.mxu2 %v4873_v25  ;;  %v4790_v25 = vld [vmem:[%s10264_s2 + $0x18] sm:$0xf0]  ;;  %v5417_v41 = vor.u32 %v6870_v28, %v5414_v29  ;;  %v6818_v29 = vld [vmem:[%s10264_s2 + $0x34c] sm:$0xf] }
  0x9d   : > { %1882 = vmatpush.bf16.msra.mxu3 %v5493_v32  ;;  %v4937_v32 = vor.u32 %v6750_v21, %v4934_v22  ;;  %v4793_v37 = vor.u32 %v6714_v24, %v4790_v25  ;;  %v5097_v21 = vor.u32 %v6790_v13, %v5094_v14  ;;  %v6854_v22 = vld [vmem:[%s10264_s2 + $0x46c] sm:$0xf] }
  0x9e   : > { %1920 = vmatpush.bf16.msra.mxu0 %v5001_v36  ;;  %v6834_v36 = vld [vmem:[%s10264_s2 + $0x3cc] sm:$0xf] }
  0x9f   : > { %1870 = vmatpush.bf16.msra.mxu1 %v5349_v42  ;;  %v6902_v42 = vld [vmem:[%s10264_s2 + $0x5ec] sm:$0xf]  ;;  %v5273_v48 = vor.u32 %v6834_v36, %v5270_v38 }
  0xa0   : > { %1908 = vmatpush.bf16.msrb.mxu2 %v4857_v39  ;;  %v6746_v39 = vld [vmem:[%s10264_s2 + $0x10c] sm:$0xf] }
  0xa1   : > { %1883 = vmatpush.bf16.msra.mxu3 %v5477_v46  ;;  %5564 = vmatmul.msk.bf16.vlgmr.msrb.gmra.mxu0 %vm1628_vm0, %v7690_v45  ;;  %v6866_v46 = vld [vmem:[%s10264_s2 + $0x4cc] sm:$0xf] }
  0xa2   : > { %1921 = vmatpush.bf16.msra.mxu0 %v4985_v49  ;;  %v4921_v49 = vor.u32 %v6746_v39, %v4918_v40  ;;  %v6786_v25 = vld [vmem:[%s10264_s2 + $0x24c] sm:$0xf]  ;;  %v5334_v39 = vld [vmem:[%s10264_s2 + $0x458] sm:$0xf0] }
  0xa3   : > { %1871 = vmatpush.bf16.msra.mxu1 %v5333_v58  ;;  %v5401_v58 = vor.u32 %v6866_v46, %v5398_v47  ;;  %v6850_v38 = vld [vmem:[%s10264_s2 + $0x44c] sm:$0xf]  ;;  %v5190_v47 = vld [vmem:[%s10264_s2 + $0x338] sm:$0xf0] }
  0xa4   : > { %1909 = vmatpush.bf16.msrb.mxu2 %v4841_v53  ;;  %v5545_v53 = vor.u32 %v6902_v42, %v5542_v43  ;;  %v6782_v42 = vld [vmem:[%s10264_s2 + $0x22c] sm:$0xf]  ;;  %v5062_v43 = vld [vmem:[%s10264_s2 + $0x238] sm:$0xf0] }
  0xa5   : > { %1884 = vmatpush.bf16.msra.mxu3 %v5461_v61  ;;  %v5129_v61 = vor.u32 %v6798_v50, %v5126_v52  ;;  %v6814_v46 = vld [vmem:[%s10264_s2 + $0x32c] sm:$0xf]  ;;  %v5462_v52 = vld [vmem:[%s10264_s2 + $0x558] sm:$0xf0] }
  0xa6   : > { %1922 = vmatpush.bf16.msra.mxu0 %v4969_v0  ;;  %v5257_v0 = vor.u32 %v6830_v54, %v5254_v56  ;;  %v6882_v50 = vld [vmem:[%s10264_s2 + $0x54c] sm:$0xf]  ;;  %v5065_v54 = vor.u32 %v6782_v42, %v5062_v43 }
  0xa7   : > { %1872 = vmatpush.bf16.msra.mxu1 %v5317_v6  ;;  %v5385_v6 = vor.u32 %v6862_v62, %v5382_v63  ;;  %v6846_v56 = vld [vmem:[%s10264_s2 + $0x42c] sm:$0xf]  ;;  %v5465_v63 = vor.u32 %v6882_v50, %v5462_v52  ;;  %v6917_v50 = vld [vmem:[%s10266_s4 + $0x40] sm:$0xff] }
  0xa8   : > { %1910 = vmatpush.bf16.msrb.mxu2 %v4825_v3  ;;  %v5529_v3 = vor.u32 %v6898_v59, %v5526_v60  ;;  %v5193_v59 = vor.u32 %v6814_v46, %v5190_v47  ;;  %v6778_v60 = vld [vmem:[%s10264_s2 + $0x20c] sm:$0xf]  ;;  %v6909_v46 = vld [vmem:[%s10266_s4] sm:$0xff] }
  0xa9   : > { %1885 = vmatpush.bf16.msra.mxu3 %v5445_v11  ;;  %v6858_v11 = vld [vmem:[%s10264_s2 + $0x48c] sm:$0xf] }
  0xaa   : > { %1923 = vmatpush.bf16.msra.mxu0 %v4953_v15  ;;  %v5513_v15 = vor.u32 %v6894_v8, %v5510_v9  ;;  %v6810_v62 = vld [vmem:[%s10264_s2 + $0x30c] sm:$0xf] }
  0xab   : > { %1873 = vmatpush.bf16.msra.mxu1 %v5301_v23  ;;  %v5350_v23 = vld [vmem:[%s10264_s2 + $0x478] sm:$0xf0]  ;;  %v8484_v28 = vpop.f32.mrf.mxu1  ;;  %v6906_v2 = vld [vmem:[%s10264_s2 + $0x60c] sm:$0xf] }
  0xac   : > { %1911 = vmatpush.bf16.msrb.mxu2 %v4809_v19  ;;  %v6890_v19 = vld [vmem:[%s10264_s2 + $0x58c] sm:$0xf] }
  0xad   : > { %1886 = vmatpush.bf16.msra.mxu3 %v5429_v26  ;;  %v5078_v26 = vld [vmem:[%s10264_s2 + $0x258] sm:$0xf0]  ;;  %v6878_v5 = vld [vmem:[%s10264_s2 + $0x52c] sm:$0xf] }
  0xae   : > { %1924 = vmatpush.bf16.msra.mxu0 %v4937_v32  ;;  %1874 = vmatmul.bf16.vlgmr.msra.gmra.mxu1 %v7777_v30  ;;  %v5353_v32 = vor.u32 %v6854_v22, %v5350_v23  ;;  %v6915_v22 = vld [vmem:[%s10266_s4 + $0x30] sm:$0xff]  ;;  %v6910_v43 = vld [vmem:[%s10266_s4 + $0x8] sm:$0xff] }
  0xaf   : > { %1931 = vmatpush.bf16.msrb.mxu1 %v5161_v27  ;;  %v5497_v27 = vor.u32 %v6890_v19, %v5494_v20  ;;  %v5430_v19 = vld [vmem:[%s10264_s2 + $0x518] sm:$0xf0] }
  0xb0   : > { %1912 = vmatpush.bf16.msrb.mxu2 %v4793_v37  ;;  %1887 = vmatmul.bf16.vlgmr.msra.gmra.mxu3 %v7788_v35  ;;  %v8464_v17 = vpop.f32.mrf.mxu0  ;;  %v5081_v37 = vor.u32 %v6786_v25, %v5078_v26  ;;  %v6924_v20 = vld [vmem:[%s10266_s4 + $0x78] sm:$0xff]  ;;  %v6914_v26 = vld [vmem:[%s10266_s4 + $0x28] sm:$0xff] }
  0xb1   : > { %1944 = vmatpush.bf16.msrb.mxu3 %v5289_v31  ;;  %v5206_v31 = vld [vmem:[%s10264_s2 + $0x358] sm:$0xf0] }
  0xb2   : > { %1925 = vmatpush.bf16.msra.mxu0 %v4921_v49  ;;  %v5209_v40 = vor.u32 %v6818_v29, %v5206_v31  ;;  %v5337_v49 = vor.u32 %v6850_v38, %v5334_v39  ;;  %v6921_v31 = vld [vmem:[%s10266_s4 + $0x60] sm:$0xff] }
  0xb3   : > { %1932 = vmatpush.bf16.msrb.mxu1 %v5145_v44  ;;  %1913 = vmatmul.bf16.vlgmr.msrb.gmra.mxu2 %v7582_v55  ;;  %v5366_v55 = vld [vmem:[%s10264_s2 + $0x498] sm:$0xf0]  ;;  %v5481_v44 = vor.u32 %v6886_v33, %v5478_v34  ;;  %v1656_v1 = vpop.f32.mrf.mxu1 }
  0xb4   : > { %1957 = vmatpush.bf16.msra.mxu2 %v5417_v41  ;;  %v5369_v18 = vor.u32 %v6858_v11, %v5366_v55  ;;  %v8506_v41 = vpop.f32.mrf.mxu3  ;;  %v5302_v11 = vld [vmem:[%s10264_s2 + $0x418] sm:$0xf0] }
  0xb5   : > { %1945 = vmatpush.bf16.msrb.mxu3 %v5273_v48  ;;  %1926 = vmatmul.bf16.vlgmr.msra.gmra.mxu0 %v7613_v7  ;;  %v5222_v7 = vld [vmem:[%s10264_s2 + $0x378] sm:$0xf0]  ;;  %v8498_v36 = vpop.f32.mrf.mxu2 }
  0xb6   : > { %1970 = vmatpush.bf16.msrb.mxu0 %v5545_v53  ;;  %v5225_v24 = vor.u32 %v6822_v16, %v5222_v7  ;;  %v8529_v53 = vld [vmem:[%s10265_s3] sm:$0xf]  ;;  %v6920_v34 = vld [vmem:[%s10266_s4 + $0x58] sm:$0xff] }
  0xb7   : > { %1933 = vmatpush.bf16.msrb.mxu1 %v5129_v61  ;;  %v5046_v61 = vld [vmem:[%s10264_s2 + $0x218] sm:$0xf0]  ;;  %v640_v55 = vperm.slane %v8529_v53, 0 }
  0xb8   : > { %1958 = vmatpush.bf16.msra.mxu2 %v5401_v58  ;;  %v1643_v48 = vpop.f32.mrf.mxu0  ;;  %v5318_v58 = vld [vmem:[%s10264_s2 + $0x438] sm:$0xf0]  ;;  %v5049_v9 = vor.u32 %v6778_v60, %v5046_v61  ;;  %v6954_v60 = vld [vmem:[%s10268_s6 + $0x70] sm:$0xff] }
  0xb9   : > { %1946 = vmatpush.bf16.msrb.mxu3 %v5257_v0  ;;  %v5174_v0 = vld [vmem:[%s10264_s2 + $0x318] sm:$0xf0]  ;;  %v5321_v4 = vor.u32 %v6846_v56, %v5318_v58  ;;  %v641_v56 = vperm.slane %v8529_v53, 1 }
  0xba   : > { %1971 = vmatpush.bf16.msrb.mxu0 %v5529_v3  ;;  %v5558_v3 = vld [vmem:[%s10264_s2 + $0x618] sm:$0xf0] }
  0xbb   : > { %1934 = vmatpush.bf16.msrb.mxu1 %v5113_v10  ;;  %v6842_v10 = vld [vmem:[%s10264_s2 + $0x40c] sm:$0xf]  ;;  %v5561_v13 = vor.u32 %v6906_v2, %v5558_v3  ;;  %v6947_v48 = vld [vmem:[%s10268_s6 + $0x38] sm:$0xff]  ;;  %v6944_v2 = vld [vmem:[%s10268_s6 + $0x20] sm:$0xff] }
  0xbc   : > { %1959 = vmatpush.bf16.msra.mxu2 %v5385_v6  ;;  %v5446_v6 = vld [vmem:[%s10264_s2 + $0x538] sm:$0xf0]  ;;  %v1682_v14 = vpop.f32.mrf.mxu3  ;;  %v5305_v7 = vor.u32 %v6842_v10, %v5302_v11 }
  0xbd   : > { %1947 = vmatpush.bf16.msrb.mxu3 %v5241_v12  ;;  %v1669_v8 = vpop.f32.mrf.mxu2  ;;  %v5177_v12 = vor.u32 %v6810_v62, %v5174_v0  ;;  %v5449_v16 = vor.u32 %v6878_v5, %v5446_v6  ;;  %v6932_v61 = vld [vmem:[%s10266_s4 + $0xb8] sm:$0xff]  ;;  %v6953_v0 = vld [vmem:[%s10268_s6 + $0x68] sm:$0xff]  ;;  %v6931_v5 = vld [vmem:[%s10266_s4 + $0xb0] sm:$0xff] }
  0xbe   : > { %1972 = vmatpush.bf16.msrb.mxu0 %v5513_v15  ;;  %v6916_v15 = vld [vmem:[%s10266_s4 + $0x38] sm:$0xff] }
  0xbf   : > { %1935 = vmatpush.bf16.msrb.mxu1 %v5097_v21  ;;  %v1642_v21 = vadd.f32 %v8464_v17, %v640_v55  ;;  %v6923_v17 = vld [vmem:[%s10266_s4 + $0x70] sm:$0xff]  ;;  %v6943_v8 = vld [vmem:[%s10268_s6 + $0x18] sm:$0xff] }
  0xc0   : > { %1960 = vmatpush.bf16.msra.mxu2 %v5369_v18  ;;  %v6874_v18 = vld [vmem:[%s10264_s2 + $0x50c] sm:$0xf]  ;;  %v6951_v11 = vld [vmem:[%s10268_s6 + $0x58] sm:$0xff] }
  0xc1   : > { %1948 = vmatpush.bf16.msrb.mxu3 %v5225_v24  ;;  %v5433_v23 = vor.u32 %v6874_v18, %v5430_v19  ;;  %v1655_v25 = vadd.f32 %v8484_v28, %v1642_v21  ;;  %v6941_v19 = vld [vmem:[%s10268_s6 + $0x8] sm:$0xff] }
  0xc2   : > { %1973 = vmatpush.bf16.msrb.mxu0 %v5497_v27  ;;  %v6913_v27 = vld [vmem:[%s10266_s4 + $0x20] sm:$0xff] }
  0xc3   : > { %1936 = vmatpush.bf16.msrb.mxu1 %v5081_v37 }
  0xc4   : > { %1961 = vmatpush.bf16.msra.mxu2 %v5353_v32 }
  0xc5   : > { %1949 = vmatpush.bf16.msrb.mxu3 %v5209_v40  ;;  %v1719_v24 = vpop.f32.mrf.mxu2 }
  0xc6   : > { %1974 = vmatpush.bf16.msrb.mxu0 %v5481_v44 }
  0xc7   : > { %1937 = vmatpush.bf16.msrb.mxu1 %v5065_v54  ;;  %v6955_v54 = vld [vmem:[%s10268_s6 + $0x78] sm:$0xff] }
  0xc8   : > { %1962 = vmatpush.bf16.msra.mxu2 %v5337_v49 }
  0xc9   : > { %1950 = vmatpush.bf16.msrb.mxu3 %v5193_v59  ;;  %v6946_v59 = vld [vmem:[%s10268_s6 + $0x30] sm:$0xff] }
  0xca   : > { %1975 = vmatpush.bf16.msrb.mxu0 %v5465_v63  ;;  %v6945_v63 = vld [vmem:[%s10268_s6 + $0x28] sm:$0xff] }
  0xcb   : > { %1938 = vmatpush.bf16.msrb.mxu1 %v5049_v9  ;;  %v1706_v28 = vpop.f32.mrf.mxu1  ;;  %v6930_v9 = vld [vmem:[%s10266_s4 + $0xa8] sm:$0xff] }
  0xcc   : > { %1963 = vmatpush.bf16.msra.mxu2 %v5321_v4  ;;  %v6952_v4 = vld [vmem:[%s10268_s6 + $0x60] sm:$0xff] }
  0xcd   : > { %1951 = vmatpush.bf16.msrb.mxu3 %v5177_v12  ;;  %v1721_v29 = vpop.f32.mrf.mxu2  ;;  %v6942_v12 = vld [vmem:[%s10268_s6 + $0x10] sm:$0xff] }
  0xce   : > { %1976 = vmatpush.bf16.msrb.mxu0 %v5449_v16  ;;  %1939 = vmatmul.bf16.vlgmr.msrb.gmra.mxu1 %v7571_v51  ;;  %v6922_v51 = vld [vmem:[%s10266_s4 + $0x68] sm:$0xff]  ;;  %v6929_v16 = vld [vmem:[%s10266_s4 + $0xa0] sm:$0xff] }
  0xcf   : > { %1990 = vmatpush.bf16.msra.mxu1 %v5561_v13 }
  0xd0   : > { %1964 = vmatpush.bf16.msra.mxu2 %v5305_v7  ;;  %1952 = vmatmul.bf16.vlgmr.msrb.gmra.mxu3 %v7584_v57  ;;  %v1668_v57 = vadd.f32 %v8498_v36, %v1655_v25  ;;  %v6911_v36 = vld [vmem:[%s10266_s4 + $0x10] sm:$0xff] }
  0xd1   : > { %2268 = vmatpush.bf16.msra.mxu3 %v6916_v15  ;;  %v6950_v15 = vld [vmem:[%s10268_s6 + $0x50] sm:$0xff] }
  0xd2   : > { %1977 = vmatpush.bf16.msrb.mxu0 %v5433_v23  ;;  %v1681_v32 = vadd.f32 %v8506_v41, %v1668_v57  ;;  %v6919_v41 = vld [vmem:[%s10266_s4 + $0x50] sm:$0xff] }
  0xd3   : > { %2281 = vmatpush.bf16.msrb.mxu1 %v6924_v20  ;;  %1965 = vmatmul.bf16.vlgmr.msra.gmra.mxu2 %v7777_v30  ;;  %v1693_v30 = vpop.f32.mrf.mxu0  ;;  %v1732_v39 = vpop.f32.mrf.mxu3  ;;  %v6928_v20 = vld [vmem:[%s10266_s4 + $0x98] sm:$0xff] }
  0xd4   : > { %v1694_v33 = vadd.f32 %v1693_v30, %v1681_v32  ;;  %v1708_v40 = vpop.f32.mrf.mxu1  ;;  %v1733_v62 = vadd.f32 %v1732_v39, %v641_v56  ;;  %2294 = vmatpush.bf16.msrb.mxu2 %v6932_v61  ;;  %v6926_v30 = vld [vmem:[%s10266_s4 + $0x88] sm:$0xff]  ;;  %v642_v56 = vperm.slane %v8529_v53, 2 }
  0xd5   : > { %2269 = vmatpush.bf16.msra.mxu3 %v6915_v22  ;;  %1978 = vmatmul.bf16.vlgmr.msrb.gmra.mxu0 %v7788_v35  ;;  %v6912_v35 = vld [vmem:[%s10266_s4 + $0x18] sm:$0xff]  ;;  %v6949_v22 = vld [vmem:[%s10268_s6 + $0x48] sm:$0xff] }
  0xd6   : > { %v1707_v37 = vadd.f32 %v1706_v28, %v1694_v33  ;;  %v1745_v42 = vpop.f32.mrf.mxu2  ;;  %v6962_v33 = vld [vmem:[%s10268_s6 + $0xb0] sm:$0xff]  ;;  %v6961_v40 = vld [vmem:[%s10268_s6 + $0xa8] sm:$0xff] }
  0xd7   : > { %2282 = vmatpush.bf16.msrb.mxu1 %v6923_v17  ;;  %v1746_v1 = vadd.f32 %v1745_v42, %v1733_v62  ;;  %v6927_v17 = vld [vmem:[%s10266_s4 + $0x90] sm:$0xff] }
  0xd8   : > { %v1720_v44 = vadd.f32 %v1719_v24, %v1707_v37  ;;  %2295 = vmatpush.bf16.msrb.mxu2 %v6931_v5  ;;  %v6940_v24 = vld [vmem:[%s10268_s6] sm:$0xff] }
  0xd9   : > { %2270 = vmatpush.bf16.msra.mxu3 %v6914_v26 }
  0xda   : > { %v1996_v47 = vmax.f32 %v1720_v44, 0.0  ;;  %v6960_v44 = vld [vmem:[%s10268_s6 + $0xa0] sm:$0xff] }
  0xdb   : > { %2283 = vmatpush.bf16.msrb.mxu1 %v6922_v51  ;;  %v1695_v38 = vpop.f32.mrf.mxu0  ;;  %v1734_v49 = vpop.f32.mrf.mxu3  ;;  %v6948_v51 = vld [vmem:[%s10268_s6 + $0x40] sm:$0xff] }
  0xdc   : > { %v8639_v58 = vpack.c.bf16 %v1996_v47, %v1996_v47  ;;  %2296 = vmatpush.bf16.msrb.mxu2 %v6930_v9  ;;  %v6959_v49 = vld [vmem:[%s10268_s6 + $0x98] sm:$0xff]  ;;  %v6933_v9 = vld [vmem:[%s10266_s4 + $0xc0] sm:$0xff] }
  0xdd   : > { %2271 = vmatpush.bf16.msra.mxu3 %v6913_v27 }
  0xde   : > { %5565 = vmatmul.msk.bf16.vlgmr.msra.gmra.mxu1 %vm1628_vm0, %v7690_v45  ;;  %v6918_v45 = vld [vmem:[%s10266_s4 + $0x48] sm:$0xff]  ;;  %v1747_v52 = vpop.f32.mrf.mxu2 }
  0xdf   : > { %2284 = vmatpush.bf16.msrb.mxu1 %v6921_v31  ;;  %v6925_v31 = vld [vmem:[%s10266_s4 + $0x80] sm:$0xff]  ;;  %v6958_v52 = vld [vmem:[%s10268_s6 + $0x90] sm:$0xff] }
  0xe0   : > { %2297 = vmatpush.bf16.msrb.mxu2 %v6929_v16 }
  0xe1   : > { %2272 = vmatpush.bf16.msra.mxu3 %v6912_v35  ;;  %v6963_v35 = vld [vmem:[%s10268_s6 + $0xb8] sm:$0xff] }
  0xe3   : > { %2285 = vmatpush.bf16.msrb.mxu1 %v6920_v34  ;;  %v2066_v34 = vld [vmem:[%s10266_s4 + $0xf8] sm:$0x3] }
  0xe4   : > { %2298 = vmatpush.bf16.msrb.mxu2 %v6928_v20 }
  0xe5   : > { %2273 = vmatpush.bf16.msra.mxu3 %v6911_v36  ;;  %v2196_v36 = vunpack.c.l.b16 %v2066_v34 }
  0xe7   : > { %2286 = vmatpush.bf16.msrb.mxu1 %v6919_v41  ;;  %v2228_v38 = vpack.c.b16 %v2196_v36, %v2196_v36 }
  0xe8   : > { %2299 = vmatpush.bf16.msrb.mxu2 %v6927_v17  ;;  %v6968_v17 = vld [vmem:[%s10268_s6 + $0xe0] sm:$0xff] }
  0xe9   : > { %2274 = vmatpush.bf16.msra.mxu3 %v6910_v43  ;;  %v2266_v41 = vsel %vm2264_vm1, %v2228_v38, 0  ;;  %v6939_v43 = vld [vmem:[%s10266_s4 + $0xf0] sm:$0xff] }
  0xea   : > { %v1758_v3 = vpop.f32.mrf.mxu0  ;;  %2307 = vmatpush.bf16.msra.mxu0 %v2266_v41 }
  0xeb   : > { %2287 = vmatpush.bf16.msrb.mxu1 %v6918_v45  ;;  %v1759_v6 = vadd.f32 %v1758_v3, %v1746_v1  ;;  %v1771_v10 = vpop.f32.mrf.mxu1  ;;  %v6934_v3 = vld [vmem:[%s10266_s4 + $0xc8] sm:$0xff] }
  0xec   : > { %2300 = vmatpush.bf16.msrb.mxu2 %v6926_v30 }
  0xed   : > { %2275 = vmatpush.bf16.msra.mxu3 %v6909_v46  ;;  %v1772_v55 = vadd.f32 %v1771_v10, %v1759_v6  ;;  %v2382_v6 = vld [vmem:[%s10268_s6 + $0xf8] sm:$0x3] }
  0xee   : > { %2308 = vmatpush.bf16.msra.mxu0 %v6939_v43 }
  0xef   : > { %2288 = vmatpush.bf16.msrb.mxu1 %v6917_v50  ;;  %v6937_v50 = vld [vmem:[%s10266_s4 + $0xe0] sm:$0xff] }
  0xf0   : > { %2276 = vmatmul.bf16.vlgmr.msra.gmra.mxu3 %v8639_v58  ;;  %2301 = vmatpush.bf16.msrb.mxu2 %v6925_v31  ;;  %v6964_v31 = vld [vmem:[%s10268_s6 + $0xc0] sm:$0xff] }
  0xf1   : > { %2579 = vmatpush.bf16.msrb.mxu3 %v6947_v48  ;;  %v6938_v48 = vld [vmem:[%s10266_s4 + $0xe8] sm:$0xff] }
  0xf2   : > { %v1760_v13 = vpop.f32.mrf.mxu0  ;;  %2309 = vmatpush.bf16.msra.mxu0 %v6938_v48 }
  0xf3   : > { %2592 = vmatpush.bf16.msra.mxu1 %v6955_v54  ;;  %v1784_v14 = vpop.f32.mrf.mxu3  ;;  %v1773_v21 = vpop.f32.mrf.mxu1 }
  0xf4   : > { %v1785_v7 = vadd.f32 %v1784_v14, %v1772_v55  ;;  %2605 = vmatpush.bf16.msra.mxu2 %v6963_v35  ;;  %v6969_v21 = vld [vmem:[%s10268_s6 + $0xe8] sm:$0xff] }
  0xf5   : > { %2580 = vmatpush.bf16.msrb.mxu3 %v6946_v59 }
  0xf6   : > { %v1797_v18 = vpop.f32.mrf.mxu2  ;;  %2310 = vmatpush.bf16.msra.mxu0 %v6937_v50 }
  0xf7   : > { %2593 = vmatpush.bf16.msra.mxu1 %v6954_v60  ;;  %v1798_v23 = vadd.f32 %v1797_v18, %v1785_v7  ;;  %v6957_v60 = vld [vmem:[%s10268_s6 + $0x88] sm:$0xff] }
  0xf8   : > { %2606 = vmatpush.bf16.msra.mxu2 %v6962_v33 }
  0xf9   : > { %2581 = vmatpush.bf16.msrb.mxu3 %v6945_v63  ;;  %v6935_v63 = vld [vmem:[%s10266_s4 + $0xd0] sm:$0xff] }
  0xfa   : > { %v1810_v25 = vpop.f32.mrf.mxu0 }
  0xfb   : > { %2594 = vmatpush.bf16.msra.mxu1 %v6953_v0  ;;  %v1786_v26 = vpop.f32.mrf.mxu3  ;;  %v1811_v57 = vadd.f32 %v1810_v25, %v1798_v23  ;;  %v6956_v0 = vld [vmem:[%s10268_s6 + $0x80] sm:$0xff] }
  0xfc   : > { %2607 = vmatpush.bf16.msra.mxu2 %v6961_v40  ;;  %v6967_v26 = vld [vmem:[%s10268_s6 + $0xd8] sm:$0xff] }
  0xfd   : > { %2582 = vmatpush.bf16.msrb.mxu3 %v6944_v2  ;;  %v1997_v28 = vmax.f32 %v1811_v57, 0.0  ;;  %v643_v57 = vperm.slane %v8529_v53, 3 }
  0xfe   : > { %v1799_v27 = vpop.f32.mrf.mxu2 }
  0xff   : > { %2595 = vmatpush.bf16.msra.mxu1 %v6952_v4  ;;  %v2001_v29 = vpack.c.bf16 %v1997_v28, %v1997_v28  ;;  %v6965_v27 = vld [vmem:[%s10268_s6 + $0xc8] sm:$0xff] }
 0x100   : > { %2608 = vmatpush.bf16.msra.mxu2 %v6960_v44 }
 0x101   : > { %2583 = vmatpush.bf16.msrb.mxu3 %v6943_v8  ;;  %2289 = vmatmul.bf16.vlgmr.msrb.gmra.mxu1 %v2001_v29  ;;  %v2512_v8 = vunpack.c.l.b16 %v2382_v6 }
 0x102   : > { %v1812_v32 = vpop.f32.mrf.mxu0 }
 0x103   : > { %2596 = vmatpush.bf16.msra.mxu1 %v6951_v11  ;;  %v2544_v10 = vpack.c.b16 %v2512_v8, %v2512_v8 }
 0x104   : > { %2609 = vmatpush.bf16.msra.mxu2 %v6959_v49  ;;  %v7205_v49 = vld [vmem:[%s10267_s5] ss:$0 sm:$0xff] }
 0x105   : > { %2584 = vmatpush.bf16.msrb.mxu3 %v6942_v12  ;;  %v2577_v55 = vsel %vm2264_vm1, %v2544_v10, 0 }
 0x107   : > { %2597 = vmatpush.bf16.msra.mxu1 %v6950_v15  ;;  %v6970_v15 = vld [vmem:[%s10268_s6 + $0xf0] sm:$0xff] }
 0x108   : > { %2610 = vmatpush.bf16.msra.mxu2 %v6958_v52 }
 0x109   : > { %2585 = vmatpush.bf16.msrb.mxu3 %v6941_v19 }
 0x10b   : > { %2598 = vmatpush.bf16.msra.mxu1 %v6949_v22  ;;  %v1823_v39 = vpop.f32.mrf.mxu1 }
 0x10c   : > { %v1824_v62 = vadd.f32 %v1823_v39, %v642_v56  ;;  %2611 = vmatpush.bf16.msra.mxu2 %v6957_v60 }
 0x10d   : > { %2586 = vmatpush.bf16.msrb.mxu3 %v6940_v24 }
 0x10e   : > { %v1849_v37 = vpop.f32.mrf.mxu0 }
 0x10f   : > { %2599 = vmatpush.bf16.msra.mxu1 %v6948_v51  ;;  %v6966_v51 = vld [vmem:[%s10268_s6 + $0xd0] sm:$0xff] }
 0x110   : > { %2587 = vmatmul.bf16.vlgmr.msrb.gmra.mxu3 %v8639_v58  ;;  %v6936_v58 = vld [vmem:[%s10266_s4 + $0xd8] sm:$0xff]  ;;  %2612 = vmatpush.bf16.msra.mxu2 %v6956_v0 }
 0x111   : > { %2311 = vmatpush.bf16.msra.mxu0 %v6936_v58 }
 0x112   : > { %2600 = vmatmul.bf16.vlgmr.msra.gmra.mxu1 %v2001_v29 }
 0x113   : > { %v1836_v42 = vpop.f32.mrf.mxu3  ;;  %v1825_v47 = vpop.f32.mrf.mxu1 }
 0x114   : > { %v1837_v1 = vadd.f32 %v1836_v42, %v1824_v62 }
 0x115   : > { %2312 = vmatpush.bf16.msra.mxu0 %v6935_v63 }
 0x116   : > { %v1851_v45 = vpop.f32.mrf.mxu0  ;;  %v1862_v46 = vpop.f32.mrf.mxu2  ;;  %v1850_v4 = vadd.f32 %v1849_v37, %v1837_v1 }
 0x118   : > { %v1863_v11 = vadd.f32 %v1862_v46, %v1850_v4  ;;  %v2641_v4 = vld [vmem:[%s10270_s8 + $0x20] sm:$0x33] }
 0x119   : > { %2313 = vmatpush.bf16.msra.mxu0 %v6934_v3  ;;  %v2667_v6 = vunpack.c.l.b16 %v2641_v4  ;;  %v2668_v8 = vunpack.c.h.b16 %v2641_v4  ;;  %v6426_v4 = vld [vmem:[%s10272_s10 + $0x498] sm:$0xf] }
 0x11b   : > { %v1838_v54 = vpop.f32.mrf.mxu3  ;;  %v2675_v10 = vpack.c.b16 %v2667_v6, %v2667_v6  ;;  %v6174_v6 = vld [vmem:[%s10272_s10 + $0x2a0] sm:$0xf] }
 0x11d   : > { %2314 = vmatpush.bf16.msra.mxu0 %v6933_v9 }
 0x11e   : > { %v1901_v59 = vpop.f32.mrf.mxu0  ;;  %v1864_v61 = vpop.f32.mrf.mxu2 }
 0x121   : > { %2618 = vmatpush.bf16.msrb.mxu0 %v2577_v55 }
 0x125   : > { %2619 = vmatpush.bf16.msrb.mxu0 %v6970_v15 }
 0x126   : > { %v1903_v2 = vpop.f32.mrf.mxu0 }
 0x129   : > { %2620 = vmatpush.bf16.msrb.mxu0 %v6969_v21  ;;  %v5826_v21 = vld [vmem:[%s10270_s8 + $0x8] sm:$0xf] }
 0x12b   : > { %v1875_v5 = vpop.f32.mrf.mxu1 }
 0x12c   : > { %v1876_v12 = vadd.f32 %v1875_v5, %v1863_v11  ;;  %v2642_v5 = vld [vmem:[%s10270_s8 + $0x28] sm:$0x33]  ;;  %v2676_v11 = vpack.c.b16 %v2668_v8, %v2668_v8  ;;  %v7062_v8 = vld [vmem:[%s10272_s10 + $0x2b8] sm:$0xf0] }
 0x12d   : > { %2621 = vmatpush.bf16.msrb.mxu0 %v6968_v17  ;;  %v2669_v9 = vunpack.c.l.b16 %v2642_v5 }
 0x12f   : > { %v2677_v55 = vpack.c.b16 %v2669_v9, %v2669_v9 }
 0x131   : > { %2622 = vmatpush.bf16.msrb.mxu0 %v6967_v26  ;;  %v2694_v15 = vsel %vm2264_vm1, %v2677_v55, 0 }
 0x132   : > { %v1927_v13 = vpop.f32.mrf.mxu0 }
 0x133   : > { %v1888_v14 = vpop.f32.mrf.mxu3  ;;  %v1877_v7 = vpop.f32.mrf.mxu1 }
 0x134   : > { %v1889_v16 = vadd.f32 %v1888_v14, %v1876_v12  ;;  %v2691_v14 = vsel %vm2264_vm1, %v2676_v11, 0  ;;  %v6973_v7 = vld [vmem:[%s10270_s8 + $0xc] sm:$0xf0] }
 0x135   : > { %2623 = vmatpush.bf16.msrb.mxu0 %v6966_v51  ;;  %2718 = vmatpush.bf16.msrb.mxu1 %v2691_v14  ;;  %v6972_v51 = vld [vmem:[%s10270_s8 + $0xc] sm:$0xf] }
 0x136   : > { %v1902_v18 = vadd.f32 %v1901_v59, %v1889_v16  ;;  %v1914_v19 = vpop.f32.mrf.mxu2  ;;  %v7206_v59 = vld [vmem:[%s10269_s7] ss:$0 sm:$0xff] }
 0x137   : > { %v1915_v30 = vadd.f32 %v1914_v19, %v643_v57  ;;  %v5818_v16 = vld [vmem:[%s10270_s8] sm:$0xf]  ;;  %v5828_v57 = vld [vmem:[%s10270_s8 + $0x18] sm:$0xf0] }
 0x138   : > { %v1998_v20 = vmax.f32 %v1902_v18, 0.0  ;;  %v6971_v18 = vld [vmem:[%s10270_s8 + $0x4] sm:$0xf]  ;;  %v5819_v19 = vor.u32 %v6973_v7, %v5818_v16  ;;  %v6398_v16 = vld [vmem:[%s10272_s10 + $0x460] sm:$0xf] }
 0x139   : > { %2624 = vmatpush.bf16.msrb.mxu0 %v6965_v27  ;;  %v1928_v29 = vadd.f32 %v1927_v13, %v1915_v30  ;;  %v2688_v13 = vsel %vm2264_vm1, %v2675_v10, 0  ;;  %v7118_v7 = vld [vmem:[%s10272_s10 + $0x478] sm:$0xf0] }
 0x13a   : > { %v2002_v22 = vpack.c.bf16 %v1998_v20, %v1998_v20  ;;  %v1929_v23 = vpop.f32.mrf.mxu0  ;;  %2705 = vmatpush.bf16.msra.mxu3 %v2688_v13  ;;  %v5820_v20 = vld [vmem:[%s10270_s8 + $0x10] sm:$0xf0]  ;;  %v7006_v13 = vld [vmem:[%s10272_s10 + $0xf8] sm:$0xf0] }
 0x13b   : > { %v1890_v24 = vpop.f32.mrf.mxu3  ;;  %v5823_v23 = vor.u32 %v6971_v18, %v5820_v20  ;;  %v8906_v18 = vld [vmem:[%s10272_s10 + $0x6c8] sm:$0x33] }
 0x13c   : > { %2302 = vmatmul.bf16.vlgmr.msrb.gmra.mxu2 %v2002_v22  ;;  %v6146_v20 = vld [vmem:[%s10272_s10 + $0x268] sm:$0xf] }
 0x13d   : > { %2625 = vmatpush.bf16.msrb.mxu0 %v6964_v31  ;;  %2731 = vmatpush.bf16.msrb.mxu2 %v2694_v15  ;;  %v6175_v15 = vor.u32 %v7062_v8, %v6174_v6  ;;  %v7090_v6 = vld [vmem:[%s10272_s10 + $0x398] sm:$0xf0] }
 0x13e   : > { %v1916_v25 = vpop.f32.mrf.mxu2  ;;  %2706 = vmatpush.bf16.msra.mxu3 %v5819_v19  ;;  %2719 = vmatpush.bf16.msrb.mxu1 %v5823_v23 }
 0x13f   : > { %v2670_v25 = vunpack.c.h.b16 %v2642_v5  ;;  %v7125_v5 = vld [vmem:[%s10272_s10 + $0x4b0] sm:$0xf0] }
 0x140   : > { %v6427_v55 = vor.u32 %v7125_v5, %v6426_v4  ;;  %v6978_v4 = vld [vmem:[%s10272_s10 + $0x18] sm:$0xf0]  ;;  %v6286_v5 = vld [vmem:[%s10272_s10 + $0x380] sm:$0xf] }
 0x141   : > { %v2678_v26 = vpack.c.b16 %v2670_v25, %v2670_v25  ;;  %v6399_v25 = vor.u32 %v7118_v7, %v6398_v16  ;;  %v7073_v16 = vld [vmem:[%s10272_s10 + $0x314] sm:$0xf]  ;;  %v6232_v7 = vld [vmem:[%s10272_s10 + $0x32c] sm:$0xf0] }
 0x143   : > { %v2697_v27 = vsel %vm2264_vm1, %v2678_v26, 0  ;;  %v5922_v26 = vld [vmem:[%s10272_s10 + $0xa8] sm:$0xf] }
 0x144   : > { %2744 = vmatpush.bf16.msrb.mxu3 %v2697_v27 }
 0x14b   : > { %v1940_v28 = vpop.f32.mrf.mxu1 }
 0x14c   : > { %2613 = vmatmul.bf16.vlgmr.msra.gmra.mxu2 %v2002_v22  ;;  %v1941_v32 = vadd.f32 %v1940_v28, %v1928_v29  ;;  %v6974_v22 = vld [vmem:[%s10270_s8 + $0x14] sm:$0xf0]  ;;  %v5831_v28 = vor.u32 %v6972_v51, %v5828_v57  ;;  %v6999_v51 = vld [vmem:[%s10272_s10 + $0xc0] sm:$0xf0]  ;;  %v6370_v57 = vld [vmem:[%s10272_s10 + $0x428] sm:$0xf] }
 0x14d   : > { %v5827_v24 = vor.u32 %v6974_v22, %v5826_v21  ;;  %v7055_v21 = vld [vmem:[%s10272_s10 + $0x280] sm:$0xf0]  ;;  %v3713_v22 = vunpack.c.l.b16 %v8906_v18 }
 0x14e   : > { %2745 = vmatpush.bf16.msrb.mxu3 %v5831_v28  ;;  %v7111_v28 = vld [vmem:[%s10272_s10 + $0x440] sm:$0xf0] }
 0x14f   : > { %2732 = vmatpush.bf16.msrb.mxu2 %v5827_v24  ;;  %v3937_v27 = vpack.c.b16 %v3713_v22, %v3713_v22 }
 0x152   : > { %v1979_v33 = vpop.f32.mrf.mxu0 }
 0x153   : > { %v1953_v35 = vpop.f32.mrf.mxu3  ;;  %v1942_v53 = vpop.f32.mrf.mxu1 }
 0x154   : > { %v1954_v34 = vadd.f32 %v1953_v35, %v1941_v32  ;;  %v7083_v53 = vld [vmem:[%s10272_s10 + $0x360] sm:$0xf0] }
 0x156   : > { %v1966_v36 = vpop.f32.mrf.mxu2 }
 0x157   : > { %v1967_v37 = vadd.f32 %v1966_v36, %v1954_v34  ;;  %v6258_v34 = vld [vmem:[%s10272_s10 + $0x348] sm:$0xf]  ;;  %v6230_v36 = vld [vmem:[%s10272_s10 + $0x310] sm:$0xf] }
 0x159   : > { %v1980_v40 = vadd.f32 %v1979_v33, %v1967_v37 }
 0x15a   : > { %v1981_v39 = vpop.f32.mrf.mxu0 }
 0x15b   : > { %v1955_v38 = vpop.f32.mrf.mxu3  ;;  %v1992_v41 = vpop.f32.mrf.mxu1  ;;  %v6259_v39 = vor.u32 %v7083_v53, %v6258_v34  ;;  %v5923_v53 = vor.u32 %v6999_v51, %v5922_v26  ;;  %v7129_v26 = vld [vmem:[%s10272_s10 + $0x4d4] sm:$0xf]  ;;  %v6235_v51 = vor.u32 %v7073_v16, %v6232_v7  ;;  %v6344_v16 = vld [vmem:[%s10272_s10 + $0x40c] sm:$0xf0] }
 0x15c   : > { %v1993_v42 = vadd.f32 %v1992_v41, %v1980_v40  ;;  %v7076_v40 = vld [vmem:[%s10272_s10 + $0x328] sm:$0xf0]  ;;  %v7185_v7 = vld [vmem:[%s10272_s10 + $0x694] sm:$0xf] }
 0x15d   : > { %4198 = vmatpush.bf16.msra.mxu1 %v6259_v39  ;;  %v6342_v39 = vld [vmem:[%s10272_s10 + $0x3f0] sm:$0xf] }
 0x15e   : > { %v1968_v43 = vpop.f32.mrf.mxu2  ;;  %v1999_v44 = vmax.f32 %v1993_v42, 0.0  ;;  %v6034_v42 = vld [vmem:[%s10272_s10 + $0x188] sm:$0xf] }
 0x15f   : > { %v7027_v43 = vld [vmem:[%s10272_s10 + $0x1a0] sm:$0xf0] }
 0x160   : > { %v2003_v45 = vpack.c.bf16 %v1999_v44, %v1999_v44  ;;  %v6482_v44 = vld [vmem:[%s10272_s10 + $0x508] sm:$0xf] }
 0x162   : > { %5690 = vmatmul.msk.bf16.vlgmr.msra.gmra.mxu0 %vm2260_vm2, %v2003_v45 }
 0x163   : > { %v1994_v46 = vpop.f32.mrf.mxu1 }
 0x164   : > { %v6231_v46 = vor.u32 %v7076_v40, %v6230_v36  ;;  %v6371_v36 = vor.u32 %v7111_v28, %v6370_v57  ;;  %v6456_v57 = vld [vmem:[%s10272_s10 + $0x4ec] sm:$0xf0]  ;;  %v7066_v28 = vld [vmem:[%s10272_s10 + $0x2dc] sm:$0xf] }
 0x166   : > { %4199 = vmatpush.bf16.msra.mxu1 %v6231_v46  ;;  %v7041_v46 = vld [vmem:[%s10272_s10 + $0x210] sm:$0xf0] }
 0x172   : > { %5815 = vmatmul.msk.bf16.vlgmr.msrb.gmra.mxu0 %vm2260_vm2, %v2003_v45 }
 0x173   : > { %v2277_v47 = vpop.f32.mrf.mxu3 }
 0x174   : > { %v2278_v50 = vadd.f32 %v7205_v49, %v2277_v47  ;;  %v6035_v47 = vor.u32 %v7027_v43, %v6034_v42  ;;  %v6202_v49 = vld [vmem:[%s10272_s10 + $0x2d8] sm:$0xf]  ;;  %v7104_v42 = vld [vmem:[%s10272_s10 + $0x408] sm:$0xf0] }
 0x175   : > { %v6650_v43 = vld [vmem:[%s10272_s10 + $0x658] sm:$0xf] }
 0x176   : > { %4185 = vmatpush.bf16.msra.mxu0 %v6035_v47 }
 0x17b   : > { %v2279_v48 = vpop.f32.mrf.mxu3 }
 0x17c   : > { %v7139_v48 = vld [vmem:[%s10272_s10 + $0x520] sm:$0xf0] }
 0x17e   : > { %v2290_v52 = vpop.f32.mrf.mxu1 }
 0x17f   : > { %v2291_v54 = vadd.f32 %v2290_v52, %v2278_v50  ;;  %v6483_v50 = vor.u32 %v7139_v48, %v6482_v44  ;;  %v7069_v52 = vld [vmem:[%s10272_s10 + $0x2f0] sm:$0xf0]  ;;  %v6343_v48 = vor.u32 %v7104_v42, %v6342_v39 }
 0x180   : > { %v7181_v44 = vld [vmem:[%s10272_s10 + $0x670] sm:$0xf0] }
 0x181   : > { %4211 = vmatpush.bf16.msra.mxu2 %v6483_v50  ;;  %v6985_v50 = vld [vmem:[%s10272_s10 + $0x50] sm:$0xf0] }
 0x182   : > { %v7153_v39 = vld [vmem:[%s10272_s10 + $0x590] sm:$0xf0] }
 0x186   : > { %v2292_v58 = vpop.f32.mrf.mxu1 }
 0x18f   : > { %v2601_v62 = vpop.f32.mrf.mxu1 }
 0x193   : > { %v2588_v56 = vpop.f32.mrf.mxu3 }
 0x194   : > { %v2589_v61 = vadd.f32 %v7206_v59, %v2588_v56  ;;  %v7020_v56 = vld [vmem:[%s10272_s10 + $0x168] sm:$0xf0]  ;;  %v6454_v59 = vld [vmem:[%s10272_s10 + $0x4d0] sm:$0xf] }
 0x196   : > { %v2602_v63 = vadd.f32 %v2601_v62, %v2589_v61 }
 0x197   : > { %v2603_v0 = vpop.f32.mrf.mxu1 }
 0x198   : > { %v5978_v0 = vld [vmem:[%s10272_s10 + $0x118] sm:$0xf] }
 0x19b   : > { %v2590_v60 = vpop.f32.mrf.mxu3 }
 0x19c   : > { %v7132_v60 = vld [vmem:[%s10272_s10 + $0x4e8] sm:$0xf0] }
 0x1bf   : > { %v2303_v1 = vpop.f32.mrf.mxu2 }
 0x1c0   : > { %v2304_v29 = vadd.f32 %v2303_v1, %v2291_v54  ;;  %v6006_v54 = vld [vmem:[%s10272_s10 + $0x150] sm:$0xf]  ;;  %v7013_v1 = vld [vmem:[%s10272_s10 + $0x130] sm:$0xf0] }
 0x1c1   : > { %v6007_v58 = vor.u32 %v7020_v56, %v6006_v54  ;;  %v5979_v10 = vor.u32 %v7013_v1, %v5978_v0  ;;  %v6651_v54 = vor.u32 %v7181_v44, %v6650_v43  ;;  %v6260_v0 = vld [vmem:[%s10272_s10 + $0x364] sm:$0xf0] }
 0x1c3   : > { %4186 = vmatpush.bf16.msra.mxu0 %v6007_v58  ;;  %v7097_v58 = vld [vmem:[%s10272_s10 + $0x3d0] sm:$0xf0] }
 0x1c7   : > { %v2305_v2 = vpop.f32.mrf.mxu2  ;;  %4187 = vmatpush.bf16.msra.mxu0 %v5979_v10  ;;  %v7024_v10 = vld [vmem:[%s10272_s10 + $0x18c] sm:$0xf] }
 0x1c8   : > { %v2633_v2 = vld [vmem:[%s423_s15] sm:$0xff] }
 0x1cf   : > { %v2614_v3 = vpop.f32.mrf.mxu2 }
 0x1d0   : > { %v2615_v31 = vadd.f32 %v2614_v3, %v2602_v63  ;;  %v6455_v63 = vor.u32 %v7132_v60, %v6454_v59  ;;  %v6203_v3 = vor.u32 %v7069_v52, %v6202_v49  ;;  %v5866_v49 = vld [vmem:[%s10272_s10 + $0x38] sm:$0xf]  ;;  %v6622_v59 = vld [vmem:[%s10272_s10 + $0x620] sm:$0xf]  ;;  %v7174_v60 = vld [vmem:[%s10272_s10 + $0x638] sm:$0xf0] }
 0x1d1   : > { %v6314_v52 = vld [vmem:[%s10272_s10 + $0x3b8] sm:$0xf]  ;;  %v5867_v1 = vor.u32 %v6985_v50, %v5866_v49  ;;  %v6623_v8 = vor.u32 %v7174_v60, %v6622_v59  ;;  %v6400_v49 = vld [vmem:[%s10272_s10 + $0x47c] sm:$0xf0] }
 0x1d2   : > { %4212 = vmatpush.bf16.msra.mxu2 %v6455_v63  ;;  %4200 = vmatpush.bf16.msra.mxu1 %v6203_v3  ;;  %v7080_v63 = vld [vmem:[%s10272_s10 + $0x34c] sm:$0xf]  ;;  %v6315_v3 = vor.u32 %v7097_v58, %v6314_v52  ;;  %v6510_v50 = vld [vmem:[%s10272_s10 + $0x540] sm:$0xf]  ;;  %v7146_v52 = vld [vmem:[%s10272_s10 + $0x558] sm:$0xf0] }
 0x1d3   : > { %v6511_v60 = vor.u32 %v7146_v52, %v6510_v50  ;;  %v7143_v50 = vld [vmem:[%s10272_s10 + $0x544] sm:$0xf]  ;;  %v6512_v52 = vld [vmem:[%s10272_s10 + $0x55c] sm:$0xf0] }
 0x1d6   : > { %4213 = vmatpush.bf16.msra.mxu2 %v6427_v55  ;;  %4201 = vmatpush.bf16.msra.mxu1 %v6175_v15  ;;  %v7136_v55 = vld [vmem:[%s10272_s10 + $0x50c] sm:$0xf]  ;;  %v7167_v15 = vld [vmem:[%s10272_s10 + $0x600] sm:$0xf0] }
 0x1d7   : > { %v2616_v12 = vpop.f32.mrf.mxu2 }
 0x1d8   : > { %v5950_v12 = vld [vmem:[%s10272_s10 + $0xe0] sm:$0xf] }
 0x1d9   : > { %v5951_v24 = vor.u32 %v7006_v13, %v5950_v12  ;;  %v6263_v12 = vor.u32 %v7080_v63, %v6260_v0  ;;  %v6484_v13 = vld [vmem:[%s10272_s10 + $0x524] sm:$0xf0]  ;;  %v6120_v63 = vld [vmem:[%s10272_s10 + $0x24c] sm:$0xf0] }
 0x1da   : > { %4214 = vmatpush.bf16.msra.mxu2 %v6399_v25  ;;  %v6487_v22 = vor.u32 %v7136_v55, %v6484_v13  ;;  %v6008_v25 = vld [vmem:[%s10272_s10 + $0x16c] sm:$0xf0] }
 0x1db   : > { %4188 = vmatpush.bf16.msra.mxu0 %v5951_v24  ;;  %v7017_v24 = vld [vmem:[%s10272_s10 + $0x154] sm:$0xf]  ;;  %v5896_v13 = vld [vmem:[%s10272_s10 + $0x8c] sm:$0xf0] }
 0x1de   : > { %4215 = vmatpush.bf16.msra.mxu2 %v6371_v36 }
 0x1df   : > { %v2316_v17 = vpop.f32.mrf.mxu0  ;;  %4189 = vmatpush.bf16.msra.mxu0 %v5923_v53  ;;  %v7122_v53 = vld [vmem:[%s10272_s10 + $0x49c] sm:$0xf] }
 0x1e0   : > { %v2317_v32 = vadd.f32 %v2316_v17, %v2304_v29  ;;  %v6678_v29 = vld [vmem:[%s10272_s10 + $0x690] sm:$0xf] }
 0x1e2   : > { %v4691_v41 = vmul.f32 %v2317_v32, %v2317_v32  ;;  %4216 = vmatpush.bf16.msra.mxu2 %v6343_v48 }
 0x1e6   : > { %4217 = vmatpush.bf16.msra.mxu2 %v6315_v3  ;;  %v5924_v3 = vld [vmem:[%s10272_s10 + $0xc4] sm:$0xf0] }
 0x1e7   : > { %v2318_v30 = vpop.f32.mrf.mxu0 }
 0x1e8   : > { %v6147_v30 = vor.u32 %v7055_v21, %v6146_v20  ;;  %v6287_v20 = vor.u32 %v7090_v6, %v6286_v5 }
 0x1ea   : > { %4202 = vmatpush.bf16.msra.mxu1 %v6147_v30  ;;  %v7160_v30 = vld [vmem:[%s10272_s10 + $0x5c8] sm:$0xf0]  ;;  %4218 = vmatpush.bf16.msra.mxu2 %v6287_v20 }
 0x1ef   : > { %v2627_v35 = vpop.f32.mrf.mxu0 }
 0x1f0   : > { %v2628_v33 = vadd.f32 %v2627_v35, %v2615_v31  ;;  %v7188_v31 = vld [vmem:[%s10272_s10 + $0x6a8] sm:$0xf0] }
 0x1f1   : > { %v7048_v35 = vld [vmem:[%s10272_s10 + $0x248] sm:$0xf0]  ;;  %v6679_v40 = vor.u32 %v7188_v31, %v6678_v29  ;;  %v6011_v29 = vor.u32 %v7017_v24, %v6008_v25  ;;  %v6459_v31 = vor.u32 %v7129_v26, %v6456_v57  ;;  %v6982_v25 = vld [vmem:[%s10272_s10 + $0x3c] sm:$0xf]  ;;  %v5868_v26 = vld [vmem:[%s10272_s10 + $0x54] sm:$0xf0] }
 0x1f2   : > { %v2631_v37 = vmul.f32 1.442695, %v2628_v33  ;;  %v4689_v38 = vmul.f32 2.0, %v2628_v33  ;;  %v4165_v33 = vsel %vm2264_vm1, %v3937_v27, 0  ;;  %v6566_v27 = vld [vmem:[%s10272_s10 + $0x5b0] sm:$0xf] }
 0x1f3   : > { %v7094_v57 = vld [vmem:[%s10272_s10 + $0x3bc] sm:$0xf] }
 0x1f4   : > { %7207 = vpow2.f32 %v2631_v37  ;;  %v4690_v45 = vadd.f32 1.0, %v4689_v38  ;;  %v5894_v37 = vld [vmem:[%s10272_s10 + $0x70] sm:$0xf]  ;;  %v6992_v38 = vld [vmem:[%s10272_s10 + $0x88] sm:$0xf0] }
 0x1f5   : > { %v5895_v47 = vor.u32 %v6992_v38, %v5894_v37  ;;  %v6428_v37 = vld [vmem:[%s10272_s10 + $0x4b4] sm:$0xf0] }
 0x1f6   : > { %v4692_v61 = vsub.f32 %v4690_v45, %v4691_v41  ;;  %v6090_v45 = vld [vmem:[%s10272_s10 + $0x1f8] sm:$0xf]  ;;  %v6431_v43 = vor.u32 %v7122_v53, %v6428_v37  ;;  %v6288_v53 = vld [vmem:[%s10272_s10 + $0x39c] sm:$0xf0] }
 0x1f7   : > { %v2629_v62 = vpop.f32.mrf.mxu0  ;;  %v6091_v56 = vor.u32 %v7041_v46, %v6090_v45  ;;  %4190 = vmatpush.bf16.msra.mxu0 %v5895_v47  ;;  %v6538_v38 = vld [vmem:[%s10272_s10 + $0x578] sm:$0xf]  ;;  %v7003_v45 = vld [vmem:[%s10272_s10 + $0xe4] sm:$0xf]  ;;  %v5952_v46 = vld [vmem:[%s10272_s10 + $0xfc] sm:$0xf0] }
 0x1f8   : > { %v7034_v62 = vld [vmem:[%s10272_s10 + $0x1d8] sm:$0xf0]  ;;  %v6539_v44 = vor.u32 %v7153_v39, %v6538_v38  ;;  %v7115_v47 = vld [vmem:[%s10272_s10 + $0x464] sm:$0xf]  ;;  %v5955_v58 = vor.u32 %v7003_v45, %v5952_v46  ;;  %v6624_v37 = vld [vmem:[%s10272_s10 + $0x63c] sm:$0xf0] }
 0x1f9   : > { %v6403_v59 = vor.u32 %v7115_v47, %v6400_v49  ;;  %v7150_v46 = vld [vmem:[%s10272_s10 + $0x57c] sm:$0xf]  ;;  %v6540_v47 = vld [vmem:[%s10272_s10 + $0x594] sm:$0xf0]  ;;  %v9222_v49 = vld [vmem:[%s10271_s9] sm:$0xf] }
 0x1fa   : > { %v7208_v9 = vpop.eup %7207 }
 0x1fb   : > { %v2634_v11 = vmul.f32 %v7208_v9, %v2633_v2  ;;  %v4688_v14 = vmul.f32 %v7208_v9, %v7208_v9  ;;  %v5838_v2 = vld [vmem:[%s10272_s10] sm:$0xf]  ;;  %4191 = vmatpush.bf16.msra.mxu0 %v5867_v1  ;;  %v3714_v1 = vunpack.c.h.b16 %v8906_v18 }
 0x1fd   : > { %v2635_v19 = vadd.f32 %v2634_v11, %v2317_v32  ;;  %v4693_v23 = vsub.f32 %v4692_v61, %v4688_v14  ;;  %v6118_v32 = vld [vmem:[%s10272_s10 + $0x230] sm:$0xf]  ;;  %v6062_v61 = vld [vmem:[%s10272_s10 + $0x1c0] sm:$0xf]  ;;  %v6036_v11 = vld [vmem:[%s10272_s10 + $0x1a4] sm:$0xf0]  ;;  %v3938_v5 = vpack.c.b16 %v3714_v1, %v3714_v1 }
 0x1fe   : > { %v6119_v41 = vor.u32 %v7048_v35, %v6118_v32  ;;  %v6063_v9 = vor.u32 %v7034_v62, %v6062_v61  ;;  %v6594_v14 = vld [vmem:[%s10272_s10 + $0x5e8] sm:$0xf]  ;;  %v6039_v21 = vor.u32 %v7024_v10, %v6036_v11  ;;  %v6567_v32 = vor.u32 %v7160_v30, %v6566_v27  ;;  %v7010_v35 = vld [vmem:[%s10272_s10 + $0x11c] sm:$0xf]  ;;  %v7045_v62 = vld [vmem:[%s10272_s10 + $0x234] sm:$0xf] }
 0x1ff   : > { %v8915_v17 = vpack.c.bf16 %v2635_v19, %v2635_v19  ;;  %v8947_v34 = vsel %vm2683_vm3, %v4693_v23, 0.0  ;;  %v5839_v19 = vor.u32 %v6978_v4, %v5838_v2  ;;  %v6595_v23 = vor.u32 %v7167_v15, %v6594_v14  ;;  %v6996_v2 = vld [vmem:[%s10272_s10 + $0xac] sm:$0xf]  ;;  %v7038_v10 = vld [vmem:[%s10272_s10 + $0x1fc] sm:$0xf] }
 0x200   : > { %4203 = vmatpush.bf16.msra.mxu1 %v6119_v41  ;;  %v6176_v41 = vld [vmem:[%s10272_s10 + $0x2bc] sm:$0xf0]  ;;  %v6123_v0 = vor.u32 %v7045_v62, %v6120_v63  ;;  %v7108_v4 = vld [vmem:[%s10272_s10 + $0x42c] sm:$0xf]  ;;  %v5927_v6 = vor.u32 %v6996_v2, %v5924_v3  ;;  %v4168_v18 = vsel %vm2264_vm1, %v3938_v5, 0  ;;  %v2645_v63 = vperm.slane %v9222_v49, 0 }
 0x201   : > { %5832 = vmatmul.msk.bf16.vlgmr.msra.gmra.mxu3 %vm2683_vm3, %v8915_v17  ;;  %5833 = vmatmul.msk.bf16.vlgmr.msrb.gmra.mxu1 %vm2683_vm3, %v8915_v17  ;;  %v6092_v11 = vld [vmem:[%s10272_s10 + $0x214] sm:$0xf0]  ;;  %v7101_v14 = vld [vmem:[%s10272_s10 + $0x3f4] sm:$0xf]  ;;  %v7178_v30 = vld [vmem:[%s10272_s10 + $0x65c] sm:$0xf] }
 0x202   : > { %5834 = vmatmul.msk.bf16.vlgmr.msrb.gmra.mxu2 %vm2683_vm3, %v8915_v17  ;;  %4224 = vmatpush.bf16.msra.mxu3 %v4165_v33  ;;  %v5980_v33 = vld [vmem:[%s10272_s10 + $0x134] sm:$0xf0]  ;;  %v6095_v55 = vor.u32 %v7038_v10, %v6092_v11  ;;  %v6347_v20 = vor.u32 %v7101_v14, %v6344_v16  ;;  %v7070_v16 = vld [vmem:[%s10272_s10 + $0x2f8] sm:$0xf0] }
 0x203   : > { %4192 = vmatpush.bf16.msra.mxu0 %v5839_v19  ;;  %4263 = vmatpush.bf16.msrb.mxu2 %v6487_v22  ;;  %v5983_v42 = vor.u32 %v7010_v35, %v5980_v33  ;;  %v6680_v19 = vld [vmem:[%s10272_s10 + $0x6ac] sm:$0xf0]  ;;  %v7031_v22 = vld [vmem:[%s10272_s10 + $0x1c4] sm:$0xf]  ;;  %v6316_v27 = vld [vmem:[%s10272_s10 + $0x3d4] sm:$0xf0] }
 0x204   : > { %4204 = vmatpush.bf16.msra.mxu1 %v6091_v56  ;;  %v6148_v56 = vld [vmem:[%s10272_s10 + $0x284] sm:$0xf0]  ;;  %v7087_v35 = vld [vmem:[%s10272_s10 + $0x384] sm:$0xf]  ;;  %v6238_v3 = vld [vmem:[%s10272_s10 + $0x318] sm:$0xf] }
 0x205   : > { %v6291_v38 = vor.u32 %v7087_v35, %v6288_v53  ;;  %v9299_v35 = vld [vmem:[%s10272_s10 + $0x6d0] sm:$0x33]  ;;  %v6434_v53 = vld [vmem:[%s10272_s10 + $0x4a0] sm:$0xf] }
 0x206   : > { %4225 = vmatpush.bf16.msra.mxu3 %v6679_v40  ;;  %v7059_v40 = vld [vmem:[%s10272_s10 + $0x2a4] sm:$0xf] }
 0x207   : > { %4237 = vmatpush.bf16.msrb.mxu0 %v6039_v21  ;;  %4264 = vmatpush.bf16.msrb.mxu2 %v6459_v31  ;;  %v6179_v48 = vor.u32 %v7059_v40, %v6176_v41  ;;  %v6683_v21 = vor.u32 %v7185_v7, %v6680_v19  ;;  %v6975_v31 = vld [vmem:[%s10272_s10 + $0x4] sm:$0xf]  ;;  %v7164_v40 = vld [vmem:[%s10272_s10 + $0x5ec] sm:$0xf]  ;;  %v6596_v41 = vld [vmem:[%s10272_s10 + $0x604] sm:$0xf0] }
 0x208   : > { %4205 = vmatpush.bf16.msra.mxu1 %v6063_v9 }
 0x20a   : > { %4226 = vmatpush.bf16.msra.mxu3 %v6651_v54  ;;  %v7052_v54 = vld [vmem:[%s10272_s10 + $0x26c] sm:$0xf] }
 0x20b   : > { %4238 = vmatpush.bf16.msrb.mxu0 %v6011_v29  ;;  %4265 = vmatpush.bf16.msrb.mxu2 %v6431_v43  ;;  %v6151_v61 = vor.u32 %v7052_v54, %v6148_v56  ;;  %v7157_v43 = vld [vmem:[%s10272_s10 + $0x5b4] sm:$0xf]  ;;  %v6515_v54 = vor.u32 %v7143_v50, %v6512_v52  ;;  %v2646_v56 = vperm.slane %v9222_v49, 1 }
 0x20c   : > { %4250 = vmatpush.bf16.msrb.mxu1 %v6263_v12  ;;  %v6989_v12 = vld [vmem:[%s10272_s10 + $0x74] sm:$0xf] }
 0x20d   : > { %v5899_v15 = vor.u32 %v6989_v12, %v5896_v13  ;;  %v6490_v12 = vld [vmem:[%s10272_s10 + $0x510] sm:$0xf]  ;;  %v7140_v13 = vld [vmem:[%s10272_s10 + $0x528] sm:$0xf0] }
 0x20e   : > { %4227 = vmatpush.bf16.msra.mxu3 %v6623_v8  ;;  %v6372_v8 = vld [vmem:[%s10272_s10 + $0x444] sm:$0xf0] }
 0x20f   : > { %4239 = vmatpush.bf16.msrb.mxu0 %v5983_v42  ;;  %4266 = vmatpush.bf16.msrb.mxu2 %v6403_v59  ;;  %v6375_v9 = vor.u32 %v7108_v4, %v6372_v8  ;;  %v6599_v42 = vor.u32 %v7164_v40, %v6596_v41  ;;  %v7077_v4 = vld [vmem:[%s10272_s10 + $0x330] sm:$0xf0]  ;;  %v3715_v40 = vunpack.c.l.b16 %v9299_v35 }
 0x210   : > { %4251 = vmatpush.bf16.msrb.mxu1 %v6235_v51  ;;  %v5871_v51 = vor.u32 %v6982_v25, %v5868_v26  ;;  %v6462_v26 = vld [vmem:[%s10272_s10 + $0x4d8] sm:$0xf] }
 0x211   : > { %5835 = vmatmul.msk.bf16.vlgmr.msrb.gmra.mxu3 %vm2683_vm3, %v8915_v17  ;;  %v6204_v17 = vld [vmem:[%s10272_s10 + $0x2f4] sm:$0xf0] }
 0x212   : > { %4228 = vmatpush.bf16.msra.mxu3 %v6595_v23  ;;  %v6207_v36 = vor.u32 %v7066_v28, %v6204_v17  ;;  %v6064_v23 = vld [vmem:[%s10272_s10 + $0x1dc] sm:$0xf0]  ;;  %v6319_v28 = vor.u32 %v7094_v57, %v6316_v27  ;;  %v6652_v17 = vld [vmem:[%s10272_s10 + $0x674] sm:$0xf0]  ;;  %v6182_v57 = vld [vmem:[%s10272_s10 + $0x2a8] sm:$0xf] }
 0x213   : > { %4240 = vmatpush.bf16.msrb.mxu0 %v5955_v58  ;;  %4267 = vmatpush.bf16.msrb.mxu2 %v6375_v9  ;;  %v6067_v24 = vor.u32 %v7031_v22, %v6064_v23  ;;  %v6655_v29 = vor.u32 %v7178_v30, %v6652_v17  ;;  %v6042_v9 = vld [vmem:[%s10272_s10 + $0x190] sm:$0xf]  ;;  %v6014_v22 = vld [vmem:[%s10272_s10 + $0x158] sm:$0xf]  ;;  %v7021_v23 = vld [vmem:[%s10272_s10 + $0x170] sm:$0xf0] }
 0x214   : > { %4252 = vmatpush.bf16.msrb.mxu1 %v6207_v36  ;;  %v7171_v36 = vld [vmem:[%s10272_s10 + $0x624] sm:$0xf] }
 0x215   : > { %v6627_v39 = vor.u32 %v7171_v36, %v6624_v37  ;;  %v7063_v27 = vld [vmem:[%s10272_s10 + $0x2c0] sm:$0xf0]  ;;  %v7126_v36 = vld [vmem:[%s10272_s10 + $0x4b8] sm:$0xf0]  ;;  %v6154_v37 = vld [vmem:[%s10272_s10 + $0x270] sm:$0xf] }
 0x216   : > { %4229 = vmatpush.bf16.msra.mxu3 %v6567_v32  ;;  %v5840_v32 = vld [vmem:[%s10272_s10 + $0x1c] sm:$0xf0]  ;;  %v6435_v41 = vor.u32 %v7126_v36, %v6434_v53 }
 0x217   : > { %4241 = vmatpush.bf16.msrb.mxu0 %v5927_v6  ;;  %4268 = vmatpush.bf16.msrb.mxu2 %v6347_v20  ;;  %v5843_v33 = vor.u32 %v6975_v31, %v5840_v32  ;;  %v5986_v31 = vld [vmem:[%s10272_s10 + $0x120] sm:$0xf]  ;;  %v7014_v32 = vld [vmem:[%s10272_s10 + $0x138] sm:$0xf0] }
 0x218   : > { %4253 = vmatpush.bf16.msrb.mxu1 %v6179_v48  ;;  %v6543_v48 = vor.u32 %v7150_v46, %v6540_v47  ;;  %v6406_v46 = vld [vmem:[%s10272_s10 + $0x468] sm:$0xf]  ;;  %v7119_v47 = vld [vmem:[%s10272_s10 + $0x480] sm:$0xf0] }
 0x21a   : > { %4230 = vmatpush.bf16.msra.mxu3 %v6539_v44  ;;  %v6568_v44 = vld [vmem:[%s10272_s10 + $0x5cc] sm:$0xf0] }
 0x21b   : > { %4242 = vmatpush.bf16.msrb.mxu0 %v5899_v15  ;;  %4269 = vmatpush.bf16.msrb.mxu2 %v6319_v28  ;;  %v6571_v45 = vor.u32 %v7157_v43, %v6568_v44  ;;  %v6210_v15 = vld [vmem:[%s10272_s10 + $0x2e0] sm:$0xf]  ;;  %v6015_v28 = vor.u32 %v7021_v23, %v6014_v22  ;;  %v5958_v43 = vld [vmem:[%s10272_s10 + $0xe8] sm:$0xf]  ;;  %v7007_v44 = vld [vmem:[%s10272_s10 + $0x100] sm:$0xf0] }
 0x21c   : > { %4254 = vmatpush.bf16.msrb.mxu1 %v6151_v61  ;;  %v7084_v61 = vld [vmem:[%s10272_s10 + $0x368] sm:$0xf0]  ;;  %v6211_v25 = vor.u32 %v7070_v16, %v6210_v15  ;;  %v5959_v52 = vor.u32 %v7007_v44, %v5958_v43  ;;  %v7035_v15 = vld [vmem:[%s10272_s10 + $0x1e0] sm:$0xf0]  ;;  %v6044_v44 = vld [vmem:[%s10272_s10 + $0x1ac] sm:$0xf0] }
 0x21e   : > { %4231 = vmatpush.bf16.msra.mxu3 %v6511_v60  ;;  %v6266_v60 = vld [vmem:[%s10272_s10 + $0x350] sm:$0xf] }
 0x21f   : > { %4243 = vmatpush.bf16.msrb.mxu0 %v5871_v51  ;;  %4270 = vmatpush.bf16.msrb.mxu2 %v6291_v38  ;;  %v6267_v1 = vor.u32 %v7084_v61, %v6266_v60  ;;  %v7133_v51 = vld [vmem:[%s10272_s10 + $0x4f0] sm:$0xf0]  ;;  %v7056_v38 = vld [vmem:[%s10272_s10 + $0x288] sm:$0xf0] }
 0x220   : > { %4255 = vmatpush.bf16.msrb.mxu1 %v6123_v0  ;;  %v2647_v0 = vperm.slane %v9222_v49, 2  ;;  %v7000_v60 = vld [vmem:[%s10272_s10 + $0xc8] sm:$0xf0] }
 0x222   : > { %4276 = vmatpush.bf16.msrb.mxu3 %v4168_v18  ;;  %v7028_v18 = vld [vmem:[%s10272_s10 + $0x1a8] sm:$0xf0] }
 0x223   : > { %4244 = vmatpush.bf16.msrb.mxu0 %v5843_v33  ;;  %v6043_v19 = vor.u32 %v7028_v18, %v6042_v9  ;;  %v6183_v33 = vor.u32 %v7063_v27, %v6182_v57  ;;  %v5902_v9 = vld [vmem:[%s10272_s10 + $0x78] sm:$0xf]  ;;  %v6993_v18 = vld [vmem:[%s10272_s10 + $0x90] sm:$0xf0]  ;;  %v7098_v27 = vld [vmem:[%s10272_s10 + $0x3d8] sm:$0xf0] }
 0x224   : > { %4256 = vmatpush.bf16.msrb.mxu1 %v6095_v55  ;;  %v6239_v55 = vor.u32 %v7077_v4, %v6238_v3  ;;  %v7042_v3 = vld [vmem:[%s10272_s10 + $0x218] sm:$0xf0] }
 0x226   : > { %4277 = vmatpush.bf16.msrb.mxu3 %v6683_v21  ;;  %v6491_v21 = vor.u32 %v7140_v13, %v6490_v12  ;;  %v6686_v12 = vld [vmem:[%s10272_s10 + $0x698] sm:$0xf]  ;;  %v7189_v13 = vld [vmem:[%s10272_s10 + $0x6b0] sm:$0xf0] }
 0x227   : > { %v6687_v23 = vor.u32 %v7189_v13, %v6686_v12  ;;  %v7123_v12 = vld [vmem:[%s10272_s10 + $0x4a4] sm:$0xf]  ;;  %v6436_v13 = vld [vmem:[%s10272_s10 + $0x4bc] sm:$0xf0] }
 0x228   : > { %4257 = vmatpush.bf16.msrb.mxu1 %v6067_v24 }
 0x22a   : > { %4278 = vmatpush.bf16.msrb.mxu3 %v6655_v29  ;;  %v6463_v29 = vor.u32 %v7133_v51, %v6462_v26  ;;  %v6986_v26 = vld [vmem:[%s10272_s10 + $0x58] sm:$0xf0]  ;;  %v6322_v51 = vld [vmem:[%s10272_s10 + $0x3c0] sm:$0xf] }
 0x22b   : > { %v6323_v53 = vor.u32 %v7098_v27, %v6322_v51  ;;  %v5960_v51 = vld [vmem:[%s10272_s10 + $0x104] sm:$0xf0] }
 0x22c   : > { %v6408_v27 = vld [vmem:[%s10272_s10 + $0x484] sm:$0xf0] }
 0x22e   : > { %4279 = vmatpush.bf16.msrb.mxu3 %v6627_v39  ;;  %v5987_v39 = vor.u32 %v7014_v32, %v5986_v31  ;;  %v7074_v31 = vld [vmem:[%s10272_s10 + $0x31c] sm:$0xf]  ;;  %v6240_v32 = vld [vmem:[%s10272_s10 + $0x334] sm:$0xf0] }
 0x22f   : > { %v6243_v43 = vor.u32 %v7074_v31, %v6240_v32  ;;  %v6518_v31 = vld [vmem:[%s10272_s10 + $0x548] sm:$0xf]  ;;  %v7147_v32 = vld [vmem:[%s10272_s10 + $0x560] sm:$0xf0] }
 0x232   : > { %4280 = vmatpush.bf16.msrb.mxu3 %v6599_v42  ;;  %v2648_v42 = vperm.slane %v9222_v49, 3  ;;  %v7049_v49 = vld [vmem:[%s10272_s10 + $0x250] sm:$0xf0] }
 0x236   : > { %4281 = vmatpush.bf16.msrb.mxu3 %v6571_v45  ;;  %v6155_v45 = vor.u32 %v7056_v38, %v6154_v37  ;;  %v6979_v37 = vld [vmem:[%s10272_s10 + $0x20] sm:$0xf0]  ;;  %v6294_v38 = vld [vmem:[%s10272_s10 + $0x388] sm:$0xf] }
 0x23a   : > { %4282 = vmatpush.bf16.msrb.mxu3 %v6543_v48  ;;  %v6126_v48 = vld [vmem:[%s10272_s10 + $0x238] sm:$0xf] }
 0x23b   : > { %v6127_v61 = vor.u32 %v7049_v49, %v6126_v48  ;;  %v7067_v48 = vld [vmem:[%s10272_s10 + $0x2e4] sm:$0xf]  ;;  %v6212_v49 = vld [vmem:[%s10272_s10 + $0x2fc] sm:$0xf0] }
 0x23e   : > { %4283 = vmatpush.bf16.msrb.mxu3 %v6515_v54  ;;  %v3939_v54 = vpack.c.b16 %v3715_v40, %v3715_v40  ;;  %v6630_v40 = vld [vmem:[%s10272_s10 + $0x628] sm:$0xf] }
 0x27e   : > { %v2721_v58 = vpop.f32.mrf.mxu1 }
 0x27f   : > { %v2722_v59 = vadd.f32 %v2721_v58, %v2646_v56  ;;  %v6407_v58 = vor.u32 %v7119_v47, %v6406_v46  ;;  %v6492_v46 = vld [vmem:[%s10272_s10 + $0x52c] sm:$0xf0] }
 0x281   : > { %v2752_v62 = vmax.f32 %v2722_v59, 0.0  ;;  %v5930_v59 = vld [vmem:[%s10272_s10 + $0xb0] sm:$0xf] }
 0x282   : > { %v5931_v4 = vor.u32 %v7000_v60, %v5930_v59  ;;  %v7168_v59 = vld [vmem:[%s10272_s10 + $0x608] sm:$0xf0]  ;;  %v7018_v60 = vld [vmem:[%s10272_s10 + $0x15c] sm:$0xf] }
 0x283   : > { %v9239_v2 = vpack.c.bf16 %v2752_v62, %v2752_v62  ;;  %v6378_v62 = vld [vmem:[%s10272_s10 + $0x430] sm:$0xf] }
 0x284   : > { %v2708_v5 = vpop.f32.mrf.mxu3 }
 0x285   : > { %v2709_v6 = vadd.f32 %v2708_v5, %v2645_v63  ;;  %v2734_v8 = vpop.f32.mrf.mxu2  ;;  %4206 = vmatmul.bf16.vlgmr.msra.gmra.mxu1 %v9239_v2  ;;  %v7112_v63 = vld [vmem:[%s10272_s10 + $0x448] sm:$0xf0]  ;;  %v4171_v5 = vsel %vm2264_vm1, %v3939_v54, 0 }
 0x286   : > { %v2735_v10 = vadd.f32 %v2734_v8, %v2647_v0  ;;  %4302 = vmatpush.bf16.msra.mxu1 %v6267_v1  ;;  %v2723_v11 = vpop.f32.mrf.mxu1  ;;  %v6098_v1 = vld [vmem:[%s10272_s10 + $0x200] sm:$0xf]  ;;  %v6379_v8 = vor.u32 %v7112_v63, %v6378_v62  ;;  %v6016_v62 = vld [vmem:[%s10272_s10 + $0x174] sm:$0xf0]  ;;  %v7130_v63 = vld [vmem:[%s10272_s10 + $0x4dc] sm:$0xf] }
 0x287   : > { %v2751_v14 = vmax.f32 %v2709_v6, 0.0  ;;  %v6099_v11 = vor.u32 %v7042_v3, %v6098_v1  ;;  %v7060_v1 = vld [vmem:[%s10272_s10 + $0x2ac] sm:$0xf]  ;;  %v6184_v3 = vld [vmem:[%s10272_s10 + $0x2c4] sm:$0xf0] }
 0x288   : > { %v2753_v7 = vmax.f32 %v2735_v10, 0.0  ;;  %v6350_v10 = vld [vmem:[%s10272_s10 + $0x3f8] sm:$0xf] }
 0x289   : > { %v9266_v20 = vpack.c.bf16 %v2751_v14, %v2751_v14  ;;  %v6070_v14 = vld [vmem:[%s10272_s10 + $0x1c8] sm:$0xf] }
 0x28a   : > { %v9274_v24 = vpack.c.bf16 %v2753_v7, %v2753_v7  ;;  %4303 = vmatpush.bf16.msra.mxu1 %v6239_v55  ;;  %v7105_v55 = vld [vmem:[%s10272_s10 + $0x410] sm:$0xf0]  ;;  %v5903_v7 = vor.u32 %v6993_v18, %v5902_v9  ;;  %v6071_v57 = vor.u32 %v7035_v15, %v6070_v14  ;;  %v6574_v9 = vld [vmem:[%s10272_s10 + $0x5b8] sm:$0xf]  ;;  %v6156_v15 = vld [vmem:[%s10272_s10 + $0x28c] sm:$0xf0] }
 0x28b   : > { %4193 = vmatmul.bf16.vlgmr.msra.gmra.mxu0 %v9266_v20  ;;  %v6351_v22 = vor.u32 %v7105_v55, %v6350_v10  ;;  %v7161_v18 = vld [vmem:[%s10272_s10 + $0x5d0] sm:$0xf0]  ;;  %v7011_v10 = vld [vmem:[%s10272_s10 + $0x124] sm:$0xf]  ;;  %v5988_v55 = vld [vmem:[%s10272_s10 + $0x13c] sm:$0xf0] }
 0x28c   : > { %4219 = vmatmul.bf16.vlgmr.msra.gmra.mxu2 %v9274_v24  ;;  %4289 = vmatpush.bf16.msra.mxu0 %v6043_v19  ;;  %v2710_v30 = vpop.f32.mrf.mxu3  ;;  %v7081_v19 = vld [vmem:[%s10272_s10 + $0x354] sm:$0xf] }
 0x28d   : > { %4315 = vmatpush.bf16.msra.mxu2 %v6491_v21  ;;  %v2736_v17 = vpop.f32.mrf.mxu2  ;;  %v6268_v21 = vld [vmem:[%s10272_s10 + $0x36c] sm:$0xf0]  ;;  %v6658_v30 = vld [vmem:[%s10272_s10 + $0x660] sm:$0xf]  ;;  %v7053_v14 = vld [vmem:[%s10272_s10 + $0x274] sm:$0xf] }
 0x28e   : > { %4304 = vmatpush.bf16.msra.mxu1 %v6211_v25  ;;  %v5874_v25 = vld [vmem:[%s10272_s10 + $0x40] sm:$0xf]  ;;  %v6271_v17 = vor.u32 %v7081_v19, %v6268_v21  ;;  %v6439_v19 = vor.u32 %v7123_v12, %v6436_v13  ;;  %v6976_v13 = vld [vmem:[%s10272_s10 + $0xc] sm:$0xf] }
 0x28f   : > { %v6546_v21 = vld [vmem:[%s10272_s10 + $0x580] sm:$0xf] }
 0x290   : > { %4290 = vmatpush.bf16.msra.mxu0 %v6015_v28  ;;  %v7182_v28 = vld [vmem:[%s10272_s10 + $0x678] sm:$0xf0] }
 0x291   : > { %4316 = vmatpush.bf16.msra.mxu2 %v6463_v29  ;;  %v5875_v29 = vor.u32 %v6986_v26, %v5874_v25  ;;  %v6659_v36 = vor.u32 %v7182_v28, %v6658_v30  ;;  %v3716_v25 = vunpack.c.h.b16 %v9299_v35  ;;  %v6159_v26 = vor.u32 %v7053_v14, %v6156_v15  ;;  %v7046_v30 = vld [vmem:[%s10272_s10 + $0x23c] sm:$0xf]  ;;  %v6128_v35 = vld [vmem:[%s10272_s10 + $0x254] sm:$0xf0]  ;;  %v5848_v14 = vld [vmem:[%s10272_s10 + $0x24] sm:$0xf0] }
 0x292   : > { %4305 = vmatpush.bf16.msra.mxu1 %v6183_v33  ;;  %v5846_v33 = vld [vmem:[%s10272_s10 + $0x8] sm:$0xf]  ;;  %v7088_v15 = vld [vmem:[%s10272_s10 + $0x38c] sm:$0xf] }
 0x293   : > { %v5847_v47 = vor.u32 %v6979_v37, %v5846_v33  ;;  %v6997_v33 = vld [vmem:[%s10272_s10 + $0xb4] sm:$0xf]  ;;  %v5932_v37 = vld [vmem:[%s10272_s10 + $0xcc] sm:$0xf0] }
 0x294   : > { %4291 = vmatpush.bf16.msra.mxu0 %v5987_v39  ;;  %v2747_v50 = vpop.f32.mrf.mxu3  ;;  %v7091_v39 = vld [vmem:[%s10272_s10 + $0x3a0] sm:$0xf0] }
 0x295   : > { %4317 = vmatpush.bf16.msra.mxu2 %v6435_v41  ;;  %v2748_v56 = vadd.f32 %v2747_v50, %v2648_v42  ;;  %4258 = vmatmul.bf16.vlgmr.msrb.gmra.mxu1 %v9239_v2  ;;  %v7175_v41 = vld [vmem:[%s10272_s10 + $0x640] sm:$0xf0]  ;;  %v7025_v42 = vld [vmem:[%s10272_s10 + $0x194] sm:$0xf]  ;;  %v6295_v50 = vor.u32 %v7091_v39, %v6294_v38  ;;  %v6380_v39 = vld [vmem:[%s10272_s10 + $0x44c] sm:$0xf0] }
 0x296   : > { %4306 = vmatpush.bf16.msra.mxu1 %v6155_v45  ;;  %v7137_v45 = vld [vmem:[%s10272_s10 + $0x514] sm:$0xf]  ;;  %v6047_v54 = vor.u32 %v7025_v42, %v6044_v44  ;;  %v6519_v42 = vor.u32 %v7147_v32, %v6518_v31  ;;  %v6604_v31 = vld [vmem:[%s10272_s10 + $0x60c] sm:$0xf0] }
 0x297   : > { %v2754_v0 = vmax.f32 %v2748_v56, 0.0  ;;  %v6495_v56 = vor.u32 %v7137_v45, %v6492_v46  ;;  %v7109_v38 = vld [vmem:[%s10272_s10 + $0x434] sm:$0xf]  ;;  %v6990_v46 = vld [vmem:[%s10272_s10 + $0x7c] sm:$0xf] }
 0x298   : > { %4292 = vmatpush.bf16.msra.mxu0 %v5959_v52  ;;  %v6631_v52 = vor.u32 %v7175_v41, %v6630_v40  ;;  %v7039_v40 = vld [vmem:[%s10272_s10 + $0x204] sm:$0xf]  ;;  %v6100_v41 = vld [vmem:[%s10272_s10 + $0x21c] sm:$0xf0]  ;;  %v6383_v44 = vor.u32 %v7109_v38, %v6380_v39  ;;  %v7134_v38 = vld [vmem:[%s10272_s10 + $0x4f8] sm:$0xf0] }
 0x299   : > { %v9353_v6 = vpack.c.bf16 %v2754_v0, %v2754_v0  ;;  %4318 = vmatpush.bf16.msra.mxu2 %v6407_v58  ;;  %v6602_v58 = vld [vmem:[%s10272_s10 + $0x5f0] sm:$0xf]  ;;  %v6464_v0 = vld [vmem:[%s10272_s10 + $0x4f4] sm:$0xf0] }
 0x29a   : > { %4307 = vmatpush.bf16.msra.mxu1 %v6127_v61  ;;  %v6215_v61 = vor.u32 %v7067_v48, %v6212_v49  ;;  %v6103_v48 = vor.u32 %v7039_v40, %v6100_v41  ;;  %v7102_v49 = vld [vmem:[%s10272_s10 + $0x3fc] sm:$0xf]  ;;  %v6190_v39 = vld [vmem:[%s10272_s10 + $0x2b0] sm:$0xf]  ;;  %v7064_v40 = vld [vmem:[%s10272_s10 + $0x2c8] sm:$0xf0] }
 0x29b   : > { %6704 = vmatmul.msk.bf16.vlgmr.msra.gmra.mxu3 %vm2260_vm2, %v9353_v6  ;;  %4245 = vmatmul.bf16.vlgmr.msrb.gmra.mxu0 %v9266_v20 }
 0x29c   : > { %4271 = vmatmul.bf16.vlgmr.msrb.gmra.mxu2 %v9274_v24  ;;  %4293 = vmatpush.bf16.msra.mxu0 %v5931_v4  ;;  %v2749_v16 = vpop.f32.mrf.mxu3  ;;  %v6603_v4 = vor.u32 %v7168_v59, %v6602_v58  ;;  %v6072_v58 = vld [vmem:[%s10272_s10 + $0x1e4] sm:$0xf0]  ;;  %v6274_v59 = vld [vmem:[%s10272_s10 + $0x358] sm:$0xf] }
 0x29d   : > { %4319 = vmatpush.bf16.msra.mxu2 %v6379_v8  ;;  %4328 = vmatpush.bf16.msra.mxu3 %v4171_v5  ;;  %v6019_v5 = vor.u32 %v7018_v60, %v6016_v62  ;;  %v6467_v8 = vor.u32 %v7130_v63, %v6464_v0  ;;  %v6575_v16 = vor.u32 %v7161_v18, %v6574_v9  ;;  %v7085_v60 = vld [vmem:[%s10272_s10 + $0x370] sm:$0xf0]  ;;  %v6983_v63 = vld [vmem:[%s10272_s10 + $0x44] sm:$0xf]  ;;  %v6660_v18 = vld [vmem:[%s10272_s10 + $0x67c] sm:$0xf0] }
 0x29e   : > { %4308 = vmatpush.bf16.msra.mxu1 %v6099_v11  ;;  %v6187_v11 = vor.u32 %v7060_v1, %v6184_v3  ;;  %v5876_v3 = vld [vmem:[%s10272_s10 + $0x5c] sm:$0xf0]  ;;  %v7179_v9 = vld [vmem:[%s10272_s10 + $0x664] sm:$0xf] }
 0x2a0   : > { %4294 = vmatpush.bf16.msra.mxu0 %v5903_v7  ;;  %v5991_v7 = vor.u32 %v7011_v10, %v5988_v55  ;;  %v6246_v10 = vld [vmem:[%s10272_s10 + $0x320] sm:$0xf]  ;;  %v5879_v55 = vor.u32 %v6983_v63, %v5876_v3  ;;  %v7008_v3 = vld [vmem:[%s10272_s10 + $0x108] sm:$0xf0] }
 0x2a1   : > { %4320 = vmatpush.bf16.msra.mxu2 %v6351_v22  ;;  %4329 = vmatpush.bf16.msra.mxu3 %v6687_v23  ;;  %v7154_v22 = vld [vmem:[%s10272_s10 + $0x598] sm:$0xf0]  ;;  %v7004_v23 = vld [vmem:[%s10272_s10 + $0xec] sm:$0xf] }
 0x2a2   : > { %4309 = vmatpush.bf16.msra.mxu1 %v6071_v57  ;;  %v7116_v57 = vld [vmem:[%s10272_s10 + $0x46c] sm:$0xf]  ;;  %v6547_v28 = vor.u32 %v7154_v22, %v6546_v21  ;;  %v6632_v21 = vld [vmem:[%s10272_s10 + $0x644] sm:$0xf0] }
 0x2a4   : > { %4295 = vmatpush.bf16.msra.mxu0 %v5875_v29  ;;  %v6411_v29 = vor.u32 %v7116_v57, %v6408_v27  ;;  %v6218_v57 = vld [vmem:[%s10272_s10 + $0x2e8] sm:$0xf]  ;;  %v7071_v27 = vld [vmem:[%s10272_s10 + $0x300] sm:$0xf0] }
 0x2a5   : > { %4321 = vmatpush.bf16.msra.mxu2 %v6323_v53  ;;  %4330 = vmatpush.bf16.msra.mxu3 %v6659_v36  ;;  %v3940_v53 = vpack.c.b16 %v3716_v25, %v3716_v25  ;;  %v6131_v36 = vor.u32 %v7046_v30, %v6128_v35  ;;  %v7029_v25 = vld [vmem:[%s10272_s10 + $0x1b0] sm:$0xf0]  ;;  %v5851_v30 = vor.u32 %v6976_v13, %v5848_v14  ;;  %v6520_v14 = vld [vmem:[%s10272_s10 + $0x564] sm:$0xf0] }
 0x2a6   : > { %4354 = vmatpush.bf16.msrb.mxu1 %v6271_v17  ;;  %v5963_v17 = vor.u32 %v7004_v23, %v5960_v51  ;;  %v6050_v23 = vld [vmem:[%s10272_s10 + $0x198] sm:$0xf]  ;;  %v7141_v51 = vld [vmem:[%s10272_s10 + $0x530] sm:$0xf0] }
 0x2a7   : > { %4310 = vmatmul.bf16.vlgmr.msra.gmra.mxu1 %v9239_v2  ;;  %v4174_v45 = vsel %vm2264_vm1, %v3940_v53, 0  ;;  %v6022_v53 = vld [vmem:[%s10272_s10 + $0x160] sm:$0xf] }
 0x2a8   : > { %4296 = vmatpush.bf16.msra.mxu0 %v5847_v47  ;;  %v5904_v47 = vld [vmem:[%s10272_s10 + $0x94] sm:$0xf0] }
 0x2a9   : > { %4322 = vmatpush.bf16.msra.mxu2 %v6295_v50  ;;  %4331 = vmatpush.bf16.msra.mxu3 %v6631_v52  ;;  %v6352_v50 = vld [vmem:[%s10272_s10 + $0x414] sm:$0xf0]  ;;  %v7186_v52 = vld [vmem:[%s10272_s10 + $0x69c] sm:$0xf] }
 0x2aa   : > { %4355 = vmatpush.bf16.msrb.mxu1 %v6243_v43  ;;  %v5935_v43 = vor.u32 %v6997_v33, %v5932_v37  ;;  %v6355_v62 = vor.u32 %v7102_v49, %v6352_v50  ;;  %v6219_v33 = vor.u32 %v7071_v27, %v6218_v57  ;;  %v6470_v37 = vld [vmem:[%s10272_s10 + $0x4e0] sm:$0xf]  ;;  %v6442_v49 = vld [vmem:[%s10272_s10 + $0x4a8] sm:$0xf]  ;;  %v9687_v50 = vld [vmem:[%s10272_s10 + $0x6d8] sm:$0x33] }
 0x2ab   : > { %6705 = vmatmul.msk.bf16.vlgmr.msrb.gmra.mxu3 %vm2260_vm2, %v9353_v6  ;;  %4297 = vmatmul.bf16.vlgmr.msra.gmra.mxu0 %v9266_v20  ;;  %v5910_v57 = vld [vmem:[%s10272_s10 + $0x80] sm:$0xf]  ;;  %v6994_v27 = vld [vmem:[%s10272_s10 + $0x98] sm:$0xf0] }
 0x2ac   : > { %4341 = vmatpush.bf16.msrb.mxu0 %v6047_v54  ;;  %4323 = vmatmul.bf16.vlgmr.msra.gmra.mxu2 %v9274_v24  ;;  %v6688_v54 = vld [vmem:[%s10272_s10 + $0x6b4] sm:$0xf0] }
 0x2ad   : > { %4367 = vmatpush.bf16.msrb.mxu2 %v6495_v56  ;;  %4332 = vmatpush.bf16.msra.mxu3 %v6603_v4  ;;  %v7032_v56 = vld [vmem:[%s10272_s10 + $0x1cc] sm:$0xf]  ;;  %v6691_v0 = vor.u32 %v7186_v52, %v6688_v54  ;;  %v7095_v4 = vld [vmem:[%s10272_s10 + $0x3c4] sm:$0xf]  ;;  %v6162_v54 = vld [vmem:[%s10272_s10 + $0x278] sm:$0xf] }
 0x2ae   : > { %4356 = vmatpush.bf16.msrb.mxu1 %v6215_v61  ;;  %v5907_v61 = vor.u32 %v6990_v46, %v5904_v47  ;;  %v6075_v1 = vor.u32 %v7032_v56, %v6072_v58  ;;  %v6471_v46 = vor.u32 %v7134_v38, %v6470_v37  ;;  %v6191_v47 = vor.u32 %v7064_v40, %v6190_v39  ;;  %v7127_v52 = vld [vmem:[%s10272_s10 + $0x4c0] sm:$0xf0]  ;;  %v7057_v56 = vld [vmem:[%s10272_s10 + $0x290] sm:$0xf0]  ;;  %v5882_v39 = vld [vmem:[%s10272_s10 + $0x48] sm:$0xf] }
 0x2af   : > { %v6443_v63 = vor.u32 %v7127_v52, %v6442_v49  ;;  %v6987_v40 = vld [vmem:[%s10272_s10 + $0x60] sm:$0xf0]  ;;  %v6248_v49 = vld [vmem:[%s10272_s10 + $0x33c] sm:$0xf0]  ;;  %v5854_v52 = vld [vmem:[%s10272_s10 + $0x10] sm:$0xf] }
 0x2b0   : > { %4342 = vmatpush.bf16.msrb.mxu0 %v6019_v5  ;;  %v6324_v5 = vld [vmem:[%s10272_s10 + $0x3dc] sm:$0xf0] }
 0x2b1   : > { %4368 = vmatpush.bf16.msrb.mxu2 %v6467_v8  ;;  %4333 = vmatpush.bf16.msra.mxu3 %v6575_v16  ;;  %v6275_v8 = vor.u32 %v7085_v60, %v6274_v59  ;;  %v6327_v12 = vor.u32 %v7095_v4, %v6324_v5  ;;  %v6663_v16 = vor.u32 %v7179_v9, %v6660_v18  ;;  %v7151_v60 = vld [vmem:[%s10272_s10 + $0x584] sm:$0xf]  ;;  %v6414_v4 = vld [vmem:[%s10272_s10 + $0x470] sm:$0xf]  ;;  %v7120_v5 = vld [vmem:[%s10272_s10 + $0x488] sm:$0xf0] }
 0x2b2   : > { %4357 = vmatpush.bf16.msrb.mxu1 %v6187_v11  ;;  %v7078_v11 = vld [vmem:[%s10272_s10 + $0x338] sm:$0xf0] }
 0x2b3   : > { %v6247_v22 = vor.u32 %v7078_v11, %v6246_v10  ;;  %v7050_v9 = vld [vmem:[%s10272_s10 + $0x258] sm:$0xf0]  ;;  %v7144_v11 = vld [vmem:[%s10272_s10 + $0x54c] sm:$0xf] }
 0x2b4   : > { %4343 = vmatpush.bf16.msrb.mxu0 %v5991_v7  ;;  %v6296_v7 = vld [vmem:[%s10272_s10 + $0x3a4] sm:$0xf0] }
 0x2b5   : > { %4369 = vmatpush.bf16.msrb.mxu2 %v6439_v19  ;;  %4334 = vmatpush.bf16.msra.mxu3 %v6547_v28  ;;  %v7172_v19 = vld [vmem:[%s10272_s10 + $0x62c] sm:$0xf]  ;;  %v6299_v35 = vor.u32 %v7088_v15, %v6296_v7  ;;  %v5938_v15 = vld [vmem:[%s10272_s10 + $0xb8] sm:$0xf] }
 0x2b6   : > { %4358 = vmatpush.bf16.msrb.mxu1 %v6159_v26  ;;  %v6498_v26 = vld [vmem:[%s10272_s10 + $0x518] sm:$0xf]  ;;  %v6635_v28 = vor.u32 %v7172_v19, %v6632_v21  ;;  %v7113_v19 = vld [vmem:[%s10272_s10 + $0x450] sm:$0xf0]  ;;  %v6106_v21 = vld [vmem:[%s10272_s10 + $0x208] sm:$0xf] }
 0x2b7   : > { %v6499_v32 = vor.u32 %v7141_v51, %v6498_v26  ;;  %v6386_v7 = vld [vmem:[%s10272_s10 + $0x438] sm:$0xf] }
 0x2b8   : > { %4344 = vmatpush.bf16.msrb.mxu0 %v5963_v17  ;;  %v6051_v17 = vor.u32 %v7029_v25, %v6050_v23  ;;  %v6523_v23 = vor.u32 %v7144_v11, %v6520_v14  ;;  %v6387_v51 = vor.u32 %v7113_v19, %v6386_v7  ;;  %v7019_v14 = vld [vmem:[%s10272_s10 + $0x164] sm:$0xf]  ;;  %v6472_v19 = vld [vmem:[%s10272_s10 + $0x4fc] sm:$0xf0] }
 0x2b9   : > { %4370 = vmatpush.bf16.msrb.mxu2 %v6411_v29  ;;  %4335 = vmatpush.bf16.msra.mxu3 %v6519_v42  ;;  %v7165_v29 = vld [vmem:[%s10272_s10 + $0x5f4] sm:$0xf]  ;;  %v7131_v7 = vld [vmem:[%s10272_s10 + $0x4e4] sm:$0xf] }
 0x2ba   : > { %4359 = vmatpush.bf16.msrb.mxu1 %v6131_v36  ;;  %v7022_v36 = vld [vmem:[%s10272_s10 + $0x178] sm:$0xf0]  ;;  %v6607_v41 = vor.u32 %v7165_v29, %v6604_v31  ;;  %v6078_v31 = vld [vmem:[%s10272_s10 + $0x1d0] sm:$0xf] }
 0x2bb   : > { %v6023_v42 = vor.u32 %v7022_v36, %v6022_v53  ;;  %v7190_v29 = vld [vmem:[%s10272_s10 + $0x6b8] sm:$0xf0]  ;;  %v6276_v36 = vld [vmem:[%s10272_s10 + $0x374] sm:$0xf0] }
 0x2bc   : > { %4345 = vmatpush.bf16.msrb.mxu0 %v5935_v43  ;;  %6706 = vmatmul.msk.bf16.vlgmr.msra.gmra.mxu3 %vm2260_vm2, %v9353_v6  ;;  %v7158_v43 = vld [vmem:[%s10272_s10 + $0x5bc] sm:$0xf] }
 0x2bd   : > { %4371 = vmatpush.bf16.msrb.mxu2 %v6383_v44  ;;  %4380 = vmatpush.bf16.msrb.mxu3 %v4174_v45  ;;  %v6576_v44 = vld [vmem:[%s10272_s10 + $0x5d4] sm:$0xf0]  ;;  %v5994_v45 = vld [vmem:[%s10272_s10 + $0x128] sm:$0xf]  ;;  %v7082_v53 = vld [vmem:[%s10272_s10 + $0x35c] sm:$0xf] }
 0x2be   : > { %4360 = vmatpush.bf16.msrb.mxu1 %v6103_v48  ;;  %v7015_v48 = vld [vmem:[%s10272_s10 + $0x140] sm:$0xf0]  ;;  %v6579_v58 = vor.u32 %v7158_v43, %v6576_v44  ;;  %v6666_v44 = vld [vmem:[%s10272_s10 + $0x668] sm:$0xf] }
 0x2bf   : > { %v5995_v59 = vor.u32 %v7015_v48, %v5994_v45  ;;  %v7099_v43 = vld [vmem:[%s10272_s10 + $0x3e0] sm:$0xf0] }
 0x2c0   : > { %4346 = vmatpush.bf16.msrb.mxu0 %v5907_v61  ;;  %v6548_v61 = vld [vmem:[%s10272_s10 + $0x59c] sm:$0xf0]  ;;  %v7183_v45 = vld [vmem:[%s10272_s10 + $0x680] sm:$0xf0] }
 0x2c1   : > { %4372 = vmatpush.bf16.msrb.mxu2 %v6355_v62  ;;  %4381 = vmatpush.bf16.msrb.mxu3 %v6691_v0  ;;  %v3717_v62 = vunpack.c.l.b16 %v9687_v50  ;;  %v6163_v0 = vor.u32 %v7057_v56, %v6162_v54  ;;  %v6551_v18 = vor.u32 %v7151_v60, %v6548_v61  ;;  %v7075_v48 = vld [vmem:[%s10272_s10 + $0x324] sm:$0xf]  ;;  %v6667_v56 = vor.u32 %v7183_v45, %v6666_v44  ;;  %v7092_v60 = vld [vmem:[%s10272_s10 + $0x3a8] sm:$0xf0]  ;;  %v6638_v61 = vld [vmem:[%s10272_s10 + $0x630] sm:$0xf] }
 0x2c2   : > { %4361 = vmatpush.bf16.msrb.mxu1 %v6075_v1  ;;  %v5966_v1 = vld [vmem:[%s10272_s10 + $0xf0] sm:$0xf]  ;;  %v7047_v44 = vld [vmem:[%s10272_s10 + $0x244] sm:$0xf] }
 0x2c3   : > { %v5967_v10 = vor.u32 %v7008_v3, %v5966_v1  ;;  %v6052_v1 = vld [vmem:[%s10272_s10 + $0x1b4] sm:$0xf0]  ;;  %v7138_v3 = vld [vmem:[%s10272_s10 + $0x51c] sm:$0xf] }
 0x2c4   : > { %4347 = vmatpush.bf16.msrb.mxu0 %v5879_v55  ;;  %v3941_v55 = vpack.c.b16 %v3717_v62, %v3717_v62  ;;  %v7176_v62 = vld [vmem:[%s10272_s10 + $0x648] sm:$0xf0] }
 0x2c5   : > { %4373 = vmatpush.bf16.msrb.mxu2 %v6327_v12  ;;  %4382 = vmatpush.bf16.msrb.mxu3 %v6663_v16  ;;  %v6415_v12 = vor.u32 %v7120_v5, %v6414_v4  ;;  %v7001_v16 = vld [vmem:[%s10272_s10 + $0xd0] sm:$0xf0]  ;;  %v6500_v4 = vld [vmem:[%s10272_s10 + $0x534] sm:$0xf0] }
 0x2c6   : > { %4406 = vmatpush.bf16.msra.mxu1 %v6275_v8  ;;  %v6134_v8 = vld [vmem:[%s10272_s10 + $0x240] sm:$0xf]  ;;  %v5939_v25 = vor.u32 %v7001_v16, %v5938_v15  ;;  %v4177_v26 = vsel %vm2264_vm1, %v3941_v55, 0  ;;  %v6503_v55 = vor.u32 %v7138_v3, %v6500_v4  ;;  %v6991_v4 = vld [vmem:[%s10272_s10 + $0x84] sm:$0xf] }
 0x2c7   : > { %4362 = vmatmul.bf16.vlgmr.msrb.gmra.mxu1 %v9239_v2  ;;  %v6135_v13 = vor.u32 %v7050_v9, %v6134_v8  ;;  %v7068_v8 = vld [vmem:[%s10272_s10 + $0x2ec] sm:$0xf]  ;;  %v6220_v9 = vld [vmem:[%s10272_s10 + $0x304] sm:$0xf0]  ;;  %v6024_v16 = vld [vmem:[%s10272_s10 + $0x17c] sm:$0xf0] }
 0x2c8   : > { %4348 = vmatpush.bf16.msrb.mxu0 %v5851_v30  ;;  %v6358_v30 = vld [vmem:[%s10272_s10 + $0x400] sm:$0xf]  ;;  %v6223_v15 = vor.u32 %v7068_v8, %v6220_v9  ;;  %v7103_v9 = vld [vmem:[%s10272_s10 + $0x404] sm:$0xf] }
 0x2c9   : > { %4374 = vmatpush.bf16.msrb.mxu2 %v6299_v35  ;;  %4383 = vmatpush.bf16.msrb.mxu3 %v6635_v28  ;;  %v7106_v28 = vld [vmem:[%s10272_s10 + $0x418] sm:$0xf0] }
 0x2ca   : > { %4407 = vmatpush.bf16.msra.mxu1 %v6247_v22  ;;  %v7043_v22 = vld [vmem:[%s10272_s10 + $0x220] sm:$0xf0]  ;;  %v6359_v37 = vor.u32 %v7106_v28, %v6358_v30  ;;  %v7124_v28 = vld [vmem:[%s10272_s10 + $0x4ac] sm:$0xf] }
 0x2cb   : > { %4349 = vmatmul.bf16.vlgmr.msrb.gmra.mxu0 %v9266_v20  ;;  %v6107_v35 = vor.u32 %v7043_v22, %v6106_v21  ;;  %v7061_v21 = vld [vmem:[%s10272_s10 + $0x2b4] sm:$0xf]  ;;  %v6192_v22 = vld [vmem:[%s10272_s10 + $0x2cc] sm:$0xf0] }
 0x2cc   : > { %4393 = vmatpush.bf16.msra.mxu0 %v6051_v17  ;;  %4375 = vmatmul.bf16.vlgmr.msrb.gmra.mxu2 %v9274_v24  ;;  %v6694_v17 = vld [vmem:[%s10272_s10 + $0x6a0] sm:$0xf]  ;;  %v6195_v30 = vor.u32 %v7061_v21, %v6192_v22  ;;  %v5884_v22 = vld [vmem:[%s10272_s10 + $0x64] sm:$0xf0] }
 0x2cd   : > { %4419 = vmatpush.bf16.msra.mxu2 %v6499_v32  ;;  %4384 = vmatpush.bf16.msrb.mxu3 %v6607_v41  ;;  %v7036_v32 = vld [vmem:[%s10272_s10 + $0x1e8] sm:$0xf0]  ;;  %v6695_v38 = vor.u32 %v7190_v29, %v6694_v17  ;;  %v6330_v41 = vld [vmem:[%s10272_s10 + $0x3c8] sm:$0xf]  ;;  %v7054_v29 = vld [vmem:[%s10272_s10 + $0x27c] sm:$0xf] }
 0x2ce   : > { %4408 = vmatpush.bf16.msra.mxu1 %v6219_v33  ;;  %v5911_v33 = vor.u32 %v6994_v27, %v5910_v57  ;;  %v6331_v54 = vor.u32 %v7099_v43, %v6330_v41  ;;  %v7162_v57 = vld [vmem:[%s10272_s10 + $0x5d8] sm:$0xf0]  ;;  %v7012_v27 = vld [vmem:[%s10272_s10 + $0x12c] sm:$0xf]  ;;  %v6444_v17 = vld [vmem:[%s10272_s10 + $0x4c4] sm:$0xf0] }
 0x2cf   : > { %v5968_v41 = vld [vmem:[%s10272_s10 + $0x10c] sm:$0xf0] }
 0x2d0   : > { %4394 = vmatpush.bf16.msra.mxu0 %v6023_v42  ;;  %v6079_v42 = vor.u32 %v7036_v32, %v6078_v31  ;;  %v6164_v31 = vld [vmem:[%s10272_s10 + $0x294] sm:$0xf0]  ;;  %v6416_v43 = vld [vmem:[%s10272_s10 + $0x48c] sm:$0xf0] }
 0x2d1   : > { %4420 = vmatpush.bf16.msra.mxu2 %v6471_v46  ;;  %4385 = vmatpush.bf16.msrb.mxu3 %v6579_v58  ;;  %v6279_v46 = vor.u32 %v7082_v53, %v6276_v36  ;;  %v6980_v58 = vld [vmem:[%s10272_s10 + $0x28] sm:$0xf0]  ;;  %v6447_v53 = vor.u32 %v7124_v28, %v6444_v17  ;;  %v6554_v36 = vld [vmem:[%s10272_s10 + $0x588] sm:$0xf]  ;;  %v6977_v17 = vld [vmem:[%s10272_s10 + $0x14] sm:$0xf] }
 0x2d2   : > { %4409 = vmatpush.bf16.msra.mxu1 %v6191_v47  ;;  %v5883_v47 = vor.u32 %v6987_v40, %v5882_v39  ;;  %v5855_v5 = vor.u32 %v6980_v58, %v5854_v52  ;;  %v3718_v39 = vunpack.c.h.b16 %v9687_v50  ;;  %v6167_v40 = vor.u32 %v7054_v29, %v6164_v31  ;;  %v6136_v50 = vld [vmem:[%s10272_s10 + $0x25c] sm:$0xf0]  ;;  %v6998_v52 = vld [vmem:[%s10272_s10 + $0xbc] sm:$0xf]  ;;  %v5940_v58 = vld [vmem:[%s10272_s10 + $0xd4] sm:$0xf0] }
 0x2d3   : > { %v5856_v29 = vld [vmem:[%s10272_s10 + $0x2c] sm:$0xf0]  ;;  %v7089_v31 = vld [vmem:[%s10272_s10 + $0x394] sm:$0xf] }
 0x2d4   : > { %4395 = vmatpush.bf16.msra.mxu0 %v5995_v59  ;;  %v6302_v59 = vld [vmem:[%s10272_s10 + $0x390] sm:$0xf] }
 0x2d5   : > { %4421 = vmatpush.bf16.msra.mxu2 %v6443_v63  ;;  %4386 = vmatpush.bf16.msrb.mxu3 %v6551_v18  ;;  %v7026_v63 = vld [vmem:[%s10272_s10 + $0x19c] sm:$0xf]  ;;  %v6303_v18 = vor.u32 %v7092_v60, %v6302_v59  ;;  %v6388_v60 = vld [vmem:[%s10272_s10 + $0x454] sm:$0xf0] }
 0x2d6   : > { %4410 = vmatpush.bf16.msra.mxu1 %v6163_v0  ;;  %v6251_v0 = vor.u32 %v7075_v48, %v6248_v49  ;;  %v6055_v11 = vor.u32 %v7026_v63, %v6052_v1  ;;  %v6526_v48 = vld [vmem:[%s10272_s10 + $0x550] sm:$0xf]  ;;  %v7148_v49 = vld [vmem:[%s10272_s10 + $0x568] sm:$0xf0]  ;;  %v7110_v59 = vld [vmem:[%s10272_s10 + $0x43c] sm:$0xf] }
 0x2d7   : > { %v6527_v63 = vor.u32 %v7148_v49, %v6526_v48  ;;  %v6391_v1 = vor.u32 %v7110_v59, %v6388_v60  ;;  %v6612_v48 = vld [vmem:[%s10272_s10 + $0x614] sm:$0xf0]  ;;  %v7135_v59 = vld [vmem:[%s10272_s10 + $0x500] sm:$0xf0] }
 0x2d8   : > { %4396 = vmatpush.bf16.msra.mxu0 %v5967_v10  ;;  %v6639_v10 = vor.u32 %v7176_v62, %v6638_v61  ;;  %v7040_v61 = vld [vmem:[%s10272_s10 + $0x20c] sm:$0xf]  ;;  %v6108_v62 = vld [vmem:[%s10272_s10 + $0x224] sm:$0xf0]  ;;  %v6198_v60 = vld [vmem:[%s10272_s10 + $0x2b8] sm:$0xf] }
 0x2d9   : > { %4422 = vmatpush.bf16.msra.mxu2 %v6415_v12  ;;  %4387 = vmatpush.bf16.msrb.mxu3 %v6523_v23  ;;  %v6610_v12 = vld [vmem:[%s10272_s10 + $0x5f8] sm:$0xf]  ;;  %v6111_v8 = vor.u32 %v7040_v61, %v6108_v62  ;;  %v7065_v61 = vld [vmem:[%s10272_s10 + $0x2d0] sm:$0xf0]  ;;  %v7159_v62 = vld [vmem:[%s10272_s10 + $0x5c4] sm:$0xf] }
 0x2da   : > { %4411 = vmatpush.bf16.msra.mxu1 %v6135_v13  ;;  %v7169_v13 = vld [vmem:[%s10272_s10 + $0x610] sm:$0xf0] }
 0x2db   : > { %v6611_v23 = vor.u32 %v7169_v13, %v6610_v12  ;;  %v6080_v12 = vld [vmem:[%s10272_s10 + $0x1ec] sm:$0xf0]  ;;  %v6282_v13 = vld [vmem:[%s10272_s10 + $0x360] sm:$0xf] }
 0x2dc   : > { %4397 = vmatpush.bf16.msra.mxu0 %v5939_v25  ;;  %6707 = vmatmul.msk.bf16.vlgmr.msrb.gmra.mxu3 %vm2260_vm2, %v9353_v6  ;;  %v6027_v25 = vor.u32 %v7019_v14, %v6024_v16  ;;  %v7086_v14 = vld [vmem:[%s10272_s10 + $0x378] sm:$0xf0] }
 0x2dd   : > { %4423 = vmatpush.bf16.msra.mxu2 %v6387_v51  ;;  %4432 = vmatpush.bf16.msra.mxu3 %v4177_v26  ;;  %v6475_v26 = vor.u32 %v7131_v7, %v6472_v19  ;;  %v6582_v51 = vld [vmem:[%s10272_s10 + $0x5c0] sm:$0xf]  ;;  %v6984_v7 = vld [vmem:[%s10272_s10 + $0x4c] sm:$0xf] }
 0x2de   : > { %4412 = vmatpush.bf16.msra.mxu1 %v6107_v35  ;;  %v5996_v35 = vld [vmem:[%s10272_s10 + $0x144] sm:$0xf0]  ;;  %v6583_v32 = vor.u32 %v7162_v57, %v6582_v51  ;;  %v7180_v51 = vld [vmem:[%s10272_s10 + $0x66c] sm:$0xf] }
 0x2df   : > { %v6668_v57 = vld [vmem:[%s10272_s10 + $0x684] sm:$0xf0] }
 0x2e0   : > { %4398 = vmatpush.bf16.msra.mxu0 %v5911_v33  ;;  %v5999_v33 = vor.u32 %v7012_v27, %v5996_v35  ;;  %v6254_v27 = vld [vmem:[%s10272_s10 + $0x328] sm:$0xf]  ;;  %v5887_v35 = vor.u32 %v6984_v7, %v5884_v22  ;;  %v7152_v7 = vld [vmem:[%s10272_s10 + $0x58c] sm:$0xf] }
 0x2e1   : > { %4424 = vmatpush.bf16.msra.mxu2 %v6359_v37  ;;  %4433 = vmatpush.bf16.msra.mxu3 %v6695_v38  ;;  %v7155_v37 = vld [vmem:[%s10272_s10 + $0x5a0] sm:$0xf0]  ;;  %v7005_v38 = vld [vmem:[%s10272_s10 + $0xf4] sm:$0xf] }
 0x2e2   : > { %4413 = vmatpush.bf16.msra.mxu1 %v6079_v42  ;;  %v7117_v42 = vld [vmem:[%s10272_s10 + $0x474] sm:$0xf]  ;;  %v6555_v45 = vor.u32 %v7155_v37, %v6554_v36  ;;  %v6640_v36 = vld [vmem:[%s10272_s10 + $0x64c] sm:$0xf0] }
 0x2e4   : > { %4399 = vmatpush.bf16.msra.mxu0 %v5883_v47  ;;  %v6419_v47 = vor.u32 %v7117_v42, %v6416_v43  ;;  %v6226_v42 = vld [vmem:[%s10272_s10 + $0x2f0] sm:$0xf]  ;;  %v7072_v43 = vld [vmem:[%s10272_s10 + $0x308] sm:$0xf0] }
 0x2e5   : > { %4425 = vmatpush.bf16.msra.mxu2 %v6331_v54  ;;  %4434 = vmatpush.bf16.msra.mxu3 %v6667_v56  ;;  %v3942_v54 = vpack.c.b16 %v3718_v39, %v3718_v39  ;;  %v6139_v56 = vor.u32 %v7047_v44, %v6136_v50  ;;  %v7030_v39 = vld [vmem:[%s10272_s10 + $0x1b8] sm:$0xf0]  ;;  %v5859_v44 = vor.u32 %v6977_v17, %v5856_v29 }
 0x2e6   : > { %4458 = vmatpush.bf16.msrb.mxu1 %v6279_v46  ;;  %v5971_v46 = vor.u32 %v7005_v38, %v5968_v41  ;;  %v6058_v38 = vld [vmem:[%s10272_s10 + $0x1a0] sm:$0xf]  ;;  %v7142_v41 = vld [vmem:[%s10272_s10 + $0x538] sm:$0xf0] }
 0x2e7   : > { %4414 = vmatmul.bf16.vlgmr.msra.gmra.mxu1 %v9239_v2  ;;  %v4180_v3 = vsel %vm2264_vm1, %v3942_v54, 0  ;;  %v6030_v54 = vld [vmem:[%s10272_s10 + $0x168] sm:$0xf] }
 0x2e8   : > { %4400 = vmatpush.bf16.msra.mxu0 %v5855_v5  ;;  %v5912_v5 = vld [vmem:[%s10272_s10 + $0x9c] sm:$0xf0] }
 0x2e9   : > { %4426 = vmatpush.bf16.msra.mxu2 %v6303_v18  ;;  %4435 = vmatpush.bf16.msra.mxu3 %v6639_v10  ;;  %v6360_v18 = vld [vmem:[%s10272_s10 + $0x41c] sm:$0xf0]  ;;  %v7187_v10 = vld [vmem:[%s10272_s10 + $0x6a4] sm:$0xf] }
 0x2ea   : > { %4459 = vmatpush.bf16.msrb.mxu1 %v6251_v0  ;;  %v5943_v0 = vor.u32 %v6998_v52, %v5940_v58  ;;  %v6363_v16 = vor.u32 %v7103_v9, %v6360_v18  ;;  %v6227_v52 = vor.u32 %v7072_v43, %v6226_v42  ;;  %v6478_v58 = vld [vmem:[%s10272_s10 + $0x4e8] sm:$0xf]  ;;  %v6199_v9 = vor.u32 %v7065_v61, %v6198_v60  ;;  %v7016_v18 = vld [vmem:[%s10272_s10 + $0x148] sm:$0xf0]  ;;  %v7114_v42 = vld [vmem:[%s10272_s10 + $0x458] sm:$0xf0] }
 0x2eb   : > { %4401 = vmatmul.bf16.vlgmr.msra.gmra.mxu0 %v9266_v20  ;;  %v6114_v43 = vld [vmem:[%s10272_s10 + $0x210] sm:$0xf]  ;;  %v7107_v60 = vld [vmem:[%s10272_s10 + $0x420] sm:$0xf0]  ;;  %v6702_v61 = vld [vmem:[%s10272_s10 + $0x6a8] sm:$0xf] }
 0x2ec   : > { %4445 = vmatpush.bf16.msrb.mxu0 %v6055_v11  ;;  %4427 = vmatmul.bf16.vlgmr.msra.gmra.mxu2 %v9274_v24  ;;  %v6696_v11 = vld [vmem:[%s10272_s10 + $0x6bc] sm:$0xf0] }
 0x2ed   : > { %4471 = vmatpush.bf16.msrb.mxu2 %v6503_v55  ;;  %4436 = vmatpush.bf16.msra.mxu3 %v6611_v23  ;;  %v7033_v55 = vld [vmem:[%s10272_s10 + $0x1d4] sm:$0xf]  ;;  %v6699_v19 = vor.u32 %v7187_v10, %v6696_v11  ;;  %v7096_v23 = vld [vmem:[%s10272_s10 + $0x3cc] sm:$0xf]  ;;  %v6450_v10 = vld [vmem:[%s10272_s10 + $0x4b0] sm:$0xf] }
 0x2ee   : > { %4460 = vmatpush.bf16.msrb.mxu1 %v6223_v15  ;;  %v5915_v15 = vor.u32 %v6991_v4, %v5912_v5  ;;  %v6083_v21 = vor.u32 %v7033_v55, %v6080_v12  ;;  %v6002_v4 = vld [vmem:[%s10272_s10 + $0x130] sm:$0xf]  ;;  %v10072_v5 = vld [vmem:[%s10273_s11] sm:$0x7f]  ;;  %v7128_v55 = vld [vmem:[%s10272_s10 + $0x4c8] sm:$0xf0] }
 0x2ef   : > { %v3010_v11 = vld [vmem:[%s10272_s10 + $0x6e0] sm:$0x3]  ;;  %v6451_v22 = vor.u32 %v7128_v55, %v6450_v10  ;;  %v6338_v10 = vld [vmem:[%s10272_s10 + $0x3d0] sm:$0xf]  ;;  %v7100_v55 = vld [vmem:[%s10272_s10 + $0x3e8] sm:$0xf0] }
 0x2f0   : > { %4446 = vmatpush.bf16.msrb.mxu0 %v6027_v25  ;;  %v6332_v25 = vld [vmem:[%s10272_s10 + $0x3e4] sm:$0xf0]  ;;  %v6170_v12 = vld [vmem:[%s10272_s10 + $0x280] sm:$0xf] }
 0x2f1   : > { %4472 = vmatpush.bf16.msrb.mxu2 %v6475_v26  ;;  %4437 = vmatpush.bf16.msra.mxu3 %v6583_v32  ;;  %v6283_v26 = vor.u32 %v7086_v14, %v6282_v13  ;;  %v6335_v28 = vor.u32 %v7096_v23, %v6332_v25  ;;  %v6671_v32 = vor.u32 %v7180_v51, %v6668_v57  ;;  %v7058_v13 = vld [vmem:[%s10272_s10 + $0x298] sm:$0xf0]  ;;  %v3013_v14 = vperm.slane %v10072_v5, 0  ;;  %v5974_v25 = vld [vmem:[%s10272_s10 + $0xf8] sm:$0xf] }
 0x2f2   : > { %4461 = vmatpush.bf16.msrb.mxu1 %v6195_v30  ;;  %v7079_v30 = vld [vmem:[%s10272_s10 + $0x340] sm:$0xf0]  ;;  %v6171_v23 = vor.u32 %v7058_v13, %v6170_v12  ;;  %v6422_v51 = vld [vmem:[%s10272_s10 + $0x478] sm:$0xf]  ;;  %v6674_v12 = vld [vmem:[%s10272_s10 + $0x670] sm:$0xf] }
 0x2f3   : > { %v6255_v37 = vor.u32 %v7079_v30, %v6254_v27  ;;  %v7121_v27 = vld [vmem:[%s10272_s10 + $0x490] sm:$0xf0]  ;;  %v6142_v30 = vld [vmem:[%s10272_s10 + $0x248] sm:$0xf]  ;;  %v7184_v13 = vld [vmem:[%s10272_s10 + $0x688] sm:$0xf0] }
 0x2f4   : > { %4447 = vmatpush.bf16.msrb.mxu0 %v5999_v33  ;;  %v6304_v33 = vld [vmem:[%s10272_s10 + $0x3ac] sm:$0xf0] }
 0x2f5   : > { %4473 = vmatpush.bf16.msrb.mxu2 %v6447_v53  ;;  %4438 = vmatpush.bf16.msra.mxu3 %v6555_v45  ;;  %v7173_v53 = vld [vmem:[%s10272_s10 + $0x634] sm:$0xf]  ;;  %v6307_v50 = vor.u32 %v7089_v31, %v6304_v33 }
 0x2f6   : > { %4462 = vmatpush.bf16.msrb.mxu1 %v6167_v40  ;;  %v6506_v40 = vld [vmem:[%s10272_s10 + $0x520] sm:$0xf]  ;;  %v6643_v45 = vor.u32 %v7173_v53, %v6640_v36  ;;  %v6423_v53 = vor.u32 %v7121_v27, %v6422_v51  ;;  %v6646_v51 = vld [vmem:[%s10272_s10 + $0x638] sm:$0xf] }
 0x2f7   : > { %v6507_v49 = vor.u32 %v7142_v41, %v6506_v40  ;;  %v7002_v40 = vld [vmem:[%s10272_s10 + $0xd8] sm:$0xf0]  ;;  %v6394_v41 = vld [vmem:[%s10272_s10 + $0x440] sm:$0xf] }
 0x2f8   : > { %4448 = vmatpush.bf16.msrb.mxu0 %v5971_v46  ;;  %v6059_v46 = vor.u32 %v7030_v39, %v6058_v38  ;;  %v6528_v38 = vld [vmem:[%s10272_s10 + $0x56c] sm:$0xf0]  ;;  %v5946_v39 = vld [vmem:[%s10272_s10 + $0xc0] sm:$0xf] }
 0x2f9   : > { %4474 = vmatpush.bf16.msrb.mxu2 %v6419_v47  ;;  %4439 = vmatpush.bf16.msra.mxu3 %v6527_v63  ;;  %v7166_v47 = vld [vmem:[%s10272_s10 + $0x5fc] sm:$0xf] }
 0x2fa   : > { %4463 = vmatpush.bf16.msrb.mxu1 %v6139_v56  ;;  %v7023_v56 = vld [vmem:[%s10272_s10 + $0x180] sm:$0xf0] }
 0x2fc   : > { %4449 = vmatpush.bf16.msrb.mxu0 %v5943_v0  ;;  %6708 = vmatmul.msk.bf16.vlgmr.msra.gmra.mxu3 %vm2260_vm2, %v9353_v6  ;;  %v6615_v0 = vor.u32 %v7166_v47, %v6612_v48  ;;  %v6395_v48 = vor.u32 %v7114_v42, %v6394_v41 }
 0x2fd   : > { %4475 = vmatpush.bf16.msrb.mxu2 %v6391_v1  ;;  %4484 = vmatpush.bf16.msrb.mxu3 %v4180_v3  ;;  %v6031_v1 = vor.u32 %v7023_v56, %v6030_v54  ;;  %v6584_v3 = vld [vmem:[%s10272_s10 + $0x5dc] sm:$0xf0]  ;;  %v6366_v54 = vld [vmem:[%s10272_s10 + $0x408] sm:$0xf] }
 0x2fe   : > { %4464 = vmatpush.bf16.msrb.mxu1 %v6111_v8  ;;  %v6479_v8 = vor.u32 %v7135_v59, %v6478_v58 }
 0x300   : > { %4450 = vmatpush.bf16.msrb.mxu0 %v5915_v15  ;;  %v6587_v15 = vor.u32 %v7159_v62, %v6584_v3  ;;  %v7191_v62 = vld [vmem:[%s10272_s10 + $0x6c0] sm:$0xf0] }
 0x301   : > { %4476 = vmatpush.bf16.msrb.mxu2 %v6363_v16  ;;  %4485 = vmatpush.bf16.msrb.mxu3 %v6699_v19  ;;  %v6003_v16 = vor.u32 %v7016_v18, %v6002_v4  ;;  %v6556_v19 = vld [vmem:[%s10272_s10 + $0x5a4] sm:$0xf0]  ;;  %v6367_v4 = vor.u32 %v7107_v60, %v6366_v54  ;;  %v6988_v18 = vld [vmem:[%s10272_s10 + $0x68] sm:$0xf0] }
 0x302   : > { %4465 = vmatpush.bf16.msrb.mxu1 %v6083_v21  ;;  %v4207_v63 = vpop.f32.mrf.mxu1  ;;  %v3719_v21 = vunpack.c.l.b16 %v3010_v11  ;;  %v6559_v29 = vor.u32 %v7152_v7, %v6556_v19  ;;  %v6339_v7 = vor.u32 %v7100_v55, %v6338_v10  ;;  %v6675_v19 = vor.u32 %v7184_v13, %v6674_v12 }
 0x304   : > { %4451 = vmatpush.bf16.msrb.mxu0 %v5887_v35  ;;  %v7051_v35 = vld [vmem:[%s10272_s10 + $0x260] sm:$0xf0]  ;;  %v3943_v33 = vpack.c.b16 %v3719_v21, %v3719_v21  ;;  %v5862_v21 = vld [vmem:[%s10272_s10 + $0x18] sm:$0xf] }
 0x305   : > { %4477 = vmatpush.bf16.msrb.mxu2 %v6335_v28  ;;  %4486 = vmatpush.bf16.msrb.mxu3 %v6671_v32  ;;  %v7145_v32 = vld [vmem:[%s10272_s10 + $0x554] sm:$0xf]  ;;  %v6143_v36 = vor.u32 %v7051_v35, %v6142_v30 }
 0x306   : > { %4510 = vmatpush.bf16.msra.mxu1 %v6283_v26  ;;  %v7009_v26 = vld [vmem:[%s10272_s10 + $0x110] sm:$0xf0] }
 0x307   : > { %4466 = vmatmul.bf16.vlgmr.msrb.gmra.mxu1 %v9239_v2  ;;  %v5975_v31 = vor.u32 %v7009_v26, %v5974_v25  ;;  %v7093_v26 = vld [vmem:[%s10272_s10 + $0x3b0] sm:$0xf0] }
 0x308   : > { %4452 = vmatpush.bf16.msrb.mxu0 %v5859_v44  ;;  %v4194_v57 = vpop.f32.mrf.mxu0  ;;  %v7044_v44 = vld [vmem:[%s10272_s10 + $0x228] sm:$0xf0] }
 0x309   : > { %4478 = vmatpush.bf16.msrb.mxu2 %v6307_v50  ;;  %4487 = vmatpush.bf16.msrb.mxu3 %v6643_v45  ;;  %v4195_v28 = vadd.f32 %v4194_v57, %v3013_v14  ;;  %v6531_v50 = vor.u32 %v7145_v32, %v6528_v38  ;;  %v5947_v45 = vor.u32 %v7002_v40, %v5946_v39  ;;  %v3014_v14 = vperm.slane %v10072_v5, 1  ;;  %v7177_v57 = vld [vmem:[%s10272_s10 + $0x650] sm:$0xf0]  ;;  %v7170_v32 = vld [vmem:[%s10272_s10 + $0x618] sm:$0xf0] }
 0x30a   : > { %4511 = vmatpush.bf16.msra.mxu1 %v6255_v37  ;;  %v4209_v17 = vpop.f32.mrf.mxu1  ;;  %v6115_v59 = vor.u32 %v7044_v44, %v6114_v43  ;;  %v7163_v40 = vld [vmem:[%s10272_s10 + $0x5e0] sm:$0xf0] }
 0x30b   : > { %4453 = vmatmul.bf16.vlgmr.msrb.gmra.mxu0 %v9266_v20  ;;  %v4208_v37 = vadd.f32 %v4207_v63, %v4195_v28  ;;  %v6086_v63 = vld [vmem:[%s10272_s10 + $0x1d8] sm:$0xf]  ;;  %v6647_v17 = vor.u32 %v7177_v57, %v6646_v51  ;;  %v3016_v51 = vperm.slane %v10072_v5, 3 }
 0x30c   : > { %4497 = vmatpush.bf16.msra.mxu0 %v6059_v46  ;;  %4479 = vmatmul.bf16.vlgmr.msrb.gmra.mxu2 %v9274_v24  ;;  %v4183_v46 = vsel %vm2264_vm1, %v3943_v33, 0 }
 0x30d   : > { %4523 = vmatpush.bf16.msra.mxu2 %v6507_v49  ;;  %4488 = vmatpush.bf16.msrb.mxu3 %v6615_v0  ;;  %v5918_v49 = vld [vmem:[%s10272_s10 + $0x88] sm:$0xf]  ;;  %v7037_v0 = vld [vmem:[%s10272_s10 + $0x1f0] sm:$0xf0] }
 0x30e   : > { %4512 = vmatpush.bf16.msra.mxu1 %v6227_v52  ;;  %v6995_v52 = vld [vmem:[%s10272_s10 + $0xa0] sm:$0xf0]  ;;  %v6087_v11 = vor.u32 %v7037_v0, %v6086_v63 }
 0x30f   : > { %v4220_v47 = vpop.f32.mrf.mxu2  ;;  %v5919_v3 = vor.u32 %v6995_v52, %v5918_v49  ;;  %v7149_v52 = vld [vmem:[%s10272_s10 + $0x570] sm:$0xf0] }
 0x310   : > { %4498 = vmatpush.bf16.msra.mxu0 %v6031_v1  ;;  %v4221_v56 = vadd.f32 %v4220_v47, %v4208_v37  ;;  %v4196_v58 = vpop.f32.mrf.mxu0  ;;  %v3015_v47 = vperm.slane %v10072_v5, 2 }
 0x311   : > { %4524 = vmatpush.bf16.msra.mxu2 %v6479_v8  ;;  %4489 = vmatpush.bf16.msrb.mxu3 %v6587_v15  ;;  %v6703_v8 = vor.u32 %v7191_v62, %v6702_v61 }
 0x312   : > { %4513 = vmatpush.bf16.msra.mxu1 %v6199_v9  ;;  %v4259_v1 = vpop.f32.mrf.mxu1  ;;  %v5890_v9 = vld [vmem:[%s10272_s10 + $0x50] sm:$0xf] }
 0x313   : > { %v5891_v15 = vor.u32 %v6988_v18, %v5890_v9 }
 0x314   : > { %4499 = vmatpush.bf16.msra.mxu0 %v6003_v16 }
 0x315   : > { %4525 = vmatpush.bf16.msra.mxu2 %v6451_v22  ;;  %4490 = vmatpush.bf16.msrb.mxu3 %v6559_v29  ;;  %v6981_v22 = vld [vmem:[%s10272_s10 + $0x30] sm:$0xf0] }
 0x316   : > { %4514 = vmatpush.bf16.msra.mxu1 %v6171_v23  ;;  %v6310_v23 = vld [vmem:[%s10272_s10 + $0x398] sm:$0xf]  ;;  %v5863_v35 = vor.u32 %v6981_v22, %v5862_v21 }
 0x317   : > { %v4222_v16 = vpop.f32.mrf.mxu2  ;;  %v6311_v28 = vor.u32 %v7093_v26, %v6310_v23 }
 0x318   : > { %4500 = vmatpush.bf16.msra.mxu0 %v5975_v31  ;;  %v4246_v25 = vpop.f32.mrf.mxu0  ;;  %v6618_v31 = vld [vmem:[%s10272_s10 + $0x600] sm:$0xf] }
 0x319   : > { %4526 = vmatpush.bf16.msra.mxu2 %v6423_v53  ;;  %4491 = vmatpush.bf16.msrb.mxu3 %v6531_v50  ;;  %v4247_v27 = vadd.f32 %v4246_v25, %v3014_v14  ;;  %v6619_v37 = vor.u32 %v7170_v32, %v6618_v31  ;;  %v6562_v50 = vld [vmem:[%s10272_s10 + $0x590] sm:$0xf] }
 0x31a   : > { %4515 = vmatpush.bf16.msra.mxu1 %v6143_v36  ;;  %v4261_v30 = vpop.f32.mrf.mxu1 }
 0x31b   : > { %v4260_v29 = vadd.f32 %v4259_v1, %v4247_v27 }
 0x31c   : > { %4501 = vmatpush.bf16.msra.mxu0 %v5947_v45  ;;  %6709 = vmatmul.msk.bf16.vlgmr.msrb.gmra.mxu3 %vm2260_vm2, %v9353_v6  ;;  %v7156_v45 = vld [vmem:[%s10272_s10 + $0x5a8] sm:$0xf0] }
 0x31d   : > { %4527 = vmatpush.bf16.msra.mxu2 %v6395_v48  ;;  %4536 = vmatpush.bf16.msra.mxu3 %v4183_v46  ;;  %v6563_v49 = vor.u32 %v7156_v45, %v6562_v50 }
 0x31e   : > { %4516 = vmatpush.bf16.msra.mxu1 %v6115_v59  ;;  %v4233_v33 = vpop.f32.mrf.mxu3 }
 0x31f   : > { %v10214_v53 = vadd.f32 %v4233_v33, %v4221_v56  ;;  %v4272_v36 = vpop.f32.mrf.mxu2 }
 0x320   : > { %4502 = vmatpush.bf16.msra.mxu0 %v5919_v3  ;;  %v4273_v38 = vadd.f32 %v4272_v36, %v4260_v29  ;;  %v4248_v39 = vpop.f32.mrf.mxu0 }
 0x321   : > { %4528 = vmatpush.bf16.msra.mxu2 %v6367_v4  ;;  %4537 = vmatpush.bf16.msra.mxu3 %v6703_v8  ;;  %v4556_v41 = vand.u32 2147483647, %v10214_v53 }
 0x322   : > { %4517 = vmatpush.bf16.msra.mxu1 %v6087_v11 }
 0x323   : > { %v4563_v42 = vsub.f32 0.0, %v4556_v41  ;;  %v7237_v41 = vld [vmem:[%s7557_s30] sm:$0xff] }
 0x324   : > { %4503 = vmatpush.bf16.msra.mxu0 %v5891_v15  ;;  %v4311_v43 = vpop.f32.mrf.mxu1 }
 0x325   : > { %4529 = vmatpush.bf16.msra.mxu2 %v6339_v7  ;;  %4538 = vmatpush.bf16.msra.mxu3 %v6675_v19  ;;  %v4570_v48 = vmul.f32 1.442695, %v4563_v42  ;;  %v4654_v42 = vmul.f32 %v7237_v41, %v10214_v53 }
 0x326   : > { %4518 = vmatmul.bf16.vlgmr.msra.gmra.mxu1 %v9239_v2  ;;  %v6590_v2 = vld [vmem:[%s10272_s10 + $0x5c8] sm:$0xf]  ;;  %v4235_v46 = vpop.f32.mrf.mxu3 }
 0x327   : > { %v6591_v44 = vor.u32 %v7163_v40, %v6590_v2  ;;  %7209 = vpow2.f32 %v4570_v48 }
 0x328   : > { %4504 = vmatpush.bf16.msra.mxu0 %v5863_v35  ;;  %v4298_v54 = vpop.f32.mrf.mxu0 }
 0x329   : > { %4530 = vmatpush.bf16.msra.mxu2 %v6311_v28  ;;  %4539 = vmatpush.bf16.msra.mxu3 %v6647_v17  ;;  %v4299_v56 = vadd.f32 %v4298_v54, %v3015_v47  ;;  %v4549_v28 = vmax.f32 %v10214_v53, 0.0 }
 0x32b   : > { %4505 = vmatmul.bf16.vlgmr.msra.gmra.mxu0 %v9266_v20  ;;  %v4274_v20 = vpop.f32.mrf.mxu2  ;;  %v4312_v60 = vadd.f32 %v4311_v43, %v4299_v56 }
 0x32c   : > { %4531 = vmatmul.bf16.vlgmr.msra.gmra.mxu2 %v9274_v24  ;;  %v6534_v24 = vld [vmem:[%s10272_s10 + $0x558] sm:$0xf]  ;;  %v4313_v58 = vpop.f32.mrf.mxu1 }
 0x32d   : > { %4540 = vmatpush.bf16.msra.mxu3 %v6619_v37  ;;  %v6535_v59 = vor.u32 %v7149_v52, %v6534_v24  ;;  %v7210_v1 = vpop.eup %7209 }
 0x32e   : > { %v4285_v61 = vpop.f32.mrf.mxu3  ;;  %v4584_v9 = vadd.f32 1.0, %v7210_v1  ;;  %v4587_v55 = vmul.f32 -0.5, %v7210_v1  ;;  %v4590_v19 = vand.u32 2147483647, %v7210_v1 }
 0x32f   : > { %v4286_v62 = vadd.f32 %v4285_v61, %v4273_v38 }
 0x330   : > { %v4300_v4 = vpop.f32.mrf.mxu0  ;;  %v4588_v15 = vadd.f32 1.0, %v4587_v55  ;;  %vm4591_vm4 = vcmp.lt.f32.partialorder %v4590_v19, 0.0004427343  ;;  %v3017_v55 = vperm.slane %v10072_v5, 4 }
 0x331   : > { %4541 = vmatpush.bf16.msra.mxu3 %v6591_v44  ;;  %v4557_v3 = vand.u32 2147483647, %v4286_v62  ;;  %v4550_v38 = vmax.f32 %v4286_v62, 0.0  ;;  %v7238_v44 = vld [vmem:[%s7557_s30 + $0x8] sm:$0xff] }
 0x332   : > { %v4589_v25 = vmul.f32 %v7210_v1, %v4588_v15  ;;  %v4655_v50 = vmul.f32 %v7238_v44, %v4286_v62  ;;  %v7239_v1 = vld [vmem:[%s7557_s30 + $0x10] sm:$0xff] }
 0x333   : > { %v4324_v63 = vpop.f32.mrf.mxu2  ;;  %v4564_v8 = vsub.f32 0.0, %v4557_v3 }
 0x334   : > { %v4325_v0 = vadd.f32 %v4324_v63, %v4312_v60 }
 0x335   : > { %4542 = vmatpush.bf16.msra.mxu3 %v6563_v49  ;;  %v4572_v18 = vmul.f32 1.442695, %v4564_v8 }
 0x336   : > { %v4287_v10 = vpop.f32.mrf.mxu3 }
 0x337   : > { %7211 = vpow2.f32 %v4572_v18 }
 0x338   : > { %7213 = vlog2.f32 %v4584_v9 }
 0x339   : > { %4543 = vmatpush.bf16.msra.mxu3 %v6535_v59 }
 0x33b   : > { %v4326_v11 = vpop.f32.mrf.mxu2 }
 0x33c   : > { %6710 = vmatmul.msk.bf16.vlgmr.msra.gmra.mxu3 %vm2260_vm2, %v9353_v6 }
 0x33d   : > { %v7212_v12 = vpop.eup %7211 }
 0x33e   : > { %v7214_v13 = vpop.eup %7213  ;;  %v4593_v14 = vadd.f32 1.0, %v7212_v12  ;;  %v4596_v16 = vmul.f32 -0.5, %v7212_v12  ;;  %v4599_v57 = vand.u32 2147483647, %v7212_v12 }
 0x33f   : > { %v4337_v7 = vpop.f32.mrf.mxu3  ;;  %v4586_v23 = vmul.f32 0.6931472, %v7214_v13 }
 0x340   : > { %7215 = vlog2.f32 %v4593_v14  ;;  %v4338_v21 = vadd.f32 %v4337_v7, %v4325_v0  ;;  %v4597_v26 = vadd.f32 1.0, %v4596_v16  ;;  %vm4600_vm5 = vcmp.lt.f32.partialorder %v4599_v57, 0.0004427343 }
 0x341   : > { %v4592_v30 = vsel %vm4591_vm4, %v4589_v25, %v4586_v23 }
 0x342   : > { %v4558_v6 = vand.u32 2147483647, %v4338_v21  ;;  %v4598_v32 = vmul.f32 %v7212_v12, %v4597_v26  ;;  %v4647_v37 = vadd.f32 %v4592_v30, %v4549_v28  ;;  %v4551_v63 = vmax.f32 %v4338_v21, 0.0 }
 0x343   : > { %v4656_v3 = vmul.f32 %v7239_v1, %v4338_v21 }
 0x344   : > { %v4363_v22 = vpop.f32.mrf.mxu1  ;;  %v4565_v27 = vsub.f32 0.0, %v4558_v6  ;;  %v4661_v45 = vsub.f32 %v4647_v37, %v4654_v42 }
 0x346   : > { %v7216_v35 = vpop.eup %7215  ;;  %v4574_v17 = vmul.f32 1.442695, %v4565_v27 }
 0x347   : > { %v4595_v31 = vmul.f32 0.6931472, %v7216_v35  ;;  %v4339_v36 = vpop.f32.mrf.mxu3 }
 0x348   : > { %v4350_v29 = vpop.f32.mrf.mxu0  ;;  %7217 = vpow2.f32 %v4574_v17 }
 0x349   : > { %v4351_v33 = vadd.f32 %v4350_v29, %v3016_v51  ;;  %v4601_v2 = vsel %vm4600_vm5, %v4598_v32, %v4595_v31  ;;  %v7240_v32 = vld [vmem:[%s7557_s30 + $0x18] sm:$0xff] }
 0x34a   : > { %v4648_v43 = vadd.f32 %v4601_v2, %v4550_v38 }
 0x34b   : > { %v4364_v40 = vadd.f32 %v4363_v22, %v4351_v33 }
 0x34c   : > { %v4365_v39 = vpop.f32.mrf.mxu1  ;;  %v4662_v46 = vsub.f32 %v4648_v43, %v4655_v50 }
 0x34e   : > { %v7218_v20 = vpop.eup %7217  ;;  %v4668_v49 = vadd.f32 %v4662_v46, %v4661_v45 }
 0x34f   : > { %v4376_v47 = vpop.f32.mrf.mxu2  ;;  %v4602_v52 = vadd.f32 1.0, %v7218_v20  ;;  %v4605_v54 = vmul.f32 -0.5, %v7218_v20  ;;  %v4608_v59 = vand.u32 2147483647, %v7218_v20 }
 0x350   : > { %v4377_v48 = vadd.f32 %v4376_v47, %v4364_v40  ;;  %v4352_v24 = vpop.f32.mrf.mxu0 }
 0x351   : > { %7219 = vlog2.f32 %v4602_v52  ;;  %v4606_v56 = vadd.f32 1.0, %v4605_v54  ;;  %vm4609_vm6 = vcmp.lt.f32.partialorder %v4608_v59, 0.0004427343  ;;  %v3018_v59 = vperm.slane %v10072_v5, 5 }
 0x353   : > { %v4607_v53 = vmul.f32 %v7218_v20, %v4606_v56 }
 0x357   : > { %v4378_v58 = vpop.f32.mrf.mxu2  ;;  %v7220_v60 = vpop.eup %7219 }
 0x358   : > { %v4604_v61 = vmul.f32 0.6931472, %v7220_v60 }
 0x35a   : > { %v4610_v62 = vsel %vm4609_vm6, %v4607_v53, %v4604_v61 }
 0x35b   : > { %v4649_v0 = vadd.f32 %v4610_v62, %v4551_v63  ;;  %v7241_v63 = vld [vmem:[%s7557_s30 + $0x20] sm:$0xff] }
 0x35d   : > { %v4663_v4 = vsub.f32 %v4649_v0, %v4656_v3 }
 0x35f   : > { %v4389_v8 = vpop.f32.mrf.mxu3  ;;  %v4669_v10 = vadd.f32 %v4668_v49, %v4663_v4 }
 0x360   : > { %v4390_v9 = vadd.f32 %v4389_v8, %v4377_v48 }
 0x362   : > { %v4559_v11 = vand.u32 2147483647, %v4390_v9  ;;  %v4552_v17 = vmax.f32 %v4390_v9, 0.0  ;;  %v4657_v33 = vmul.f32 %v7240_v32, %v4390_v9 }
 0x364   : > { %v4415_v18 = vpop.f32.mrf.mxu1  ;;  %v4566_v12 = vsub.f32 0.0, %v4559_v11 }
 0x366   : > { %v4576_v14 = vmul.f32 1.442695, %v4566_v12 }
 0x367   : > { %v4391_v16 = vpop.f32.mrf.mxu3 }
 0x368   : > { %v4402_v13 = vpop.f32.mrf.mxu0  ;;  %7221 = vpow2.f32 %v4576_v14 }
 0x369   : > { %v4403_v15 = vadd.f32 %v4402_v13, %v3017_v55 }
 0x36b   : > { %v4416_v19 = vadd.f32 %v4415_v18, %v4403_v15 }
 0x36c   : > { %v4417_v7 = vpop.f32.mrf.mxu1 }
 0x36d   : > { %v3019_v7 = vperm.slane %v10072_v5, 6 }
 0x36e   : > { %v7222_v6 = vpop.eup %7221 }
 0x36f   : > { %v4428_v22 = vpop.f32.mrf.mxu2  ;;  %v4611_v25 = vadd.f32 1.0, %v7222_v6  ;;  %v4614_v26 = vmul.f32 -0.5, %v7222_v6  ;;  %v4617_v27 = vand.u32 2147483647, %v7222_v6 }
 0x370   : > { %v4429_v23 = vadd.f32 %v4428_v22, %v4416_v19  ;;  %v4404_v21 = vpop.f32.mrf.mxu0 }
 0x371   : > { %7223 = vlog2.f32 %v4611_v25  ;;  %v4615_v51 = vadd.f32 1.0, %v4614_v26  ;;  %vm4618_vm7 = vcmp.lt.f32.partialorder %v4617_v27, 0.0004427343 }
 0x373   : > { %v4616_v28 = vmul.f32 %v7222_v6, %v4615_v51 }
 0x377   : > { %v4430_v57 = vpop.f32.mrf.mxu2  ;;  %v7224_v30 = vpop.eup %7223 }
 0x378   : > { %v4613_v35 = vmul.f32 0.6931472, %v7224_v30 }
 0x37a   : > { %v4619_v29 = vsel %vm4618_vm7, %v4616_v28, %v4613_v35 }
 0x37b   : > { %v4650_v31 = vadd.f32 %v4619_v29, %v4552_v17 }
 0x37d   : > { %v4664_v37 = vsub.f32 %v4650_v31, %v4657_v33 }
 0x37f   : > { %v4441_v36 = vpop.f32.mrf.mxu3  ;;  %v4670_v40 = vadd.f32 %v4669_v10, %v4664_v37 }
 0x380   : > { %v4442_v38 = vadd.f32 %v4441_v36, %v4429_v23 }
 0x382   : > { %v4560_v2 = vand.u32 2147483647, %v4442_v38  ;;  %v4553_v60 = vmax.f32 %v4442_v38, 0.0  ;;  %v4658_v62 = vmul.f32 %v7241_v63, %v4442_v38 }
 0x384   : > { %v4467_v39 = vpop.f32.mrf.mxu1  ;;  %v4567_v41 = vsub.f32 0.0, %v4560_v2 }
 0x386   : > { %v4578_v42 = vmul.f32 1.442695, %v4567_v41 }
 0x387   : > { %v4443_v44 = vpop.f32.mrf.mxu3 }
 0x388   : > { %v4454_v43 = vpop.f32.mrf.mxu0  ;;  %7225 = vpow2.f32 %v4578_v42  ;;  %v7242_v44 = vld [vmem:[%s7557_s30 + $0x28] sm:$0xff] }
 0x389   : > { %v4455_v0 = vadd.f32 %v4454_v43, %v3018_v59 }
 0x38b   : > { %v4468_v9 = vadd.f32 %v4467_v39, %v4455_v0 }
 0x38c   : > { %v4469_v50 = vpop.f32.mrf.mxu1 }
 0x38e   : > { %v7226_v46 = vpop.eup %7225 }
 0x38f   : > { %v4480_v45 = vpop.f32.mrf.mxu2  ;;  %v4620_v48 = vadd.f32 1.0, %v7226_v46  ;;  %v4623_v20 = vmul.f32 -0.5, %v7226_v46  ;;  %v4626_v52 = vand.u32 2147483647, %v7226_v46 }
 0x390   : > { %v4456_v47 = vpop.f32.mrf.mxu0  ;;  %v4481_v18 = vadd.f32 %v4480_v45, %v4468_v9 }
 0x391   : > { %7227 = vlog2.f32 %v4620_v48  ;;  %v4624_v49 = vadd.f32 1.0, %v4623_v20  ;;  %vm4627_vm8 = vcmp.lt.f32.partialorder %v4626_v52, 0.0004427343 }
 0x393   : > { %v4625_v58 = vmul.f32 %v7226_v46, %v4624_v49 }
 0x397   : > { %v4482_v24 = vpop.f32.mrf.mxu2  ;;  %v7228_v54 = vpop.eup %7227 }
 0x398   : > { %v4622_v56 = vmul.f32 0.6931472, %v7228_v54  ;;  %v7243_v24 = vld [vmem:[%s7557_s30 + $0x30] sm:$0xff] }
 0x39a   : > { %v4628_v61 = vsel %vm4627_vm8, %v4625_v58, %v4622_v56 }
 0x39b   : > { %v4651_v53 = vadd.f32 %v4628_v61, %v4553_v60 }
 0x39d   : > { %v4665_v3 = vsub.f32 %v4651_v53, %v4658_v62 }
 0x39f   : > { %v4493_v1 = vpop.f32.mrf.mxu3  ;;  %v4671_v8 = vadd.f32 %v4670_v40, %v4665_v3 }
 0x3a0   : > { %v4494_v11 = vadd.f32 %v4493_v1, %v4481_v18 }
 0x3a2   : > { %v4561_v13 = vand.u32 2147483647, %v4494_v11  ;;  %v4554_v2 = vmax.f32 %v4494_v11, 0.0  ;;  %v4659_v50 = vmul.f32 %v7242_v44, %v4494_v11 }
 0x3a3   : > { %v4519_v4 = vpop.f32.mrf.mxu1 }
 0x3a4   : > { %v4568_v16 = vsub.f32 0.0, %v4561_v13 }
 0x3a6   : > { %v4580_v19 = vmul.f32 1.442695, %v4568_v16 }
 0x3a7   : > { %v4495_v55 = vpop.f32.mrf.mxu3 }
 0x3a8   : > { %v4506_v10 = vpop.f32.mrf.mxu0  ;;  %7229 = vpow2.f32 %v4580_v19 }
 0x3a9   : > { %v4507_v23 = vadd.f32 %v4506_v10, %v3019_v7 }
 0x3ab   : > { %v4521_v12 = vpop.f32.mrf.mxu1  ;;  %v4520_v21 = vadd.f32 %v4519_v4, %v4507_v23 }
 0x3ae   : > { %v7230_v25 = vpop.eup %7229 }
 0x3af   : > { %v4532_v14 = vpop.f32.mrf.mxu2  ;;  %v4629_v27 = vadd.f32 1.0, %v7230_v25  ;;  %v4632_v17 = vmul.f32 -0.5, %v7230_v25  ;;  %v4635_v32 = vand.u32 2147483647, %v7230_v25 }
 0x3b0   : > { %v4508_v15 = vpop.f32.mrf.mxu0  ;;  %v4533_v6 = vadd.f32 %v4532_v14, %v4520_v21 }
 0x3b1   : > { %7231 = vlog2.f32 %v4629_v27  ;;  %v4633_v5 = vadd.f32 1.0, %v4632_v17  ;;  %vm4636_vm9 = vcmp.lt.f32.partialorder %v4635_v32, 0.0004427343 }
 0x3b3   : > { %v4634_v38 = vmul.f32 %v7230_v25, %v4633_v5 }
 0x3b7   : > { %v4534_v22 = vpop.f32.mrf.mxu2  ;;  %v7232_v29 = vpop.eup %7231 }
 0x3b8   : > { %v4631_v33 = vmul.f32 0.6931472, %v7232_v29 }
 0x3ba   : > { %v4637_v39 = vsel %vm4636_vm9, %v4634_v38, %v4631_v33 }
 0x3bb   : > { %v4652_v42 = vadd.f32 %v4637_v39, %v4554_v2 }
 0x3bd   : > { %v4666_v20 = vsub.f32 %v4652_v42, %v4659_v50 }
 0x3bf   : > { %v4545_v26 = vpop.f32.mrf.mxu3  ;;  %v4672_v56 = vadd.f32 %v4671_v8, %v4666_v20 }
 0x3c0   : > { %v4546_v51 = vadd.f32 %v4545_v26, %v4533_v6 }
 0x3c2   : > { %v4562_v57 = vand.u32 2147483647, %v4546_v51  ;;  %v4555_v47 = vmax.f32 %v4546_v51, 0.0  ;;  %v4660_v52 = vmul.f32 %v7243_v24, %v4546_v51 }
 0x3c4   : > { %v4569_v30 = vsub.f32 0.0, %v4562_v57 }
 0x3c6   : > { %v4582_v35 = vmul.f32 1.442695, %v4569_v30 }
 0x3c7   : > { %v4547_v28 = vpop.f32.mrf.mxu3 }
 0x3c8   : > { %7233 = vpow2.f32 %v4582_v35 }
 0x3ce   : > { %v7234_v31 = vpop.eup %7233 }
 0x3cf   : > { %v4638_v36 = vadd.f32 1.0, %v7234_v31  ;;  %v4641_v37 = vmul.f32 -0.5, %v7234_v31  ;;  %v4644_v41 = vand.u32 2147483647, %v7234_v31 }
 0x3d1   : > { %7235 = vlog2.f32 %v4638_v36  ;;  %v4642_v40 = vadd.f32 1.0, %v4641_v37  ;;  %vm4645_vm10 = vcmp.lt.f32.partialorder %v4644_v41, 0.0004427343 }
 0x3d3   : > { %v4643_v46 = vmul.f32 %v7234_v31, %v4642_v40 }
 0x3d7   : > { %v7236_v43 = vpop.eup %7235 }
 0x3d8   : > { %v4640_v45 = vmul.f32 0.6931472, %v7236_v43 }
 0x3da   : > { %v4646_v48 = vsel %vm4645_vm10, %v4643_v46, %v4640_v45 }
 0x3db   : > { %v4653_v49 = vadd.f32 %v4646_v48, %v4555_v47 }
 0x3dd   : > { %v4667_v54 = vsub.f32 %v4653_v49, %v4660_v52 }
 0x3df   : > { %v4673_v58 = vsel %vm1628_vm0, %v4667_v54, 0.0 }
 0x3e0   : > { %v4674_v59 = vadd.f32 %v4673_v58, %v4672_v56 }
 0x3e2   : > { %4675 = vadd.xlane.f32.xlu0 %v4674_v59 }
 0x3ea   : > { %4695 = vadd.xlane.f32.xlu0 %v8947_v34 }
 0x455   : > { %v4676_v60 = vpop.xlane.xlu0 %4675 }
 0x456   : > { %v4678_v61 = vsel %vm4677_vm11, %v4676_v60, 0.0 }
 0x457   : > { %4679 = vadd.xlane.f32.xlu1 %v4678_v61 }
 0x45d   : > { %v4696_v53 = vpop.xlane.xlu0 %4695 }
 0x45e   : > { %v4697_v63 = vsel %vm4677_vm11, %v4696_v53, 0.0 }
 0x45f   : > { %4698 = vadd.xlane.f32.xlu1 %v4697_v63 }
 0x4ca   : > { %v4680_v62 = vpop.xlane.xlu1 %4679 }
 0x4cb   : > { %v4681_v0 = vrot.slane %v4680_v62, 4 }
 0x4cd   : > { %v4682_v1 = vadd.f32 %v4681_v0, %v4680_v62 }
 0x4cf   : > { %v4683_v3 = vrot.slane %v4682_v1, 2 }
 0x4d1   : > { %v4684_v4 = vadd.f32 %v4683_v3, %v4682_v1 }
 0x4d2   : > { %v4699_v8 = vpop.xlane.xlu1 %4698 }
 0x4d3   : > { %v4700_v9 = vrot.slane %v4699_v8, 4  ;;  %v4685_v18 = vrot.slane %v4684_v4, 1 }
 0x4d5   : > { %v4701_v10 = vadd.f32 %v4700_v9, %v4699_v8  ;;  %v4686_v11 = vadd.f32 %v4685_v18, %v4684_v4 }
 0x4d7   : > { %v4702_v55 = vrot.slane %v4701_v10, 2  ;;  %7193 = vpush %v4686_v11 }
 0x4d9   : > { %v4703_v34 = vadd.f32 %v4702_v55, %v4701_v10 }
 0x4db   : > { %v4704_v12 = vrot.slane %v4703_v34, 1 }
 0x4dd   : > { %v4705_v13 = vadd.f32 %v4704_v12, %v4703_v34 }
 0x4df   : > { %7195 = vpush %v4705_v13 }
 0x508   : > { %s7194_s30 = spop %7193 }
 0x510   : > { %s7196_s15 = spop %7195 }
 0x511   : > { %s4707_s14 = smul.f32 -0.5, %s7196_s15 }
 0x513   : > { %s4708_s29 = sadd.f32 %s7194_s30, %s4707_s14 }
 0x515   : > { %v4709_v14 = vstv %s4708_s29 }
 0x516   : > { %4711 = vst.msk [vmem:[%s426_s28] sm:$0x1] %vm4710_vm12, %v4709_v14 }
 0x517 PF: > { %s22_s21 = sadd.s32 1, %s7250_s21  }
 0x518   : > { %p19_p4 = scmp.ge.s32.totalorder %s22_s21, 6  }
 0x51a   :  { %21 = sbr.rel (!%p19_p4) target bundleno = 1 (0x1), region = 101 }

</bundles_post_ra>
